<compile_context>
chip_gen: v5e
topology: v5e:2x2
jax: 0.10.0
libtpu: 0.0.40
codegen_flags: <defaults>
</compile_context>

<pallas_src>
import jax
import jax.numpy as jnp
from jax import lax
from jax.experimental import pallas as pl
from jax.experimental.pallas import tpu as pltpu

_NUM_SQUARINGS = 15   # effective 2^15 power-iteration steps, only ~30 matmuls
_MAX_TILE_M = 256     # row-tile for the Gram accumulation (multiple of 8/256)
_TINY = 1e-30


def _cond_number_kernel(a_ref, out_ref, g_ref):
    # a_ref: (tile_m, n) f32 VMEM block of the (possibly zero-padded) matrix
    # out_ref: (1,) f32 SMEM scalar output
    # g_ref: (n, n) f32 VMEM scratch accumulating the Gram matrix
    i = pl.program_id(0)

    @pl.when(i == 0)
    def _init():
        g_ref[...] = jnp.zeros_like(g_ref)
        out_ref[0] = jnp.float32(0.0)

    a = a_ref[...]
    # A_chunk^T A_chunk without an explicit (XLU) transpose: contract axis 0
    # of both operands directly on the MXU.
    g_ref[...] += lax.dot_general(
        a, a,
        dimension_numbers=(((0,), (0,)), ((), ())),
        preferred_element_type=jnp.float32,
    )

    @pl.when(i == pl.num_programs(0) - 1)
    def _finalize():
        g = g_ref[...]
        n = g.shape[0]

        # Gershgorin / infinity-norm upper bound on lambda_max(G). Using this
        # (instead of the estimated lambda_max) as the shift decouples the two
        # eigen-problems so their matmul chains run concurrently.
        row_sums = jnp.sum(jnp.abs(g), axis=1, keepdims=True)        # (n, 1)
        s = jnp.maximum(jnp.max(row_sums), _TINY)                    # scalar

        eye = jnp.eye(n, dtype=jnp.float32)
        h = s * eye - g   # PSD; dominant eigenvalue = s - lambda_min(G)

        def _normalized(mat):
            # Rescale by max-abs so repeated squaring never over/underflows.
            # Accuracy of the scale is irrelevant (only the direction matters),
            # so the approximate EUP reciprocal is free.
            mx = jnp.max(jnp.abs(mat), keepdims=True)                # (1, 1)
            return mat * pl.reciprocal(mx + 1e-37, approx=True)

        bg = _normalized(g)
        bh = _normalized(h)
        # Repeated squaring: B^(2^k) concentrates every column onto the
        # dominant eigen-direction. Two independent chains, fully unrolled.
        for _ in range(_NUM_SQUARINGS):
            bg = _normalized(jnp.dot(bg, bg, preferred_element_type=jnp.float32))
            bh = _normalized(jnp.dot(bh, bh, preferred_element_type=jnp.float32))

        def _rayleigh_max(mat, vblock):
            # Lane-dense: score all n candidate columns with one matmul.
            w = jnp.dot(mat, vblock, preferred_element_type=jnp.float32)
            num = jnp.sum(vblock * w, axis=0, keepdims=True)         # (1, n)
            den = jnp.sum(vblock * vblock, axis=0, keepdims=True)    # (1, n)
            return jnp.max(num / (den + 1e-37))

        lam_max = jnp.maximum(_rayleigh_max(g, bg), _TINY)
        mu_max = _rayleigh_max(h, bh)                 # ~ s - lambda_min
        lam_min = jnp.maximum(s - mu_max, _TINY)

        out_ref[0] = jnp.sqrt(lam_max / lam_min)


def matrix_condition_number(matrix: jax.Array) -> jax.Array:
    """Condition number (sigma_max / sigma_min) of a 2-D matrix."""
    matrix = jnp.asarray(matrix, jnp.float32)
    if matrix.ndim != 2:
        raise ValueError("expected a 2-D matrix")
    m, n = matrix.shape
    # Work with the tall orientation so the Gram matrix has size min(M,N):
    # singular values are transpose-invariant, and this matches torch's S[-1].
    if m < n:
        matrix = matrix.T
        m, n = n, m

    tile_m = min(m, _MAX_TILE_M)
    pad = (-m) % tile_m
    if pad:
        # Zero rows contribute nothing to A^T A.
        matrix = jnp.concatenate(
            [matrix, jnp.zeros((pad, n), jnp.float32)], axis=0)
    num_tiles = (m + pad) // tile_m

    out = pl.pallas_call(
        _cond_number_kernel,
        out_shape=jax.ShapeDtypeStruct((1,), jnp.float32),
        grid=(num_tiles,),
        in_specs=[pl.BlockSpec((tile_m, n), lambda i: (i, 0))],
        out_specs=pl.BlockSpec(memory_space=pltpu.SMEM),
        scratch_shapes=[pltpu.VMEM((n, n), jnp.float32)],
        compiler_params=pltpu.CompilerParams(
            dimension_semantics=("arbitrary",)),
    )(matrix)
    return out[0]


if __name__ == "__main__":
    M, N = 512, 32  # exercises the tiled Gram accumulation (grid of 2 tiles)
    key = jax.random.PRNGKey(0)
    k1, k2 = jax.random.split(key)

    # Deterministic test matrix with controlled spectrum: A = Q1 diag(s) Q2^T,
    # singular values linspace(10, 1, N)  ->  cond(A) = 10.
    q1, _ = jnp.linalg.qr(jax.random.normal(k1, (M, N), dtype=jnp.float32))
    q2, _ = jnp.linalg.qr(jax.random.normal(k2, (N, N), dtype=jnp.float32))
    s = jnp.linspace(10.0, 1.0, N, dtype=jnp.float32)
    matrix = (q1 * s[None, :]) @ q2.T  # (M, N) f32, cond = 10

    cond_tall = jax.block_until_ready(matrix_condition_number(matrix))
    cond_wide = jax.block_until_ready(matrix_condition_number(matrix.T))  # M < N path

    expected = 10.0
    assert jnp.isfinite(cond_tall) and cond_tall > 0.0
    assert jnp.isfinite(cond_wide) and cond_wide > 0.0
    assert abs(float(cond_tall) - expected) / expected < 0.02, float(cond_tall)
    assert abs(float(cond_wide) - expected) / expected < 0.02, float(cond_wide)
    print("KERNEL_OK")
</pallas_src>

<mosaic_0001>
module attributes {stable_mosaic.version = 11 : i64} {
  func.func @_cond_number_kernel(%arg0: i32, %arg1: memref<256x32xf32, #tpu.memory_space<vmem>>, %arg2: memref<1xf32, #tpu.memory_space<smem>>, %arg3: memref<32x32xf32, #tpu.memory_space<vmem>>) attributes {dimension_semantics = [#tpu.dimension_semantics<arbitrary>], iteration_bounds = array<i64: 2>, scalar_prefetch = 0 : i64, scratch_operands = 1 : i64, tpu.core_type = #tpu.core_type<tc>, window_params = [{transform_indices = @transform_0, window_bounds = array<i64: 256, 32>}, {transform_indices = @transform_1, window_bounds = array<i64: 1>}]} {
    %c0_i32 = arith.constant 0 : i32
    %0 = arith.cmpi eq, %arg0, %c0_i32 : i32
    %1 = arith.extui %0 : i1 to i32
    %c0_i32_0 = arith.constant 0 : i32
    %2 = arith.cmpi ne, %1, %c0_i32_0 : i32
    scf.if %2 {
      %cst_7 = arith.constant 0.000000e+00 : f32
      %11 = vector.broadcast %cst_7 : f32 to vector<32x32xf32>
      %c0_8 = arith.constant 0 : index
      %c0_9 = arith.constant 0 : index
      %12 = vector.load %arg3[%c0_8, %c0_9] : memref<32x32xf32, #tpu.memory_space<vmem>>, vector<32x32xf32>
      tpu.vector_store %arg3[%c0_8, %c0_9], %11 {strides = array<i32>} : memref<32x32xf32, #tpu.memory_space<vmem>>, vector<32x32xf32>,
      %cst_10 = arith.constant 0.000000e+00 : f32
      %c0_11 = arith.constant 0 : index
      %13 = memref.load %arg2[%c0_11] : memref<1xf32, #tpu.memory_space<smem>>
      memref.store %cst_10, %arg2[%c0_11] : memref<1xf32, #tpu.memory_space<smem>>
    } else {
    }
    %c0 = arith.constant 0 : index
    %c0_1 = arith.constant 0 : index
    %3 = vector.load %arg1[%c0, %c0_1] : memref<256x32xf32, #tpu.memory_space<vmem>>, vector<256x32xf32>
    %c0_2 = arith.constant 0 : index
    %c0_3 = arith.constant 0 : index
    %4 = vector.load %arg3[%c0_2, %c0_3] : memref<32x32xf32, #tpu.memory_space<vmem>>, vector<32x32xf32>
    %cst = arith.constant dense<0.000000e+00> : vector<32x32xf32>
    %5 = tpu.matmul %3, %3, %cst {dimension_numbers = #tpu.dot_dimension_numbers<[0], [0], [1], [1], [0, 1, 1, 1], [], []>} : vector<256x32xf32>, vector<256x32xf32>, vector<32x32xf32> -> vector<32x32xf32>
    %6 = arith.addf %4, %5 : vector<32x32xf32>
    %c0_4 = arith.constant 0 : index
    %c0_5 = arith.constant 0 : index
    %7 = vector.load %arg3[%c0_4, %c0_5] : memref<32x32xf32, #tpu.memory_space<vmem>>, vector<32x32xf32>
    tpu.vector_store %arg3[%c0_4, %c0_5], %6 {strides = array<i32>} : memref<32x32xf32, #tpu.memory_space<vmem>>, vector<32x32xf32>,
    %c1_i32 = arith.constant 1 : i32
    %8 = arith.cmpi eq, %arg0, %c1_i32 : i32
    %9 = arith.extui %8 : i1 to i32
    %c0_i32_6 = arith.constant 0 : i32
    %10 = arith.cmpi ne, %9, %c0_i32_6 : i32
    scf.if %10 {
      %c0_7 = arith.constant 0 : index
      %c0_8 = arith.constant 0 : index
      %11 = vector.load %arg3[%c0_7, %c0_8] : memref<32x32xf32, #tpu.memory_space<vmem>>, vector<32x32xf32>
      %12 = math.absf %11 : vector<32x32xf32>
      %cst_9 = arith.constant dense<0.000000e+00> : vector<32xf32>
      %13 = vector.multi_reduction <add>, %12, %cst_9 [1] : vector<32x32xf32> to vector<32xf32>
      %14 = vector.shape_cast %13 : vector<32xf32> to vector<32x1xf32>
      %15 = vector.shape_cast %14 : vector<32x1xf32> to vector<1x32x1xf32>
      %cst_10 = arith.constant dense<0xFF800000> : vector<1xf32>
      %16 = vector.multi_reduction <maximumf>, %15, %cst_10 [1, 2] : vector<1x32x1xf32> to vector<1xf32>
      %17 = vector.shape_cast %16 : vector<1xf32> to vector<1x1x1xf32>
      %18 = vector.extract %17[0, 0, 0] : f32 from vector<1x1x1xf32>
      %cst_11 = arith.constant 1.000000e-30 : f32
      %19 = arith.maximumf %18, %cst_11 : f32
      %20 = tpu.iota {dimensions = array<i32: 0>} : vector<32x32xi32>
      %21 = tpu.iota {dimensions = array<i32: 1>} : vector<32x32xi32>
      %c0_i32_12 = arith.constant 0 : i32
      %22 = vector.broadcast %c0_i32_12 : i32 to vector<32x32xi32>
      %23 = arith.addi %20, %22 : vector<32x32xi32>
      %24 = arith.cmpi eq, %23, %21 : vector<32x32xi32>
      %25 = arith.extui %24 : vector<32x32xi1> to vector<32x32xi32>
      %26 = arith.sitofp %25 : vector<32x32xi32> to vector<32x32xf32>
      %27 = vector.broadcast %19 : f32 to vector<32x32xf32>
      %28 = arith.mulf %27, %26 : vector<32x32xf32>
      %29 = arith.subf %28, %11 : vector<32x32xf32>
      %30 = math.absf %11 : vector<32x32xf32>
      %31 = vector.shape_cast %30 : vector<32x32xf32> to vector<1x32x32xf32>
      %cst_13 = arith.constant dense<0xFF800000> : vector<1xf32>
      %32 = vector.multi_reduction <maximumf>, %31, %cst_13 [1, 2] : vector<1x32x32xf32> to vector<1xf32>
      %33 = vector.shape_cast %32 : vector<1xf32> to vector<1x1x1xf32>
      %34 = vector.extract %33[0, 0, 0] : f32 from vector<1x1x1xf32>
      %35 = vector.broadcast %34 : f32 to vector<1x1xf32>
      %cst_14 = arith.constant 9.99999991E-38 : f32
      %36 = vector.broadcast %cst_14 : f32 to vector<1x1xf32>
      %37 = arith.addf %35, %36 : vector<1x1xf32>
      %38 = tpu.reciprocal %37 {approx = true} : vector<1x1xf32> -> vector<1x1xf32>
      %39 = vector.broadcast %38 : vector<1x1xf32> to vector<32x32xf32>
      %40 = arith.mulf %11, %39 : vector<32x32xf32>
      %41 = math.absf %29 : vector<32x32xf32>
      %42 = vector.shape_cast %41 : vector<32x32xf32> to vector<1x32x32xf32>
      %cst_15 = arith.constant dense<0xFF800000> : vector<1xf32>
      %43 = vector.multi_reduction <maximumf>, %42, %cst_15 [1, 2] : vector<1x32x32xf32> to vector<1xf32>
      %44 = vector.shape_cast %43 : vector<1xf32> to vector<1x1x1xf32>
      %45 = vector.extract %44[0, 0, 0] : f32 from vector<1x1x1xf32>
      %46 = vector.broadcast %45 : f32 to vector<1x1xf32>
      %cst_16 = arith.constant 9.99999991E-38 : f32
      %47 = vector.broadcast %cst_16 : f32 to vector<1x1xf32>
      %48 = arith.addf %46, %47 : vector<1x1xf32>
      %49 = tpu.reciprocal %48 {approx = true} : vector<1x1xf32> -> vector<1x1xf32>
      %50 = vector.broadcast %49 : vector<1x1xf32> to vector<32x32xf32>
      %51 = arith.mulf %29, %50 : vector<32x32xf32>
      %cst_17 = arith.constant dense<0.000000e+00> : vector<32x32xf32>
      %52 = tpu.matmul %40, %40, %cst_17 {dimension_numbers = #tpu.dot_dimension_numbers<[1], [0], [0], [1], [0, 0, 1, 1], [], []>} : vector<32x32xf32>, vector<32x32xf32>, vector<32x32xf32> -> vector<32x32xf32>
      %53 = math.absf %52 : vector<32x32xf32>
      %54 = vector.shape_cast %53 : vector<32x32xf32> to vector<1x32x32xf32>
      %cst_18 = arith.constant dense<0xFF800000> : vector<1xf32>
      %55 = vector.multi_reduction <maximumf>, %54, %cst_18 [1, 2] : vector<1x32x32xf32> to vector<1xf32>
      %56 = vector.shape_cast %55 : vector<1xf32> to vector<1x1x1xf32>
      %57 = vector.extract %56[0, 0, 0] : f32 from vector<1x1x1xf32>
      %58 = vector.broadcast %57 : f32 to vector<1x1xf32>
      %cst_19 = arith.constant 9.99999991E-38 : f32
      %59 = vector.broadcast %cst_19 : f32 to vector<1x1xf32>
      %60 = arith.addf %58, %59 : vector<1x1xf32>
      %61 = tpu.reciprocal %60 {approx = true} : vector<1x1xf32> -> vector<1x1xf32>
      %62 = vector.broadcast %61 : vector<1x1xf32> to vector<32x32xf32>
      %63 = arith.mulf %52, %62 : vector<32x32xf32>
      %cst_20 = arith.constant dense<0.000000e+00> : vector<32x32xf32>
      %64 = tpu.matmul %51, %51, %cst_20 {dimension_numbers = #tpu.dot_dimension_numbers<[1], [0], [0], [1], [0, 0, 1, 1], [], []>} : vector<32x32xf32>, vector<32x32xf32>, vector<32x32xf32> -> vector<32x32xf32>
      %65 = math.absf %64 : vector<32x32xf32>
      %66 = vector.shape_cast %65 : vector<32x32xf32> to vector<1x32x32xf32>
      %cst_21 = arith.constant dense<0xFF800000> : vector<1xf32>
      %67 = vector.multi_reduction <maximumf>, %66, %cst_21 [1, 2] : vector<1x32x32xf32> to vector<1xf32>
      %68 = vector.shape_cast %67 : vector<1xf32> to vector<1x1x1xf32>
      %69 = vector.extract %68[0, 0, 0] : f32 from vector<1x1x1xf32>
      %70 = vector.broadcast %69 : f32 to vector<1x1xf32>
      %cst_22 = arith.constant 9.99999991E-38 : f32
      %71 = vector.broadcast %cst_22 : f32 to vector<1x1xf32>
      %72 = arith.addf %70, %71 : vector<1x1xf32>
      %73 = tpu.reciprocal %72 {approx = true} : vector<1x1xf32> -> vector<1x1xf32>
      %74 = vector.broadcast %73 : vector<1x1xf32> to vector<32x32xf32>
      %75 = arith.mulf %64, %74 : vector<32x32xf32>
      %cst_23 = arith.constant dense<0.000000e+00> : vector<32x32xf32>
      %76 = tpu.matmul %63, %63, %cst_23 {dimension_numbers = #tpu.dot_dimension_numbers<[1], [0], [0], [1], [0, 0, 1, 1], [], []>} : vector<32x32xf32>, vector<32x32xf32>, vector<32x32xf32> -> vector<32x32xf32>
      %77 = math.absf %76 : vector<32x32xf32>
      %78 = vector.shape_cast %77 : vector<32x32xf32> to vector<1x32x32xf32>
      %cst_24 = arith.constant dense<0xFF800000> : vector<1xf32>
      %79 = vector.multi_reduction <maximumf>, %78, %cst_24 [1, 2] : vector<1x32x32xf32> to vector<1xf32>
      %80 = vector.shape_cast %79 : vector<1xf32> to vector<1x1x1xf32>
      %81 = vector.extract %80[0, 0, 0] : f32 from vector<1x1x1xf32>
      %82 = vector.broadcast %81 : f32 to vector<1x1xf32>
      %cst_25 = arith.constant 9.99999991E-38 : f32
      %83 = vector.broadcast %cst_25 : f32 to vector<1x1xf32>
      %84 = arith.addf %82, %83 : vector<1x1xf32>
      %85 = tpu.reciprocal %84 {approx = true} : vector<1x1xf32> -> vector<1x1xf32>
      %86 = vector.broadcast %85 : vector<1x1xf32> to vector<32x32xf32>
      %87 = arith.mulf %76, %86 : vector<32x32xf32>
      %cst_26 = arith.constant dense<0.000000e+00> : vector<32x32xf32>
      %88 = tpu.matmul %75, %75, %cst_26 {dimension_numbers = #tpu.dot_dimension_numbers<[1], [0], [0], [1], [0, 0, 1, 1], [], []>} : vector<32x32xf32>, vector<32x32xf32>, vector<32x32xf32> -> vector<32x32xf32>
      %89 = math.absf %88 : vector<32x32xf32>
      %90 = vector.shape_cast %89 : vector<32x32xf32> to vector<1x32x32xf32>
      %cst_27 = arith.constant dense<0xFF800000> : vector<1xf32>
      %91 = vector.multi_reduction <maximumf>, %90, %cst_27 [1, 2] : vector<1x32x32xf32> to vector<1xf32>
      %92 = vector.shape_cast %91 : vector<1xf32> to vector<1x1x1xf32>
      %93 = vector.extract %92[0, 0, 0] : f32 from vector<1x1x1xf32>
      %94 = vector.broadcast %93 : f32 to vector<1x1xf32>
      %cst_28 = arith.constant 9.99999991E-38 : f32
      %95 = vector.broadcast %cst_28 : f32 to vector<1x1xf32>
      %96 = arith.addf %94, %95 : vector<1x1xf32>
      %97 = tpu.reciprocal %96 {approx = true} : vector<1x1xf32> -> vector<1x1xf32>
      %98 = vector.broadcast %97 : vector<1x1xf32> to vector<32x32xf32>
      %99 = arith.mulf %88, %98 : vector<32x32xf32>
      %cst_29 = arith.constant dense<0.000000e+00> : vector<32x32xf32>
      %100 = tpu.matmul %87, %87, %cst_29 {dimension_numbers = #tpu.dot_dimension_numbers<[1], [0], [0], [1], [0, 0, 1, 1], [], []>} : vector<32x32xf32>, vector<32x32xf32>, vector<32x32xf32> -> vector<32x32xf32>
      %101 = math.absf %100 : vector<32x32xf32>
      %102 = vector.shape_cast %101 : vector<32x32xf32> to vector<1x32x32xf32>
      %cst_30 = arith.constant dense<0xFF800000> : vector<1xf32>
      %103 = vector.multi_reduction <maximumf>, %102, %cst_30 [1, 2] : vector<1x32x32xf32> to vector<1xf32>
      %104 = vector.shape_cast %103 : vector<1xf32> to vector<1x1x1xf32>
      %105 = vector.extract %104[0, 0, 0] : f32 from vector<1x1x1xf32>
      %106 = vector.broadcast %105 : f32 to vector<1x1xf32>
      %cst_31 = arith.constant 9.99999991E-38 : f32
      %107 = vector.broadcast %cst_31 : f32 to vector<1x1xf32>
      %108 = arith.addf %106, %107 : vector<1x1xf32>
      %109 = tpu.reciprocal %108 {approx = true} : vector<1x1xf32> -> vector<1x1xf32>
      %110 = vector.broadcast %109 : vector<1x1xf32> to vector<32x32xf32>
      %111 = arith.mulf %100, %110 : vector<32x32xf32>
      %cst_32 = arith.constant dense<0.000000e+00> : vector<32x32xf32>
      %112 = tpu.matmul %99, %99, %cst_32 {dimension_numbers = #tpu.dot_dimension_numbers<[1], [0], [0], [1], [0, 0, 1, 1], [], []>} : vector<32x32xf32>, vector<32x32xf32>, vector<32x32xf32> -> vector<32x32xf32>
      %113 = math.absf %112 : vector<32x32xf32>
      %114 = vector.shape_cast %113 : vector<32x32xf32> to vector<1x32x32xf32>
      %cst_33 = arith.constant dense<0xFF800000> : vector<1xf32>
      %115 = vector.multi_reduction <maximumf>, %114, %cst_33 [1, 2] : vector<1x32x32xf32> to vector<1xf32>
      %116 = vector.shape_cast %115 : vector<1xf32> to vector<1x1x1xf32>
      %117 = vector.extract %116[0, 0, 0] : f32 from vector<1x1x1xf32>
      %118 = vector.broadcast %117 : f32 to vector<1x1xf32>
      %cst_34 = arith.constant 9.99999991E-38 : f32
      %119 = vector.broadcast %cst_34 : f32 to vector<1x1xf32>
      %120 = arith.addf %118, %119 : vector<1x1xf32>
      %121 = tpu.reciprocal %120 {approx = true} : vector<1x1xf32> -> vector<1x1xf32>
      %122 = vector.broadcast %121 : vector<1x1xf32> to vector<32x32xf32>
      %123 = arith.mulf %112, %122 : vector<32x32xf32>
      %cst_35 = arith.constant dense<0.000000e+00> : vector<32x32xf32>
      %124 = tpu.matmul %111, %111, %cst_35 {dimension_numbers = #tpu.dot_dimension_numbers<[1], [0], [0], [1], [0, 0, 1, 1], [], []>} : vector<32x32xf32>, vector<32x32xf32>, vector<32x32xf32> -> vector<32x32xf32>
      %125 = math.absf %124 : vector<32x32xf32>
      %126 = vector.shape_cast %125 : vector<32x32xf32> to vector<1x32x32xf32>
      %cst_36 = arith.constant dense<0xFF800000> : vector<1xf32>
      %127 = vector.multi_reduction <maximumf>, %126, %cst_36 [1, 2] : vector<1x32x32xf32> to vector<1xf32>
      %128 = vector.shape_cast %127 : vector<1xf32> to vector<1x1x1xf32>
      %129 = vector.extract %128[0, 0, 0] : f32 from vector<1x1x1xf32>
      %130 = vector.broadcast %129 : f32 to vector<1x1xf32>
      %cst_37 = arith.constant 9.99999991E-38 : f32
      %131 = vector.broadcast %cst_37 : f32 to vector<1x1xf32>
      %132 = arith.addf %130, %131 : vector<1x1xf32>
      %133 = tpu.reciprocal %132 {approx = true} : vector<1x1xf32> -> vector<1x1xf32>
      %134 = vector.broadcast %133 : vector<1x1xf32> to vector<32x32xf32>
      %135 = arith.mulf %124, %134 : vector<32x32xf32>
      %cst_38 = arith.constant dense<0.000000e+00> : vector<32x32xf32>
      %136 = tpu.matmul %123, %123, %cst_38 {dimension_numbers = #tpu.dot_dimension_numbers<[1], [0], [0], [1], [0, 0, 1, 1], [], []>} : vector<32x32xf32>, vector<32x32xf32>, vector<32x32xf32> -> vector<32x32xf32>
      %137 = math.absf %136 : vector<32x32xf32>
      %138 = vector.shape_cast %137 : vector<32x32xf32> to vector<1x32x32xf32>
      %cst_39 = arith.constant dense<0xFF800000> : vector<1xf32>
      %139 = vector.multi_reduction <maximumf>, %138, %cst_39 [1, 2] : vector<1x32x32xf32> to vector<1xf32>
      %140 = vector.shape_cast %139 : vector<1xf32> to vector<1x1x1xf32>
      %141 = vector.extract %140[0, 0, 0] : f32 from vector<1x1x1xf32>
      %142 = vector.broadcast %141 : f32 to vector<1x1xf32>
      %cst_40 = arith.constant 9.99999991E-38 : f32
      %143 = vector.broadcast %cst_40 : f32 to vector<1x1xf32>
      %144 = arith.addf %142, %143 : vector<1x1xf32>
      %145 = tpu.reciprocal %144 {approx = true} : vector<1x1xf32> -> vector<1x1xf32>
      %146 = vector.broadcast %145 : vector<1x1xf32> to vector<32x32xf32>
      %147 = arith.mulf %136, %146 : vector<32x32xf32>
      %cst_41 = arith.constant dense<0.000000e+00> : vector<32x32xf32>
      %148 = tpu.matmul %135, %135, %cst_41 {dimension_numbers = #tpu.dot_dimension_numbers<[1], [0], [0], [1], [0, 0, 1, 1], [], []>} : vector<32x32xf32>, vector<32x32xf32>, vector<32x32xf32> -> vector<32x32xf32>
      %149 = math.absf %148 : vector<32x32xf32>
      %150 = vector.shape_cast %149 : vector<32x32xf32> to vector<1x32x32xf32>
      %cst_42 = arith.constant dense<0xFF800000> : vector<1xf32>
      %151 = vector.multi_reduction <maximumf>, %150, %cst_42 [1, 2] : vector<1x32x32xf32> to vector<1xf32>
      %152 = vector.shape_cast %151 : vector<1xf32> to vector<1x1x1xf32>
      %153 = vector.extract %152[0, 0, 0] : f32 from vector<1x1x1xf32>
      %154 = vector.broadcast %153 : f32 to vector<1x1xf32>
      %cst_43 = arith.constant 9.99999991E-38 : f32
      %155 = vector.broadcast %cst_43 : f32 to vector<1x1xf32>
      %156 = arith.addf %154, %155 : vector<1x1xf32>
      %157 = tpu.reciprocal %156 {approx = true} : vector<1x1xf32> -> vector<1x1xf32>
      %158 = vector.broadcast %157 : vector<1x1xf32> to vector<32x32xf32>
      %159 = arith.mulf %148, %158 : vector<32x32xf32>
      %cst_44 = arith.constant dense<0.000000e+00> : vector<32x32xf32>
      %160 = tpu.matmul %147, %147, %cst_44 {dimension_numbers = #tpu.dot_dimension_numbers<[1], [0], [0], [1], [0, 0, 1, 1], [], []>} : vector<32x32xf32>, vector<32x32xf32>, vector<32x32xf32> -> vector<32x32xf32>
      %161 = math.absf %160 : vector<32x32xf32>
      %162 = vector.shape_cast %161 : vector<32x32xf32> to vector<1x32x32xf32>
      %cst_45 = arith.constant dense<0xFF800000> : vector<1xf32>
      %163 = vector.multi_reduction <maximumf>, %162, %cst_45 [1, 2] : vector<1x32x32xf32> to vector<1xf32>
      %164 = vector.shape_cast %163 : vector<1xf32> to vector<1x1x1xf32>
      %165 = vector.extract %164[0, 0, 0] : f32 from vector<1x1x1xf32>
      %166 = vector.broadcast %165 : f32 to vector<1x1xf32>
      %cst_46 = arith.constant 9.99999991E-38 : f32
      %167 = vector.broadcast %cst_46 : f32 to vector<1x1xf32>
      %168 = arith.addf %166, %167 : vector<1x1xf32>
      %169 = tpu.reciprocal %168 {approx = true} : vector<1x1xf32> -> vector<1x1xf32>
      %170 = vector.broadcast %169 : vector<1x1xf32> to vector<32x32xf32>
      %171 = arith.mulf %160, %170 : vector<32x32xf32>
      %cst_47 = arith.constant dense<0.000000e+00> : vector<32x32xf32>
      %172 = tpu.matmul %159, %159, %cst_47 {dimension_numbers = #tpu.dot_dimension_numbers<[1], [0], [0], [1], [0, 0, 1, 1], [], []>} : vector<32x32xf32>, vector<32x32xf32>, vector<32x32xf32> -> vector<32x32xf32>
      %173 = math.absf %172 : vector<32x32xf32>
      %174 = vector.shape_cast %173 : vector<32x32xf32> to vector<1x32x32xf32>
      %cst_48 = arith.constant dense<0xFF800000> : vector<1xf32>
      %175 = vector.multi_reduction <maximumf>, %174, %cst_48 [1, 2] : vector<1x32x32xf32> to vector<1xf32>
      %176 = vector.shape_cast %175 : vector<1xf32> to vector<1x1x1xf32>
      %177 = vector.extract %176[0, 0, 0] : f32 from vector<1x1x1xf32>
      %178 = vector.broadcast %177 : f32 to vector<1x1xf32>
      %cst_49 = arith.constant 9.99999991E-38 : f32
      %179 = vector.broadcast %cst_49 : f32 to vector<1x1xf32>
      %180 = arith.addf %178, %179 : vector<1x1xf32>
      %181 = tpu.reciprocal %180 {approx = true} : vector<1x1xf32> -> vector<1x1xf32>
      %182 = vector.broadcast %181 : vector<1x1xf32> to vector<32x32xf32>
      %183 = arith.mulf %172, %182 : vector<32x32xf32>
      %cst_50 = arith.constant dense<0.000000e+00> : vector<32x32xf32>
      %184 = tpu.matmul %171, %171, %cst_50 {dimension_numbers = #tpu.dot_dimension_numbers<[1], [0], [0], [1], [0, 0, 1, 1], [], []>} : vector<32x32xf32>, vector<32x32xf32>, vector<32x32xf32> -> vector<32x32xf32>
      %185 = math.absf %184 : vector<32x32xf32>
      %186 = vector.shape_cast %185 : vector<32x32xf32> to vector<1x32x32xf32>
      %cst_51 = arith.constant dense<0xFF800000> : vector<1xf32>
      %187 = vector.multi_reduction <maximumf>, %186, %cst_51 [1, 2] : vector<1x32x32xf32> to vector<1xf32>
      %188 = vector.shape_cast %187 : vector<1xf32> to vector<1x1x1xf32>
      %189 = vector.extract %188[0, 0, 0] : f32 from vector<1x1x1xf32>
      %190 = vector.broadcast %189 : f32 to vector<1x1xf32>
      %cst_52 = arith.constant 9.99999991E-38 : f32
      %191 = vector.broadcast %cst_52 : f32 to vector<1x1xf32>
      %192 = arith.addf %190, %191 : vector<1x1xf32>
      %193 = tpu.reciprocal %192 {approx = true} : vector<1x1xf32> -> vector<1x1xf32>
      %194 = vector.broadcast %193 : vector<1x1xf32> to vector<32x32xf32>
      %195 = arith.mulf %184, %194 : vector<32x32xf32>
      %cst_53 = arith.constant dense<0.000000e+00> : vector<32x32xf32>
      %196 = tpu.matmul %183, %183, %cst_53 {dimension_numbers = #tpu.dot_dimension_numbers<[1], [0], [0], [1], [0, 0, 1, 1], [], []>} : vector<32x32xf32>, vector<32x32xf32>, vector<32x32xf32> -> vector<32x32xf32>
      %197 = math.absf %196 : vector<32x32xf32>
      %198 = vector.shape_cast %197 : vector<32x32xf32> to vector<1x32x32xf32>
      %cst_54 = arith.constant dense<0xFF800000> : vector<1xf32>
      %199 = vector.multi_reduction <maximumf>, %198, %cst_54 [1, 2] : vector<1x32x32xf32> to vector<1xf32>
      %200 = vector.shape_cast %199 : vector<1xf32> to vector<1x1x1xf32>
      %201 = vector.extract %200[0, 0, 0] : f32 from vector<1x1x1xf32>
      %202 = vector.broadcast %201 : f32 to vector<1x1xf32>
      %cst_55 = arith.constant 9.99999991E-38 : f32
      %203 = vector.broadcast %cst_55 : f32 to vector<1x1xf32>
      %204 = arith.addf %202, %203 : vector<1x1xf32>
      %205 = tpu.reciprocal %204 {approx = true} : vector<1x1xf32> -> vector<1x1xf32>
      %206 = vector.broadcast %205 : vector<1x1xf32> to vector<32x32xf32>
      %207 = arith.mulf %196, %206 : vector<32x32xf32>
      %cst_56 = arith.constant dense<0.000000e+00> : vector<32x32xf32>
      %208 = tpu.matmul %195, %195, %cst_56 {dimension_numbers = #tpu.dot_dimension_numbers<[1], [0], [0], [1], [0, 0, 1, 1], [], []>} : vector<32x32xf32>, vector<32x32xf32>, vector<32x32xf32> -> vector<32x32xf32>
      %209 = math.absf %208 : vector<32x32xf32>
      %210 = vector.shape_cast %209 : vector<32x32xf32> to vector<1x32x32xf32>
      %cst_57 = arith.constant dense<0xFF800000> : vector<1xf32>
      %211 = vector.multi_reduction <maximumf>, %210, %cst_57 [1, 2] : vector<1x32x32xf32> to vector<1xf32>
      %212 = vector.shape_cast %211 : vector<1xf32> to vector<1x1x1xf32>
      %213 = vector.extract %212[0, 0, 0] : f32 from vector<1x1x1xf32>
      %214 = vector.broadcast %213 : f32 to vector<1x1xf32>
      %cst_58 = arith.constant 9.99999991E-38 : f32
      %215 = vector.broadcast %cst_58 : f32 to vector<1x1xf32>
      %216 = arith.addf %214, %215 : vector<1x1xf32>
      %217 = tpu.reciprocal %216 {approx = true} : vector<1x1xf32> -> vector<1x1xf32>
      %218 = vector.broadcast %217 : vector<1x1xf32> to vector<32x32xf32>
      %219 = arith.mulf %208, %218 : vector<32x32xf32>
      %cst_59 = arith.constant dense<0.000000e+00> : vector<32x32xf32>
      %220 = tpu.matmul %207, %207, %cst_59 {dimension_numbers = #tpu.dot_dimension_numbers<[1], [0], [0], [1], [0, 0, 1, 1], [], []>} : vector<32x32xf32>, vector<32x32xf32>, vector<32x32xf32> -> vector<32x32xf32>
      %221 = math.absf %220 : vector<32x32xf32>
      %222 = vector.shape_cast %221 : vector<32x32xf32> to vector<1x32x32xf32>
      %cst_60 = arith.constant dense<0xFF800000> : vector<1xf32>
      %223 = vector.multi_reduction <maximumf>, %222, %cst_60 [1, 2] : vector<1x32x32xf32> to vector<1xf32>
      %224 = vector.shape_cast %223 : vector<1xf32> to vector<1x1x1xf32>
      %225 = vector.extract %224[0, 0, 0] : f32 from vector<1x1x1xf32>
      %226 = vector.broadcast %225 : f32 to vector<1x1xf32>
      %cst_61 = arith.constant 9.99999991E-38 : f32
      %227 = vector.broadcast %cst_61 : f32 to vector<1x1xf32>
      %228 = arith.addf %226, %227 : vector<1x1xf32>
      %229 = tpu.reciprocal %228 {approx = true} : vector<1x1xf32> -> vector<1x1xf32>
      %230 = vector.broadcast %229 : vector<1x1xf32> to vector<32x32xf32>
      %231 = arith.mulf %220, %230 : vector<32x32xf32>
      %cst_62 = arith.constant dense<0.000000e+00> : vector<32x32xf32>
      %232 = tpu.matmul %219, %219, %cst_62 {dimension_numbers = #tpu.dot_dimension_numbers<[1], [0], [0], [1], [0, 0, 1, 1], [], []>} : vector<32x32xf32>, vector<32x32xf32>, vector<32x32xf32> -> vector<32x32xf32>
      %233 = math.absf %232 : vector<32x32xf32>
      %234 = vector.shape_cast %233 : vector<32x32xf32> to vector<1x32x32xf32>
      %cst_63 = arith.constant dense<0xFF800000> : vector<1xf32>
      %235 = vector.multi_reduction <maximumf>, %234, %cst_63 [1, 2] : vector<1x32x32xf32> to vector<1xf32>
      %236 = vector.shape_cast %235 : vector<1xf32> to vector<1x1x1xf32>
      %237 = vector.extract %236[0, 0, 0] : f32 from vector<1x1x1xf32>
      %238 = vector.broadcast %237 : f32 to vector<1x1xf32>
      %cst_64 = arith.constant 9.99999991E-38 : f32
      %239 = vector.broadcast %cst_64 : f32 to vector<1x1xf32>
      %240 = arith.addf %238, %239 : vector<1x1xf32>
      %241 = tpu.reciprocal %240 {approx = true} : vector<1x1xf32> -> vector<1x1xf32>
      %242 = vector.broadcast %241 : vector<1x1xf32> to vector<32x32xf32>
      %243 = arith.mulf %232, %242 : vector<32x32xf32>
      %cst_65 = arith.constant dense<0.000000e+00> : vector<32x32xf32>
      %244 = tpu.matmul %231, %231, %cst_65 {dimension_numbers = #tpu.dot_dimension_numbers<[1], [0], [0], [1], [0, 0, 1, 1], [], []>} : vector<32x32xf32>, vector<32x32xf32>, vector<32x32xf32> -> vector<32x32xf32>
      %245 = math.absf %244 : vector<32x32xf32>
      %246 = vector.shape_cast %245 : vector<32x32xf32> to vector<1x32x32xf32>
      %cst_66 = arith.constant dense<0xFF800000> : vector<1xf32>
      %247 = vector.multi_reduction <maximumf>, %246, %cst_66 [1, 2] : vector<1x32x32xf32> to vector<1xf32>
      %248 = vector.shape_cast %247 : vector<1xf32> to vector<1x1x1xf32>
      %249 = vector.extract %248[0, 0, 0] : f32 from vector<1x1x1xf32>
      %250 = vector.broadcast %249 : f32 to vector<1x1xf32>
      %cst_67 = arith.constant 9.99999991E-38 : f32
      %251 = vector.broadcast %cst_67 : f32 to vector<1x1xf32>
      %252 = arith.addf %250, %251 : vector<1x1xf32>
      %253 = tpu.reciprocal %252 {approx = true} : vector<1x1xf32> -> vector<1x1xf32>
      %254 = vector.broadcast %253 : vector<1x1xf32> to vector<32x32xf32>
      %255 = arith.mulf %244, %254 : vector<32x32xf32>
      %cst_68 = arith.constant dense<0.000000e+00> : vector<32x32xf32>
      %256 = tpu.matmul %243, %243, %cst_68 {dimension_numbers = #tpu.dot_dimension_numbers<[1], [0], [0], [1], [0, 0, 1, 1], [], []>} : vector<32x32xf32>, vector<32x32xf32>, vector<32x32xf32> -> vector<32x32xf32>
      %257 = math.absf %256 : vector<32x32xf32>
      %258 = vector.shape_cast %257 : vector<32x32xf32> to vector<1x32x32xf32>
      %cst_69 = arith.constant dense<0xFF800000> : vector<1xf32>
      %259 = vector.multi_reduction <maximumf>, %258, %cst_69 [1, 2] : vector<1x32x32xf32> to vector<1xf32>
      %260 = vector.shape_cast %259 : vector<1xf32> to vector<1x1x1xf32>
      %261 = vector.extract %260[0, 0, 0] : f32 from vector<1x1x1xf32>
      %262 = vector.broadcast %261 : f32 to vector<1x1xf32>
      %cst_70 = arith.constant 9.99999991E-38 : f32
      %263 = vector.broadcast %cst_70 : f32 to vector<1x1xf32>
      %264 = arith.addf %262, %263 : vector<1x1xf32>
      %265 = tpu.reciprocal %264 {approx = true} : vector<1x1xf32> -> vector<1x1xf32>
      %266 = vector.broadcast %265 : vector<1x1xf32> to vector<32x32xf32>
      %267 = arith.mulf %256, %266 : vector<32x32xf32>
      %cst_71 = arith.constant dense<0.000000e+00> : vector<32x32xf32>
      %268 = tpu.matmul %255, %255, %cst_71 {dimension_numbers = #tpu.dot_dimension_numbers<[1], [0], [0], [1], [0, 0, 1, 1], [], []>} : vector<32x32xf32>, vector<32x32xf32>, vector<32x32xf32> -> vector<32x32xf32>
      %269 = math.absf %268 : vector<32x32xf32>
      %270 = vector.shape_cast %269 : vector<32x32xf32> to vector<1x32x32xf32>
      %cst_72 = arith.constant dense<0xFF800000> : vector<1xf32>
      %271 = vector.multi_reduction <maximumf>, %270, %cst_72 [1, 2] : vector<1x32x32xf32> to vector<1xf32>
      %272 = vector.shape_cast %271 : vector<1xf32> to vector<1x1x1xf32>
      %273 = vector.extract %272[0, 0, 0] : f32 from vector<1x1x1xf32>
      %274 = vector.broadcast %273 : f32 to vector<1x1xf32>
      %cst_73 = arith.constant 9.99999991E-38 : f32
      %275 = vector.broadcast %cst_73 : f32 to vector<1x1xf32>
      %276 = arith.addf %274, %275 : vector<1x1xf32>
      %277 = tpu.reciprocal %276 {approx = true} : vector<1x1xf32> -> vector<1x1xf32>
      %278 = vector.broadcast %277 : vector<1x1xf32> to vector<32x32xf32>
      %279 = arith.mulf %268, %278 : vector<32x32xf32>
      %cst_74 = arith.constant dense<0.000000e+00> : vector<32x32xf32>
      %280 = tpu.matmul %267, %267, %cst_74 {dimension_numbers = #tpu.dot_dimension_numbers<[1], [0], [0], [1], [0, 0, 1, 1], [], []>} : vector<32x32xf32>, vector<32x32xf32>, vector<32x32xf32> -> vector<32x32xf32>
      %281 = math.absf %280 : vector<32x32xf32>
      %282 = vector.shape_cast %281 : vector<32x32xf32> to vector<1x32x32xf32>
      %cst_75 = arith.constant dense<0xFF800000> : vector<1xf32>
      %283 = vector.multi_reduction <maximumf>, %282, %cst_75 [1, 2] : vector<1x32x32xf32> to vector<1xf32>
      %284 = vector.shape_cast %283 : vector<1xf32> to vector<1x1x1xf32>
      %285 = vector.extract %284[0, 0, 0] : f32 from vector<1x1x1xf32>
      %286 = vector.broadcast %285 : f32 to vector<1x1xf32>
      %cst_76 = arith.constant 9.99999991E-38 : f32
      %287 = vector.broadcast %cst_76 : f32 to vector<1x1xf32>
      %288 = arith.addf %286, %287 : vector<1x1xf32>
      %289 = tpu.reciprocal %288 {approx = true} : vector<1x1xf32> -> vector<1x1xf32>
      %290 = vector.broadcast %289 : vector<1x1xf32> to vector<32x32xf32>
      %291 = arith.mulf %280, %290 : vector<32x32xf32>
      %cst_77 = arith.constant dense<0.000000e+00> : vector<32x32xf32>
      %292 = tpu.matmul %279, %279, %cst_77 {dimension_numbers = #tpu.dot_dimension_numbers<[1], [0], [0], [1], [0, 0, 1, 1], [], []>} : vector<32x32xf32>, vector<32x32xf32>, vector<32x32xf32> -> vector<32x32xf32>
      %293 = math.absf %292 : vector<32x32xf32>
      %294 = vector.shape_cast %293 : vector<32x32xf32> to vector<1x32x32xf32>
      %cst_78 = arith.constant dense<0xFF800000> : vector<1xf32>
      %295 = vector.multi_reduction <maximumf>, %294, %cst_78 [1, 2] : vector<1x32x32xf32> to vector<1xf32>
      %296 = vector.shape_cast %295 : vector<1xf32> to vector<1x1x1xf32>
      %297 = vector.extract %296[0, 0, 0] : f32 from vector<1x1x1xf32>
      %298 = vector.broadcast %297 : f32 to vector<1x1xf32>
      %cst_79 = arith.constant 9.99999991E-38 : f32
      %299 = vector.broadcast %cst_79 : f32 to vector<1x1xf32>
      %300 = arith.addf %298, %299 : vector<1x1xf32>
      %301 = tpu.reciprocal %300 {approx = true} : vector<1x1xf32> -> vector<1x1xf32>
      %302 = vector.broadcast %301 : vector<1x1xf32> to vector<32x32xf32>
      %303 = arith.mulf %292, %302 : vector<32x32xf32>
      %cst_80 = arith.constant dense<0.000000e+00> : vector<32x32xf32>
      %304 = tpu.matmul %291, %291, %cst_80 {dimension_numbers = #tpu.dot_dimension_numbers<[1], [0], [0], [1], [0, 0, 1, 1], [], []>} : vector<32x32xf32>, vector<32x32xf32>, vector<32x32xf32> -> vector<32x32xf32>
      %305 = math.absf %304 : vector<32x32xf32>
      %306 = vector.shape_cast %305 : vector<32x32xf32> to vector<1x32x32xf32>
      %cst_81 = arith.constant dense<0xFF800000> : vector<1xf32>
      %307 = vector.multi_reduction <maximumf>, %306, %cst_81 [1, 2] : vector<1x32x32xf32> to vector<1xf32>
      %308 = vector.shape_cast %307 : vector<1xf32> to vector<1x1x1xf32>
      %309 = vector.extract %308[0, 0, 0] : f32 from vector<1x1x1xf32>
      %310 = vector.broadcast %309 : f32 to vector<1x1xf32>
      %cst_82 = arith.constant 9.99999991E-38 : f32
      %311 = vector.broadcast %cst_82 : f32 to vector<1x1xf32>
      %312 = arith.addf %310, %311 : vector<1x1xf32>
      %313 = tpu.reciprocal %312 {approx = true} : vector<1x1xf32> -> vector<1x1xf32>
      %314 = vector.broadcast %313 : vector<1x1xf32> to vector<32x32xf32>
      %315 = arith.mulf %304, %314 : vector<32x32xf32>
      %cst_83 = arith.constant dense<0.000000e+00> : vector<32x32xf32>
      %316 = tpu.matmul %303, %303, %cst_83 {dimension_numbers = #tpu.dot_dimension_numbers<[1], [0], [0], [1], [0, 0, 1, 1], [], []>} : vector<32x32xf32>, vector<32x32xf32>, vector<32x32xf32> -> vector<32x32xf32>
      %317 = math.absf %316 : vector<32x32xf32>
      %318 = vector.shape_cast %317 : vector<32x32xf32> to vector<1x32x32xf32>
      %cst_84 = arith.constant dense<0xFF800000> : vector<1xf32>
      %319 = vector.multi_reduction <maximumf>, %318, %cst_84 [1, 2] : vector<1x32x32xf32> to vector<1xf32>
      %320 = vector.shape_cast %319 : vector<1xf32> to vector<1x1x1xf32>
      %321 = vector.extract %320[0, 0, 0] : f32 from vector<1x1x1xf32>
      %322 = vector.broadcast %321 : f32 to vector<1x1xf32>
      %cst_85 = arith.constant 9.99999991E-38 : f32
      %323 = vector.broadcast %cst_85 : f32 to vector<1x1xf32>
      %324 = arith.addf %322, %323 : vector<1x1xf32>
      %325 = tpu.reciprocal %324 {approx = true} : vector<1x1xf32> -> vector<1x1xf32>
      %326 = vector.broadcast %325 : vector<1x1xf32> to vector<32x32xf32>
      %327 = arith.mulf %316, %326 : vector<32x32xf32>
      %cst_86 = arith.constant dense<0.000000e+00> : vector<32x32xf32>
      %328 = tpu.matmul %315, %315, %cst_86 {dimension_numbers = #tpu.dot_dimension_numbers<[1], [0], [0], [1], [0, 0, 1, 1], [], []>} : vector<32x32xf32>, vector<32x32xf32>, vector<32x32xf32> -> vector<32x32xf32>
      %329 = math.absf %328 : vector<32x32xf32>
      %330 = vector.shape_cast %329 : vector<32x32xf32> to vector<1x32x32xf32>
      %cst_87 = arith.constant dense<0xFF800000> : vector<1xf32>
      %331 = vector.multi_reduction <maximumf>, %330, %cst_87 [1, 2] : vector<1x32x32xf32> to vector<1xf32>
      %332 = vector.shape_cast %331 : vector<1xf32> to vector<1x1x1xf32>
      %333 = vector.extract %332[0, 0, 0] : f32 from vector<1x1x1xf32>
      %334 = vector.broadcast %333 : f32 to vector<1x1xf32>
      %cst_88 = arith.constant 9.99999991E-38 : f32
      %335 = vector.broadcast %cst_88 : f32 to vector<1x1xf32>
      %336 = arith.addf %334, %335 : vector<1x1xf32>
      %337 = tpu.reciprocal %336 {approx = true} : vector<1x1xf32> -> vector<1x1xf32>
      %338 = vector.broadcast %337 : vector<1x1xf32> to vector<32x32xf32>
      %339 = arith.mulf %328, %338 : vector<32x32xf32>
      %cst_89 = arith.constant dense<0.000000e+00> : vector<32x32xf32>
      %340 = tpu.matmul %327, %327, %cst_89 {dimension_numbers = #tpu.dot_dimension_numbers<[1], [0], [0], [1], [0, 0, 1, 1], [], []>} : vector<32x32xf32>, vector<32x32xf32>, vector<32x32xf32> -> vector<32x32xf32>
      %341 = math.absf %340 : vector<32x32xf32>
      %342 = vector.shape_cast %341 : vector<32x32xf32> to vector<1x32x32xf32>
      %cst_90 = arith.constant dense<0xFF800000> : vector<1xf32>
      %343 = vector.multi_reduction <maximumf>, %342, %cst_90 [1, 2] : vector<1x32x32xf32> to vector<1xf32>
      %344 = vector.shape_cast %343 : vector<1xf32> to vector<1x1x1xf32>
      %345 = vector.extract %344[0, 0, 0] : f32 from vector<1x1x1xf32>
      %346 = vector.broadcast %345 : f32 to vector<1x1xf32>
      %cst_91 = arith.constant 9.99999991E-38 : f32
      %347 = vector.broadcast %cst_91 : f32 to vector<1x1xf32>
      %348 = arith.addf %346, %347 : vector<1x1xf32>
      %349 = tpu.reciprocal %348 {approx = true} : vector<1x1xf32> -> vector<1x1xf32>
      %350 = vector.broadcast %349 : vector<1x1xf32> to vector<32x32xf32>
      %351 = arith.mulf %340, %350 : vector<32x32xf32>
      %cst_92 = arith.constant dense<0.000000e+00> : vector<32x32xf32>
      %352 = tpu.matmul %339, %339, %cst_92 {dimension_numbers = #tpu.dot_dimension_numbers<[1], [0], [0], [1], [0, 0, 1, 1], [], []>} : vector<32x32xf32>, vector<32x32xf32>, vector<32x32xf32> -> vector<32x32xf32>
      %353 = math.absf %352 : vector<32x32xf32>
      %354 = vector.shape_cast %353 : vector<32x32xf32> to vector<1x32x32xf32>
      %cst_93 = arith.constant dense<0xFF800000> : vector<1xf32>
      %355 = vector.multi_reduction <maximumf>, %354, %cst_93 [1, 2] : vector<1x32x32xf32> to vector<1xf32>
      %356 = vector.shape_cast %355 : vector<1xf32> to vector<1x1x1xf32>
      %357 = vector.extract %356[0, 0, 0] : f32 from vector<1x1x1xf32>
      %358 = vector.broadcast %357 : f32 to vector<1x1xf32>
      %cst_94 = arith.constant 9.99999991E-38 : f32
      %359 = vector.broadcast %cst_94 : f32 to vector<1x1xf32>
      %360 = arith.addf %358, %359 : vector<1x1xf32>
      %361 = tpu.reciprocal %360 {approx = true} : vector<1x1xf32> -> vector<1x1xf32>
      %362 = vector.broadcast %361 : vector<1x1xf32> to vector<32x32xf32>
      %363 = arith.mulf %352, %362 : vector<32x32xf32>
      %cst_95 = arith.constant dense<0.000000e+00> : vector<32x32xf32>
      %364 = tpu.matmul %351, %351, %cst_95 {dimension_numbers = #tpu.dot_dimension_numbers<[1], [0], [0], [1], [0, 0, 1, 1], [], []>} : vector<32x32xf32>, vector<32x32xf32>, vector<32x32xf32> -> vector<32x32xf32>
      %365 = math.absf %364 : vector<32x32xf32>
      %366 = vector.shape_cast %365 : vector<32x32xf32> to vector<1x32x32xf32>
      %cst_96 = arith.constant dense<0xFF800000> : vector<1xf32>
      %367 = vector.multi_reduction <maximumf>, %366, %cst_96 [1, 2] : vector<1x32x32xf32> to vector<1xf32>
      %368 = vector.shape_cast %367 : vector<1xf32> to vector<1x1x1xf32>
      %369 = vector.extract %368[0, 0, 0] : f32 from vector<1x1x1xf32>
      %370 = vector.broadcast %369 : f32 to vector<1x1xf32>
      %cst_97 = arith.constant 9.99999991E-38 : f32
      %371 = vector.broadcast %cst_97 : f32 to vector<1x1xf32>
      %372 = arith.addf %370, %371 : vector<1x1xf32>
      %373 = tpu.reciprocal %372 {approx = true} : vector<1x1xf32> -> vector<1x1xf32>
      %374 = vector.broadcast %373 : vector<1x1xf32> to vector<32x32xf32>
      %375 = arith.mulf %364, %374 : vector<32x32xf32>
      %cst_98 = arith.constant dense<0.000000e+00> : vector<32x32xf32>
      %376 = tpu.matmul %363, %363, %cst_98 {dimension_numbers = #tpu.dot_dimension_numbers<[1], [0], [0], [1], [0, 0, 1, 1], [], []>} : vector<32x32xf32>, vector<32x32xf32>, vector<32x32xf32> -> vector<32x32xf32>
      %377 = math.absf %376 : vector<32x32xf32>
      %378 = vector.shape_cast %377 : vector<32x32xf32> to vector<1x32x32xf32>
      %cst_99 = arith.constant dense<0xFF800000> : vector<1xf32>
      %379 = vector.multi_reduction <maximumf>, %378, %cst_99 [1, 2] : vector<1x32x32xf32> to vector<1xf32>
      %380 = vector.shape_cast %379 : vector<1xf32> to vector<1x1x1xf32>
      %381 = vector.extract %380[0, 0, 0] : f32 from vector<1x1x1xf32>
      %382 = vector.broadcast %381 : f32 to vector<1x1xf32>
      %cst_100 = arith.constant 9.99999991E-38 : f32
      %383 = vector.broadcast %cst_100 : f32 to vector<1x1xf32>
      %384 = arith.addf %382, %383 : vector<1x1xf32>
      %385 = tpu.reciprocal %384 {approx = true} : vector<1x1xf32> -> vector<1x1xf32>
      %386 = vector.broadcast %385 : vector<1x1xf32> to vector<32x32xf32>
      %387 = arith.mulf %376, %386 : vector<32x32xf32>
      %cst_101 = arith.constant dense<0.000000e+00> : vector<32x32xf32>
      %388 = tpu.matmul %375, %375, %cst_101 {dimension_numbers = #tpu.dot_dimension_numbers<[1], [0], [0], [1], [0, 0, 1, 1], [], []>} : vector<32x32xf32>, vector<32x32xf32>, vector<32x32xf32> -> vector<32x32xf32>
      %389 = math.absf %388 : vector<32x32xf32>
      %390 = vector.shape_cast %389 : vector<32x32xf32> to vector<1x32x32xf32>
      %cst_102 = arith.constant dense<0xFF800000> : vector<1xf32>
      %391 = vector.multi_reduction <maximumf>, %390, %cst_102 [1, 2] : vector<1x32x32xf32> to vector<1xf32>
      %392 = vector.shape_cast %391 : vector<1xf32> to vector<1x1x1xf32>
      %393 = vector.extract %392[0, 0, 0] : f32 from vector<1x1x1xf32>
      %394 = vector.broadcast %393 : f32 to vector<1x1xf32>
      %cst_103 = arith.constant 9.99999991E-38 : f32
      %395 = vector.broadcast %cst_103 : f32 to vector<1x1xf32>
      %396 = arith.addf %394, %395 : vector<1x1xf32>
      %397 = tpu.reciprocal %396 {approx = true} : vector<1x1xf32> -> vector<1x1xf32>
      %398 = vector.broadcast %397 : vector<1x1xf32> to vector<32x32xf32>
      %399 = arith.mulf %388, %398 : vector<32x32xf32>
      %cst_104 = arith.constant dense<0.000000e+00> : vector<32x32xf32>
      %400 = tpu.matmul %387, %387, %cst_104 {dimension_numbers = #tpu.dot_dimension_numbers<[1], [0], [0], [1], [0, 0, 1, 1], [], []>} : vector<32x32xf32>, vector<32x32xf32>, vector<32x32xf32> -> vector<32x32xf32>
      %401 = math.absf %400 : vector<32x32xf32>
      %402 = vector.shape_cast %401 : vector<32x32xf32> to vector<1x32x32xf32>
      %cst_105 = arith.constant dense<0xFF800000> : vector<1xf32>
      %403 = vector.multi_reduction <maximumf>, %402, %cst_105 [1, 2] : vector<1x32x32xf32> to vector<1xf32>
      %404 = vector.shape_cast %403 : vector<1xf32> to vector<1x1x1xf32>
      %405 = vector.extract %404[0, 0, 0] : f32 from vector<1x1x1xf32>
      %406 = vector.broadcast %405 : f32 to vector<1x1xf32>
      %cst_106 = arith.constant 9.99999991E-38 : f32
      %407 = vector.broadcast %cst_106 : f32 to vector<1x1xf32>
      %408 = arith.addf %406, %407 : vector<1x1xf32>
      %409 = tpu.reciprocal %408 {approx = true} : vector<1x1xf32> -> vector<1x1xf32>
      %410 = vector.broadcast %409 : vector<1x1xf32> to vector<32x32xf32>
      %411 = arith.mulf %400, %410 : vector<32x32xf32>
      %cst_107 = arith.constant dense<0.000000e+00> : vector<32x32xf32>
      %412 = tpu.matmul %11, %399, %cst_107 {dimension_numbers = #tpu.dot_dimension_numbers<[1], [0], [0], [1], [0, 0, 1, 1], [], []>} : vector<32x32xf32>, vector<32x32xf32>, vector<32x32xf32> -> vector<32x32xf32>
      %413 = arith.mulf %399, %412 : vector<32x32xf32>
      %cst_108 = arith.constant dense<0.000000e+00> : vector<32xf32>
      %414 = vector.multi_reduction <add>, %413, %cst_108 [0] : vector<32x32xf32> to vector<32xf32>
      %415 = vector.shape_cast %414 : vector<32xf32> to vector<1x32xf32>
      %416 = arith.mulf %399, %399 : vector<32x32xf32>
      %cst_109 = arith.constant dense<0.000000e+00> : vector<32xf32>
      %417 = vector.multi_reduction <add>, %416, %cst_109 [0] : vector<32x32xf32> to vector<32xf32>
      %418 = vector.shape_cast %417 : vector<32xf32> to vector<1x32xf32>
      %cst_110 = arith.constant 9.99999991E-38 : f32
      %419 = vector.broadcast %cst_110 : f32 to vector<1x32xf32>
      %420 = arith.addf %418, %419 : vector<1x32xf32>
      %421 = arith.divf %415, %420 : vector<1x32xf32>
      %422 = vector.shape_cast %421 : vector<1x32xf32> to vector<1x1x32xf32>
      %cst_111 = arith.constant dense<0xFF800000> : vector<1xf32>
      %423 = vector.multi_reduction <maximumf>, %422, %cst_111 [1, 2] : vector<1x1x32xf32> to vector<1xf32>
      %424 = vector.shape_cast %423 : vector<1xf32> to vector<1x1x1xf32>
      %425 = vector.extract %424[0, 0, 0] : f32 from vector<1x1x1xf32>
      %cst_112 = arith.constant 1.000000e-30 : f32
      %426 = arith.maximumf %425, %cst_112 : f32
      %cst_113 = arith.constant dense<0.000000e+00> : vector<32x32xf32>
      %427 = tpu.matmul %29, %411, %cst_113 {dimension_numbers = #tpu.dot_dimension_numbers<[1], [0], [0], [1], [0, 0, 1, 1], [], []>} : vector<32x32xf32>, vector<32x32xf32>, vector<32x32xf32> -> vector<32x32xf32>
      %428 = arith.mulf %411, %427 : vector<32x32xf32>
      %cst_114 = arith.constant dense<0.000000e+00> : vector<32xf32>
      %429 = vector.multi_reduction <add>, %428, %cst_114 [0] : vector<32x32xf32> to vector<32xf32>
      %430 = vector.shape_cast %429 : vector<32xf32> to vector<1x32xf32>
      %431 = arith.mulf %411, %411 : vector<32x32xf32>
      %cst_115 = arith.constant dense<0.000000e+00> : vector<32xf32>
      %432 = vector.multi_reduction <add>, %431, %cst_115 [0] : vector<32x32xf32> to vector<32xf32>
      %433 = vector.shape_cast %432 : vector<32xf32> to vector<1x32xf32>
      %cst_116 = arith.constant 9.99999991E-38 : f32
      %434 = vector.broadcast %cst_116 : f32 to vector<1x32xf32>
      %435 = arith.addf %433, %434 : vector<1x32xf32>
      %436 = arith.divf %430, %435 : vector<1x32xf32>
      %437 = vector.shape_cast %436 : vector<1x32xf32> to vector<1x1x32xf32>
      %cst_117 = arith.constant dense<0xFF800000> : vector<1xf32>
      %438 = vector.multi_reduction <maximumf>, %437, %cst_117 [1, 2] : vector<1x1x32xf32> to vector<1xf32>
      %439 = vector.shape_cast %438 : vector<1xf32> to vector<1x1x1xf32>
      %440 = vector.extract %439[0, 0, 0] : f32 from vector<1x1x1xf32>
      %441 = arith.subf %19, %440 : f32
      %cst_118 = arith.constant 1.000000e-30 : f32
      %442 = arith.maximumf %441, %cst_118 : f32
      %443 = arith.divf %426, %442 : f32
      %444 = math.sqrt %443 : f32
      %c0_119 = arith.constant 0 : index
      %445 = memref.load %arg2[%c0_119] : memref<1xf32, #tpu.memory_space<smem>>
      memref.store %444, %arg2[%c0_119] : memref<1xf32, #tpu.memory_space<smem>>
    } else {
    }
    return
  }
  func.func @transform_0(%arg0: i32) -> (i32, i32) {
    %c0_i32 = arith.constant 0 : i32
    %c0_i32_0 = arith.constant 0 : i32
    return %arg0, %c0_i32 : i32, i32
  }
  func.func @transform_1(%arg0: i32) -> i32 {
    %c0_i32 = arith.constant 0 : i32
    %c0_i32_0 = arith.constant 0 : i32
    return %c0_i32 : i32
  }
}

</mosaic_0001>

<bundles_post_ra>
// kernel: tpu_custom_call.1
= control target key start
LH: loop header
LB: loop body
LE: loop exit
PB: predicated region body
PF: predicated region fallthrough
CT: control target
= control target key end

     0   :  { %6 = vsyncpa [#allocation4], 0  ;;  %s3147_s6 = smov 0   ;;  %s3881_s0 = inlined_call_operand.vmem [shape: f32[512,32], index: 0, kind: input, shape index: {}]   ;;  %s3882_s1 = inlined_call_operand.hbm [shape: f32[1], index: 1, kind: output, shape index: {}]  }
   0x1 LB: > { %s3153_s7 = sadd.s32 4294967295, %s3130_s6   ;;  %p2712_p0 = scmp.ge.s32.totalorder %s3130_s6, 1  ;;  %s3130_s6 = sphi %s3147_s6, %s12_s6  }
   0x2   : > { %p84_p1 = scmp.lt.s32.totalorder %s3130_s6, 3 }
   0x4   : > { %p85_p2 = pnand %p2712_p0, %p84_p1 }
   0x5   : > { %s2713_s8 = sshll.u32 (!%p85_p2), %s3153_s7, 5  ;;  %p2715_p4 = scmp.ne.s32.totalorder (!%p85_p2), %s3153_s7, 0 }
   0x6   : > { %88 = sbr.rel (%p85_p2) target bundleno = 6604 (0x19cc), region = 24  ;;  %p100_p3 = scmp.lt.s32.totalorder (!%p85_p2), %s2713_s8, 63 }
   0xb   : > { %s3884_s8 = smov (!%p100_p3, %s2713_s8), 63  ;;  %108 = sbr.rel (%p2715_p4) target bundleno = 21 (0x15), region = 28 }
   0xc   : > { %s2714_s9 = sshll.u32 %s3884_s8, 3  ;;  %s3133_s13 = smov (!%p2715_p4), 0.0  }
   0xd   : > { %s3161_s12 = scalar_lea.vmem %s3881_s0, %s2714_s9  ;;  %115 = sst [smem:[#allocation3]] (!%p2715_p4), %s3133_s13 }
  0x10   : > { %vm109_vm0 = vcmask 261120   ;;  %v3132_v0 = vmov 0.0  }
  0x11   : > { %110 = vst.msk [vmem:[#allocation2] sm:$0xff] %vm109_vm0, %v3132_v0 }
  0x12   : > { %111 = vst.msk [vmem:[#allocation2 + $0x8] sm:$0xff] %vm109_vm0, %v3132_v0 }
  0x13   : > { %112 = vst.msk [vmem:[#allocation2 + $0x10] sm:$0xff] %vm109_vm0, %v3132_v0 }
  0x14   : > { %113 = vst.msk [vmem:[#allocation2 + $0x18] sm:$0xff] %vm109_vm0, %v3132_v0 }
  0x15 PF: > { %v3165_v1 = vld [vmem:[%s3161_s12] sm:$0xff]  ;;  %v3173_v4 = vld [vmem:[%s3161_s12 + $0x8] sm:$0xff]  ;;  %v3181_v7 = vld [vmem:[%s3161_s12 + $0x10] sm:$0xff]  ;;  %vm278_vm1 = vcmask 261120   ;;  %p2716_p5 = scmp.ne.s32.totalorder %s3153_s7, 1 }
  0x16   : > { %v3168_v2 = vld [vmem:[%s3161_s12 + $0x80] sm:$0xff]  ;;  %v3176_v5 = vld [vmem:[%s3161_s12 + $0x88] sm:$0xff]  ;;  %v3184_v8 = vld [vmem:[%s3161_s12 + $0x90] sm:$0xff]  ;;  %s3135_s15 = smov (!%p2716_p5), 1e-30  }
  0x17   : > { %v2978_v3 = vpack.i.bf16 %v3168_v2, %v3165_v1  ;;  %v2980_v6 = vpack.i.bf16 %v3176_v5, %v3173_v4  ;;  %v2982_v9 = vpack.i.bf16 %v3184_v8, %v3181_v7  ;;  %v3189_v10 = vld [vmem:[%s3161_s12 + $0x18] sm:$0xff]  ;;  %v3197_v13 = vld [vmem:[%s3161_s12 + $0x20] sm:$0xff]  ;;  %v3205_v16 = vld [vmem:[%s3161_s12 + $0x28] sm:$0xff] }
  0x18   : > { %v3192_v11 = vld [vmem:[%s3161_s12 + $0x98] sm:$0xff]  ;;  %v3200_v14 = vld [vmem:[%s3161_s12 + $0xa0] sm:$0xff]  ;;  %v3208_v17 = vld [vmem:[%s3161_s12 + $0xa8] sm:$0xff] }
  0x19   : > { %2979 = vxpose.xlu0.b32.start [1/16] (narrow) %v2978_v3, 32  ;;  %v2984_v12 = vpack.i.bf16 %v3192_v11, %v3189_v10  ;;  %v2986_v15 = vpack.i.bf16 %v3200_v14, %v3197_v13  ;;  %v2988_v18 = vpack.i.bf16 %v3208_v17, %v3205_v16  ;;  %v3213_v19 = vld [vmem:[%s3161_s12 + $0x30] sm:$0xff]  ;;  %v3221_v22 = vld [vmem:[%s3161_s12 + $0x38] sm:$0xff]  ;;  %v124_v25 = vld [vmem:[%s3161_s12 + $0x40] sm:$0xff] }
  0x1a   : > { %v3216_v20 = vld [vmem:[%s3161_s12 + $0xb0] sm:$0xff]  ;;  %v3224_v23 = vld [vmem:[%s3161_s12 + $0xb8] sm:$0xff]  ;;  %v140_v26 = vld [vmem:[%s3161_s12 + $0xc0] sm:$0xff] }
  0x1b   : > { %v2990_v21 = vpack.i.bf16 %v3216_v20, %v3213_v19  ;;  %v2992_v24 = vpack.i.bf16 %v3224_v23, %v3221_v22  ;;  %v2994_v27 = vpack.i.bf16 %v140_v26, %v124_v25  ;;  %v125_v28 = vld [vmem:[%s3161_s12 + $0x48] sm:$0xff]  ;;  %v126_v31 = vld [vmem:[%s3161_s12 + $0x50] sm:$0xff]  ;;  %v3235_v34 = vld [vmem:[%s3161_s12 + $0x78] sm:$0xff] }
  0x1c   : > { %v141_v29 = vld [vmem:[%s3161_s12 + $0xc8] sm:$0xff]  ;;  %v142_v32 = vld [vmem:[%s3161_s12 + $0xd0] sm:$0xff]  ;;  %v3238_v35 = vld [vmem:[%s3161_s12 + $0xf8] sm:$0xff]  ;;  %216 = vmatpush.msra.mxu0 %v3235_v34  ;;  %2853 = vmatpush.msra.mxu2 %v3235_v34 }
  0x1d   : > { %v2996_v30 = vpack.i.bf16 %v141_v29, %v125_v28  ;;  %v2998_v33 = vpack.i.bf16 %v142_v32, %v126_v31  ;;  %v127_v36 = vld [vmem:[%s3161_s12 + $0x58] sm:$0xff]  ;;  %245 = vmatpush.msra.mxu1 %v3238_v35  ;;  %v3245_v38 = vld [vmem:[%s3161_s12 + $0x70] sm:$0xff]  ;;  %2869 = vmatpush.msra.mxu3 %v3238_v35  ;;  %v129_v41 = vld [vmem:[%s3161_s12 + $0x68] sm:$0xff]  ;;  %v3008_v48 = vpack.i.bf16 %v3238_v35, %v3235_v34 }
  0x1e   : > { %v143_v37 = vld [vmem:[%s3161_s12 + $0xd8] sm:$0xff]  ;;  %v3248_v39 = vld [vmem:[%s3161_s12 + $0xf0] sm:$0xff]  ;;  %217 = vmatpush.msra.mxu0 %v3245_v38  ;;  %v145_v42 = vld [vmem:[%s3161_s12 + $0xe8] sm:$0xff]  ;;  %2854 = vmatpush.msra.mxu2 %v3245_v38 }
  0x1f   : > { %246 = vmatpush.msra.mxu1 %v3248_v39  ;;  %v3000_v40 = vpack.i.bf16 %v143_v37, %v127_v36  ;;  %2870 = vmatpush.msra.mxu3 %v3248_v39  ;;  %v128_v43 = vld [vmem:[%s3161_s12 + $0x60] sm:$0xff]  ;;  %v3004_v46 = vpack.i.bf16 %v145_v42, %v129_v41  ;;  %v3006_v47 = vpack.i.bf16 %v3248_v39, %v3245_v38  ;;  %v149_v3 = vld [vmem:[#allocation2 + $0x8] sm:$0xff] }
  0x20   : > { %218 = vmatpush.msra.mxu0 %v129_v41  ;;  %v144_v44 = vld [vmem:[%s3161_s12 + $0xe0] sm:$0xff]  ;;  %2855 = vmatpush.msra.mxu2 %v129_v41 }
  0x21   : > { %2981 = vxpose.xlu0.b32.cont [2/16] (narrow) %v2980_v6, 32  ;;  %247 = vmatpush.msra.mxu1 %v145_v42  ;;  %v3002_v45 = vpack.i.bf16 %v144_v44, %v128_v43  ;;  %v148_v62 = vld [vmem:[#allocation2] sm:$0xff] }
  0x22   : > { %2871 = vmatpush.msra.mxu3 %v145_v42  ;;  %219 = vmatpush.msra.mxu0 %v128_v43 }
  0x23   : > { %248 = vmatpush.msra.mxu1 %v144_v44  ;;  %2856 = vmatpush.msra.mxu2 %v128_v43 }
  0x24   : > { %220 = vmatpush.msra.mxu0 %v127_v36  ;;  %2872 = vmatpush.msra.mxu3 %v144_v44 }
  0x25   : > { %249 = vmatpush.msra.mxu1 %v143_v37  ;;  %2857 = vmatpush.msra.mxu2 %v127_v36 }
  0x26   : > { %221 = vmatpush.msra.mxu0 %v126_v31  ;;  %2873 = vmatpush.msra.mxu3 %v143_v37 }
  0x27   : > { %250 = vmatpush.msra.mxu1 %v142_v32  ;;  %2858 = vmatpush.msra.mxu2 %v126_v31 }
  0x28   : > { %222 = vmatpush.msra.mxu0 %v125_v28  ;;  %2874 = vmatpush.msra.mxu3 %v142_v32 }
  0x29   : > { %2983 = vxpose.xlu0.b32.cont [3/16] (narrow) %v2982_v9, 32  ;;  %251 = vmatpush.msra.mxu1 %v141_v29 }
  0x2a   : > { %2859 = vmatpush.msra.mxu2 %v125_v28  ;;  %223 = vmatpush.msra.mxu0 %v124_v25 }
  0x2b   : > { %252 = vmatpush.msra.mxu1 %v140_v26  ;;  %2875 = vmatpush.msra.mxu3 %v141_v29 }
  0x2c   : > { %224 = vmatpush.msra.mxu0 %v3221_v22  ;;  %2860 = vmatpush.msra.mxu2 %v124_v25 }
  0x2d   : > { %253 = vmatpush.msra.mxu1 %v3224_v23  ;;  %2876 = vmatpush.msra.mxu3 %v140_v26 }
  0x2e   : > { %225 = vmatpush.msra.mxu0 %v3213_v19  ;;  %2861 = vmatpush.msra.mxu2 %v3221_v22 }
  0x2f   : > { %254 = vmatpush.msra.mxu1 %v3216_v20  ;;  %2877 = vmatpush.msra.mxu3 %v3224_v23 }
  0x30   : > { %226 = vmatpush.msra.mxu0 %v3205_v16  ;;  %2862 = vmatpush.msra.mxu2 %v3213_v19 }
  0x31   : > { %2985 = vxpose.xlu0.b32.cont [4/16] (narrow) %v2984_v12, 32  ;;  %255 = vmatpush.msra.mxu1 %v3208_v17 }
  0x32   : > { %2878 = vmatpush.msra.mxu3 %v3216_v20  ;;  %227 = vmatpush.msra.mxu0 %v3197_v13 }
  0x33   : > { %256 = vmatpush.msra.mxu1 %v3200_v14  ;;  %2863 = vmatpush.msra.mxu2 %v3205_v16 }
  0x34   : > { %228 = vmatpush.msra.mxu0 %v3189_v10  ;;  %2879 = vmatpush.msra.mxu3 %v3208_v17 }
  0x35   : > { %257 = vmatpush.msra.mxu1 %v3192_v11  ;;  %2864 = vmatpush.msra.mxu2 %v3197_v13  ;;  %v151_v13 = vld [vmem:[#allocation2 + $0x18] sm:$0xff] }
  0x36   : > { %229 = vmatpush.msra.mxu0 %v3181_v7  ;;  %2880 = vmatpush.msra.mxu3 %v3200_v14 }
  0x37   : > { %258 = vmatpush.msra.mxu1 %v3184_v8  ;;  %2865 = vmatpush.msra.mxu2 %v3189_v10 }
  0x38   : > { %230 = vmatpush.msra.mxu0 %v3173_v4  ;;  %2881 = vmatpush.msra.mxu3 %v3192_v11 }
  0x39   : > { %2987 = vxpose.xlu0.b32.cont [5/16] (narrow) %v2986_v15, 32  ;;  %259 = vmatpush.msra.mxu1 %v3176_v5 }
  0x3a   : > { %2866 = vmatpush.msra.mxu2 %v3181_v7  ;;  %231 = vmatpush.msra.mxu0 %v3165_v1 }
  0x3b   : > { %260 = vmatpush.msra.mxu1 %v3168_v2  ;;  %2882 = vmatpush.msra.mxu3 %v3184_v8  ;;  %v150_v8 = vld [vmem:[#allocation2 + $0x10] sm:$0xff] }
  0x3c   : > { %2867 = vmatpush.msra.mxu2 %v3173_v4 }
  0x3d   : > { %2883 = vmatpush.msra.mxu3 %v3176_v5 }
  0x3e   : > { %2868 = vmatpush.msra.mxu2 %v3165_v1 }
  0x3f   : > { %2884 = vmatpush.msra.mxu3 %v3168_v2 }
  0x41   : > { %2989 = vxpose.xlu0.b32.cont [6/16] (narrow) %v2988_v18, 32 }
  0x49   : > { %2991 = vxpose.xlu0.b32.cont [7/16] (narrow) %v2990_v21, 32 }
  0x51   : > { %2993 = vxpose.xlu0.b32.cont [8/16] (narrow) %v2992_v24, 32 }
  0x59   : > { %2995 = vxpose.xlu0.b32.cont [9/16] (narrow) %v2994_v27, 32 }
  0x61   : > { %2997 = vxpose.xlu0.b32.cont [10/16] (narrow) %v2996_v30, 32 }
  0x69   : > { %2999 = vxpose.xlu0.b32.cont [11/16] (narrow) %v2998_v33, 32 }
  0x71   : > { %3001 = vxpose.xlu0.b32.cont [12/16] (narrow) %v3000_v40, 32 }
  0x79   : > { %3003 = vxpose.xlu0.b32.cont [13/16] (narrow) %v3002_v45, 32 }
  0x81   : > { %3005 = vxpose.xlu0.b32.cont [14/16] (narrow) %v3004_v46, 32 }
  0x89   : > { %3007 = vxpose.xlu0.b32.cont [15/16] (narrow) %v3006_v47, 32 }
  0x91   : > { %3009 = vxpose.xlu0.b32.end [16/16] (narrow) %v3008_v48, 32 }
  0xbd   : > { %v3010_v49 = vpop.trf.xlu0 }
  0xbe   : > { %v3011_v50 = vunpack.i.l.bf16 %v3010_v49  ;;  %v3014_v51 = vunpack.i.h.bf16 %v3010_v49 }
  0xc0   : > { %232 = vmatmul.f32.vlgmr.msra.gmra.mxu0 %v3011_v50  ;;  %261 = vmatmul.f32.vlgmr.msra.gmra.mxu1 %v3014_v51 }
  0xc5   : > { %v3015_v52 = vpop.trf.xlu0 }
  0xc6   : > { %v3016_v53 = vunpack.i.l.bf16 %v3015_v52  ;;  %v3019_v54 = vunpack.i.h.bf16 %v3015_v52 }
  0xc8   : > { %235 = vmatmul.f32.gmra.mxu0 %v3016_v53  ;;  %264 = vmatmul.f32.gmra.mxu1 %v3019_v54 }
  0xcd   : > { %v3020_v55 = vpop.trf.xlu0 }
  0xce   : > { %v3021_v56 = vunpack.i.l.bf16 %v3020_v55  ;;  %v3024_v57 = vunpack.i.h.bf16 %v3020_v55 }
  0xd0   : > { %238 = vmatmul.f32.vlgmr.msra.gmra.mxu2 %v3021_v56  ;;  %267 = vmatmul.f32.vlgmr.msra.gmra.mxu3 %v3024_v57 }
  0xd5   : > { %v3025_v58 = vpop.trf.xlu0 }
  0xd6   : > { %v3026_v59 = vunpack.i.l.bf16 %v3025_v58  ;;  %v3029_v60 = vunpack.i.h.bf16 %v3025_v58 }
  0xd8   : > { %241 = vmatmul.f32.gmra.mxu2 %v3026_v59  ;;  %270 = vmatmul.f32.gmra.mxu3 %v3029_v60 }
 0x13d   : > { %v233_v61 = vpop.f32.mrf.mxu0  ;;  %v262_v63 = vpop.f32.mrf.mxu1 }
 0x13e   : > { %v263_v0 = vadd.f32 %v262_v63, %v233_v61 }
 0x140   : > { %v274_v1 = vadd.f32 %v263_v0, %v148_v62 }
 0x142   : > { %279 = vst.msk [vmem:[#allocation2] sm:$0xff] %vm278_vm1, %v274_v1 }
 0x145   : > { %v236_v2 = vpop.f32.mrf.mxu0  ;;  %v265_v4 = vpop.f32.mrf.mxu1 }
 0x146   : > { %v266_v5 = vadd.f32 %v265_v4, %v236_v2 }
 0x148   : > { %v275_v6 = vadd.f32 %v266_v5, %v149_v3 }
 0x14a   : > { %280 = vst.msk [vmem:[#allocation2 + $0x8] sm:$0xff] %vm278_vm1, %v275_v6 }
 0x153   : > { %v239_v7 = vpop.f32.mrf.mxu2  ;;  %v268_v9 = vpop.f32.mrf.mxu3 }
 0x154   : > { %v269_v10 = vadd.f32 %v268_v9, %v239_v7 }
 0x156   : > { %v276_v11 = vadd.f32 %v269_v10, %v150_v8 }
 0x158   : > { %281 = vst.msk [vmem:[#allocation2 + $0x10] sm:$0xff] %vm278_vm1, %v276_v11 }
 0x15b   : > { %v242_v12 = vpop.f32.mrf.mxu2  ;;  %v271_v14 = vpop.f32.mrf.mxu3 }
 0x15c   : > { %v272_v15 = vadd.f32 %v271_v14, %v242_v12  ;;  %286 = sbr.rel (%p2716_p5) target bundleno = 6598 (0x19c6), region = 32 }
 0x15e   : > { %v277_v16 = vadd.f32 %v272_v15, %v151_v13 }
 0x160   : > { %282 = vst.msk [vmem:[#allocation2 + $0x18] sm:$0xff] %vm278_vm1, %v277_v16 }
 0x161   : > { %v3301_v17 = vld [vmem:[#allocation2 + $0x10] sm:$0xff]  ;;  %v3303_v18 = vld [vmem:[#allocation2] sm:$0xff]  ;;  %v3310_v23 = vld [vmem:[#allocation2 + $0x8] sm:$0xff]  ;;  %v318_v56 = vlaneseq  ;;  %v3134_v62 = vmov 0.0  }
 0x162   : > { %v293_v20 = vand.u32 2147483647, %v3301_v17  ;;  %v291_v21 = vand.u32 2147483647, %v3303_v18  ;;  %v292_v26 = vand.u32 2147483647, %v3310_v23 }
 0x163   : > { %v319_v57 = vshrl.u32 %v318_v56, 7  ;;  %v324_v61 = vand.u32 127, %v318_v56 }
 0x164   : > { %v301_v24 = vsel %vm278_vm1, %v293_v20, 0.0  ;;  %v295_v25 = vsel %vm278_vm1, %v291_v21, 0.0  ;;  %v346_v27 = vsel %vm278_vm1, %v291_v21, -inf  ;;  %v348_v28 = vsel %vm278_vm1, %v293_v20, -inf }
 0x165   : > { %302 = vadd.xlane.f32.xlu1 %v301_v24  ;;  %296 = vadd.xlane.f32.xlu0 %v295_v25  ;;  %v347_v30 = vsel %vm278_vm1, %v292_v26, -inf  ;;  %v298_v35 = vsel %vm278_vm1, %v292_v26, 0.0  ;;  %v320_v58 = vadd.s32 8, %v319_v57  ;;  %v321_v59 = vadd.s32 16, %v319_v57 }
 0x166   : > { %v350_v32 = vmax.f32 %v346_v27, %v347_v30  ;;  %v322_v60 = vadd.s32 24, %v319_v57  ;;  %vm325_vm2 = vcmp.eq.s32.totalorder %v319_v57, %v324_v61 }
 0x167   : > { %v3305_v19 = vld [vmem:[#allocation2 + $0x18] sm:$0xff]  ;;  %vm326_vm3 = vcmp.eq.s32.totalorder %v320_v58, %v324_v61  ;;  %vm327_vm4 = vcmp.eq.s32.totalorder %v321_v59, %v324_v61  ;;  %v2717_v63 = vsel %vm325_vm2, 1.0, %v3134_v62 }
 0x168   : > { %v294_v22 = vand.u32 2147483647, %v3305_v19  ;;  %vm328_vm5 = vcmp.eq.s32.totalorder %v322_v60, %v324_v61  ;;  %v2718_v0 = vsel %vm326_vm3, 1.0, %v3134_v62  ;;  %v2719_v1 = vsel %vm327_vm4, 1.0, %v3134_v62 }
 0x169   : > { %v2720_v2 = vsel %vm328_vm5, 1.0, %v3134_v62 }
 0x16a   : > { %v349_v29 = vsel %vm278_vm1, %v294_v22, -inf  ;;  %v304_v34 = vsel %vm278_vm1, %v294_v22, 0.0 }
 0x16b   : > { %v351_v31 = vmax.f32 %v348_v28, %v349_v29 }
 0x16d   : > { %v352_v33 = vmax.f32 %v350_v32, %v351_v31  ;;  %305 = vadd.xlane.f32.xlu1 %v304_v34  ;;  %299 = vadd.xlane.f32.xlu0 %v298_v35 }
 0x16f   : > { %353 = vmax.xlane.f32.xlu2 %v352_v33 }
 0x1d8   : > { %v303_v36 = vpop.xlane.xlu1 %302  ;;  %v297_v37 = vpop.xlane.xlu0 %296 }
 0x1e0   : > { %v306_v40 = vpop.xlane.xlu1 %305  ;;  %v300_v41 = vpop.xlane.xlu0 %299 }
 0x1e1   : > { %v308_v42 = vmax.f32 %v303_v36, %v306_v40  ;;  %v307_v43 = vmax.f32 %v297_v37, %v300_v41 }
 0x1e2   : > { %v354_v38 = vpop.xlane.xlu2 %353 }
 0x1e3   : > { %v355_v39 = vrot.slane %v354_v38, 4  ;;  %v309_v45 = vmax.f32 %v307_v43, %v308_v42 }
 0x1e5   : > { %v356_v44 = vmax.f32 %v354_v38, %v355_v39  ;;  %v310_v47 = vrot.slane %v309_v45, 4 }
 0x1e7   : > { %v357_v46 = vrot.slane %v356_v44, 2  ;;  %v311_v49 = vmax.f32 %v309_v45, %v310_v47 }
 0x1e9   : > { %v358_v48 = vmax.f32 %v356_v44, %v357_v46  ;;  %v312_v50 = vrot.slane %v311_v49, 2 }
 0x1eb   : > { %v359_v51 = vrot.slane %v358_v48, 1  ;;  %v313_v52 = vmax.f32 %v311_v49, %v312_v50 }
 0x1ed   : > { %v314_v53 = vrot.slane %v313_v52, 1  ;;  %v360_v54 = vmax.f32 %v358_v48, %v359_v51 }
 0x1ef   : > { %v315_v55 = vmax.f32 %v313_v52, %v314_v53 }
 0x1f1   : > { %2885 = vpush %v315_v55 }
 0x1f2   : > { %2887 = vpush %v360_v54 }
 0x222   : > { %s2886_s14 = spop %2885 }
 0x223   : > { %s3322_s16 = smax.f32 %s3135_s15, %s2886_s14  ;;  %s2888_s17 = spop %2887 }
 0x224   : > { %v337_v3 = vstv %s3322_s16  ;;  %v362_v4 = vstv %s2888_s17 }
 0x225   : > { %v338_v5 = vmul.f32 %v2717_v63, %v337_v3  ;;  %v339_v6 = vmul.f32 %v2718_v0, %v337_v3  ;;  %v340_v7 = vmul.f32 %v2719_v1, %v337_v3  ;;  %v341_v8 = vmul.f32 %v2720_v2, %v337_v3 }
 0x226   : > { %v363_v9 = vadd.f32 1e-37, %v362_v4 }
 0x227   : > { %v3326_v10 = vsub.f32 %v338_v5, %v3303_v18  ;;  %v3329_v11 = vsub.f32 %v339_v6, %v3310_v23  ;;  %v3332_v12 = vsub.f32 %v340_v7, %v3301_v17  ;;  %v3335_v13 = vsub.f32 %v341_v8, %v3305_v19 }
 0x228   : > { %3030 = vrcp.f32 %v363_v9 }
 0x229   : > { %v369_v14 = vand.u32 2147483647, %v3326_v10  ;;  %v370_v15 = vand.u32 2147483647, %v3329_v11  ;;  %v371_v16 = vand.u32 2147483647, %v3332_v12 }
 0x22a   : > { %v372_v20 = vand.u32 2147483647, %v3335_v13 }
 0x22b   : > { %v373_v21 = vsel %vm278_vm1, %v369_v14, -inf  ;;  %v374_v22 = vsel %vm278_vm1, %v370_v15, -inf  ;;  %v375_v24 = vsel %vm278_vm1, %v371_v16, -inf }
 0x22c   : > { %v376_v25 = vsel %vm278_vm1, %v372_v20, -inf  ;;  %v377_v26 = vmax.f32 %v373_v21, %v374_v22 }
 0x22d   : > { %v378_v27 = vmax.f32 %v375_v24, %v376_v25 }
 0x22e   : > { %v3031_v28 = vpop.eup %3030 }
 0x22f   : > { %v368_v29 = vmul.f32 %v3031_v28, %v3305_v19  ;;  %v379_v30 = vmax.f32 %v377_v26, %v378_v27  ;;  %v367_v31 = vmul.f32 %v3031_v28, %v3301_v17  ;;  %v366_v32 = vmul.f32 %v3031_v28, %v3310_v23 }
 0x230   : > { %v365_v33 = vmul.f32 %v3031_v28, %v3303_v18 }
 0x231   : > { %420 = vmatpush.msra.mxu0 %v368_v29  ;;  %380 = vmax.xlane.f32.xlu2 %v379_v30 }
 0x233   : > { %421 = vmatpush.msra.mxu0 %v367_v31 }
 0x235   : > { %422 = vmatpush.msra.mxu0 %v366_v32 }
 0x237   : > { %423 = vmatpush.msra.mxu0 %v365_v33 }
 0x238   : > { %2721 = vmatmul.msk.f32.vlgmr.msra.gmra.mxu0 %vm278_vm1, %v365_v33 }
 0x240   : > { %2722 = vmatmul.msk.f32.gmra.mxu0 %vm278_vm1, %v366_v32 }
 0x248   : > { %2723 = vmatmul.msk.f32.gmra.mxu0 %vm278_vm1, %v367_v31 }
 0x250   : > { %2724 = vmatmul.msk.f32.gmra.mxu0 %vm278_vm1, %v368_v29 }
 0x2a4   : > { %v381_v19 = vpop.xlane.xlu2 %380 }
 0x2a5   : > { %v382_v34 = vrot.slane %v381_v19, 4 }
 0x2a7   : > { %v383_v17 = vmax.f32 %v381_v19, %v382_v34 }
 0x2a9   : > { %v384_v35 = vrot.slane %v383_v17, 2 }
 0x2ab   : > { %v385_v36 = vmax.f32 %v383_v17, %v384_v35 }
 0x2ad   : > { %v386_v37 = vrot.slane %v385_v36, 1 }
 0x2af   : > { %v387_v23 = vmax.f32 %v385_v36, %v386_v37 }
 0x2b1   : > { %2889 = vpush %v387_v23 }
 0x2b5   : > { %v3353_v38 = vpop.f32.mrf.mxu0 }
 0x2b6   : > { %v437_v40 = vand.u32 2147483647, %v3353_v38 }
 0x2b8   : > { %v441_v43 = vsel %vm278_vm1, %v437_v40, -inf }
 0x2bd   : > { %v3355_v18 = vpop.f32.mrf.mxu0 }
 0x2be   : > { %v438_v41 = vand.u32 2147483647, %v3355_v18 }
 0x2c0   : > { %v442_v44 = vsel %vm278_vm1, %v438_v41, -inf }
 0x2c1   : > { %v445_v48 = vmax.f32 %v441_v43, %v442_v44 }
 0x2c5   : > { %v431_v39 = vpop.f32.mrf.mxu0 }
 0x2c6   : > { %v439_v42 = vand.u32 2147483647, %v431_v39 }
 0x2c8   : > { %v443_v46 = vsel %vm278_vm1, %v439_v42, -inf }
 0x2cd   : > { %v434_v45 = vpop.f32.mrf.mxu0 }
 0x2ce   : > { %v440_v47 = vand.u32 2147483647, %v434_v45 }
 0x2d0   : > { %v444_v49 = vsel %vm278_vm1, %v440_v47, -inf }
 0x2d1   : > { %v446_v50 = vmax.f32 %v443_v46, %v444_v49 }
 0x2d3   : > { %v447_v51 = vmax.f32 %v445_v48, %v446_v50 }
 0x2d5   : > { %448 = vmax.xlane.f32.xlu0 %v447_v51 }
 0x2e2   : > { %s2890_s18 = spop %2889 }
 0x2e3   : > { %v389_v52 = vstv %s2890_s18 }
 0x2e4   : > { %v390_v53 = vadd.f32 1e-37, %v389_v52 }
 0x2e6   : > { %3032 = vrcp.f32 %v390_v53 }
 0x2ec   : > { %v3033_v54 = vpop.eup %3032 }
 0x2ed   : > { %v395_v55 = vmul.f32 %v3033_v54, %v3335_v13  ;;  %v394_v56 = vmul.f32 %v3033_v54, %v3332_v12  ;;  %v393_v57 = vmul.f32 %v3033_v54, %v3329_v11  ;;  %v392_v58 = vmul.f32 %v3033_v54, %v3326_v10 }
 0x2ef   : > { %488 = vmatpush.msra.mxu1 %v395_v55 }
 0x2f1   : > { %489 = vmatpush.msra.mxu1 %v394_v56 }
 0x2f3   : > { %490 = vmatpush.msra.mxu1 %v393_v57 }
 0x2f5   : > { %491 = vmatpush.msra.mxu1 %v392_v58 }
 0x2f6   : > { %2725 = vmatmul.msk.f32.vlgmr.msra.gmra.mxu1 %vm278_vm1, %v392_v58 }
 0x2fe   : > { %2726 = vmatmul.msk.f32.gmra.mxu1 %vm278_vm1, %v393_v57 }
 0x306   : > { %2727 = vmatmul.msk.f32.gmra.mxu1 %vm278_vm1, %v394_v56 }
 0x30e   : > { %2728 = vmatmul.msk.f32.gmra.mxu1 %vm278_vm1, %v395_v55 }
 0x348   : > { %v449_v59 = vpop.xlane.xlu0 %448 }
 0x349   : > { %v450_v60 = vrot.slane %v449_v59, 4 }
 0x34b   : > { %v451_v61 = vmax.f32 %v449_v59, %v450_v60 }
 0x34d   : > { %v452_v62 = vrot.slane %v451_v61, 2 }
 0x34f   : > { %v453_v63 = vmax.f32 %v451_v61, %v452_v62 }
 0x351   : > { %v454_v0 = vrot.slane %v453_v63, 1 }
 0x353   : > { %v455_v1 = vmax.f32 %v453_v63, %v454_v0 }
 0x355   : > { %2891 = vpush %v455_v1 }
 0x373   : > { %v3371_v2 = vpop.f32.mrf.mxu1 }
 0x374   : > { %v505_v8 = vand.u32 2147483647, %v3371_v2 }
 0x376   : > { %v509_v20 = vsel %vm278_vm1, %v505_v8, -inf }
 0x37b   : > { %v3373_v3 = vpop.f32.mrf.mxu1 }
 0x37c   : > { %v506_v6 = vand.u32 2147483647, %v3373_v3 }
 0x37e   : > { %v510_v15 = vsel %vm278_vm1, %v506_v6, -inf }
 0x37f   : > { %v513_v24 = vmax.f32 %v509_v20, %v510_v15 }
 0x383   : > { %v499_v4 = vpop.f32.mrf.mxu1 }
 0x384   : > { %v507_v9 = vand.u32 2147483647, %v499_v4 }
 0x386   : > { %s2892_s19 = spop %2891  ;;  %v511_v21 = vsel %vm278_vm1, %v507_v9, -inf }
 0x387   : > { %v457_v5 = vstv %s2892_s19 }
 0x388   : > { %v458_v7 = vadd.f32 1e-37, %v457_v5 }
 0x38a   : > { %3034 = vrcp.f32 %v458_v7 }
 0x38b   : > { %v502_v14 = vpop.f32.mrf.mxu1 }
 0x38c   : > { %v508_v16 = vand.u32 2147483647, %v502_v14 }
 0x38e   : > { %v512_v22 = vsel %vm278_vm1, %v508_v16, -inf }
 0x38f   : > { %v514_v25 = vmax.f32 %v511_v21, %v512_v22 }
 0x390   : > { %v3035_v26 = vpop.eup %3034 }
 0x391   : > { %v463_v27 = vmul.f32 %v3035_v26, %v434_v45  ;;  %v515_v28 = vmax.f32 %v513_v24, %v514_v25  ;;  %v462_v29 = vmul.f32 %v3035_v26, %v431_v39  ;;  %v461_v30 = vmul.f32 %v3035_v26, %v3355_v18 }
 0x392   : > { %v460_v31 = vmul.f32 %v3035_v26, %v3353_v38 }
 0x393   : > { %556 = vmatpush.msra.mxu2 %v463_v27  ;;  %516 = vmax.xlane.f32.xlu1 %v515_v28 }
 0x395   : > { %557 = vmatpush.msra.mxu2 %v462_v29 }
 0x397   : > { %558 = vmatpush.msra.mxu2 %v461_v30 }
 0x399   : > { %559 = vmatpush.msra.mxu2 %v460_v31 }
 0x39a   : > { %2729 = vmatmul.msk.f32.vlgmr.msra.gmra.mxu2 %vm278_vm1, %v460_v31 }
 0x3a2   : > { %2730 = vmatmul.msk.f32.gmra.mxu2 %vm278_vm1, %v461_v30 }
 0x3aa   : > { %2731 = vmatmul.msk.f32.gmra.mxu2 %vm278_vm1, %v462_v29 }
 0x3b2   : > { %2732 = vmatmul.msk.f32.gmra.mxu2 %vm278_vm1, %v463_v27 }
 0x406   : > { %v517_v32 = vpop.xlane.xlu1 %516 }
 0x407   : > { %v518_v33 = vrot.slane %v517_v32, 4 }
 0x409   : > { %v519_v19 = vmax.f32 %v517_v32, %v518_v33 }
 0x40b   : > { %v520_v34 = vrot.slane %v519_v19, 2 }
 0x40d   : > { %v521_v17 = vmax.f32 %v519_v19, %v520_v34 }
 0x40f   : > { %v522_v35 = vrot.slane %v521_v17, 1 }
 0x411   : > { %v523_v36 = vmax.f32 %v521_v17, %v522_v35 }
 0x413   : > { %2893 = vpush %v523_v36 }
 0x41d   : > { %v3387_v37 = vpop.f32.mrf.mxu2 }
 0x41e   : > { %v573_v39 = vand.u32 2147483647, %v3387_v37 }
 0x420   : > { %v577_v44 = vsel %vm278_vm1, %v573_v39, -inf }
 0x425   : > { %v3389_v23 = vpop.f32.mrf.mxu2 }
 0x426   : > { %v574_v18 = vand.u32 2147483647, %v3389_v23 }
 0x428   : > { %v578_v42 = vsel %vm278_vm1, %v574_v18, -inf }
 0x429   : > { %v581_v47 = vmax.f32 %v577_v44, %v578_v42 }
 0x42d   : > { %v567_v38 = vpop.f32.mrf.mxu2 }
 0x42e   : > { %v575_v40 = vand.u32 2147483647, %v567_v38 }
 0x430   : > { %v579_v45 = vsel %vm278_vm1, %v575_v40, -inf }
 0x435   : > { %v570_v41 = vpop.f32.mrf.mxu2 }
 0x436   : > { %v576_v43 = vand.u32 2147483647, %v570_v41 }
 0x438   : > { %v580_v46 = vsel %vm278_vm1, %v576_v43, -inf }
 0x439   : > { %v582_v48 = vmax.f32 %v579_v45, %v580_v46 }
 0x43b   : > { %v583_v49 = vmax.f32 %v581_v47, %v582_v48 }
 0x43d   : > { %584 = vmax.xlane.f32.xlu2 %v583_v49 }
 0x444   : > { %s2894_s20 = spop %2893 }
 0x445   : > { %v525_v50 = vstv %s2894_s20 }
 0x446   : > { %v526_v51 = vadd.f32 1e-37, %v525_v50 }
 0x448   : > { %3036 = vrcp.f32 %v526_v51 }
 0x44e   : > { %v3037_v52 = vpop.eup %3036 }
 0x44f   : > { %v531_v53 = vmul.f32 %v3037_v52, %v502_v14  ;;  %v530_v54 = vmul.f32 %v3037_v52, %v499_v4  ;;  %v529_v55 = vmul.f32 %v3037_v52, %v3373_v3  ;;  %v528_v56 = vmul.f32 %v3037_v52, %v3371_v2 }
 0x451   : > { %624 = vmatpush.msra.mxu3 %v531_v53 }
 0x453   : > { %625 = vmatpush.msra.mxu3 %v530_v54 }
 0x455   : > { %626 = vmatpush.msra.mxu3 %v529_v55 }
 0x457   : > { %627 = vmatpush.msra.mxu3 %v528_v56 }
 0x458   : > { %2733 = vmatmul.msk.f32.vlgmr.msra.gmra.mxu3 %vm278_vm1, %v528_v56 }
 0x460   : > { %2734 = vmatmul.msk.f32.gmra.mxu3 %vm278_vm1, %v529_v55 }
 0x468   : > { %2735 = vmatmul.msk.f32.gmra.mxu3 %vm278_vm1, %v530_v54 }
 0x470   : > { %2736 = vmatmul.msk.f32.gmra.mxu3 %vm278_vm1, %v531_v53 }
 0x4b0   : > { %v585_v57 = vpop.xlane.xlu2 %584 }
 0x4b1   : > { %v586_v58 = vrot.slane %v585_v57, 4 }
 0x4b3   : > { %v587_v59 = vmax.f32 %v585_v57, %v586_v58 }
 0x4b5   : > { %v588_v60 = vrot.slane %v587_v59, 2 }
 0x4b7   : > { %v589_v61 = vmax.f32 %v587_v59, %v588_v60 }
 0x4b9   : > { %v590_v62 = vrot.slane %v589_v61, 1 }
 0x4bb   : > { %v591_v63 = vmax.f32 %v589_v61, %v590_v62 }
 0x4bd   : > { %2895 = vpush %v591_v63 }
 0x4db   : > { %v3403_v0 = vpop.f32.mrf.mxu3 }
 0x4dc   : > { %v641_v6 = vand.u32 2147483647, %v3403_v0 }
 0x4de   : > { %v645_v15 = vsel %vm278_vm1, %v641_v6, -inf }
 0x4e3   : > { %v3405_v1 = vpop.f32.mrf.mxu3 }
 0x4e4   : > { %v642_v4 = vand.u32 2147483647, %v3405_v1 }
 0x4e6   : > { %v646_v9 = vsel %vm278_vm1, %v642_v4, -inf }
 0x4e7   : > { %v649_v21 = vmax.f32 %v645_v15, %v646_v9 }
 0x4eb   : > { %v635_v2 = vpop.f32.mrf.mxu3 }
 0x4ec   : > { %v643_v7 = vand.u32 2147483647, %v635_v2 }
 0x4ee   : > { %s2896_s21 = spop %2895  ;;  %v647_v16 = vsel %vm278_vm1, %v643_v7, -inf }
 0x4ef   : > { %v593_v3 = vstv %s2896_s21 }
 0x4f0   : > { %v594_v5 = vadd.f32 1e-37, %v593_v3 }
 0x4f2   : > { %3038 = vrcp.f32 %v594_v5 }
 0x4f3   : > { %v638_v8 = vpop.f32.mrf.mxu3 }
 0x4f4   : > { %v644_v14 = vand.u32 2147483647, %v638_v8 }
 0x4f6   : > { %v648_v20 = vsel %vm278_vm1, %v644_v14, -inf }
 0x4f7   : > { %v650_v22 = vmax.f32 %v647_v16, %v648_v20 }
 0x4f8   : > { %v3039_v24 = vpop.eup %3038 }
 0x4f9   : > { %v599_v25 = vmul.f32 %v3039_v24, %v570_v41  ;;  %v651_v26 = vmax.f32 %v649_v21, %v650_v22  ;;  %v598_v27 = vmul.f32 %v3039_v24, %v567_v38  ;;  %v597_v28 = vmul.f32 %v3039_v24, %v3389_v23 }
 0x4fa   : > { %v596_v29 = vmul.f32 %v3039_v24, %v3387_v37 }
 0x4fb   : > { %692 = vmatpush.msrb.mxu0 %v599_v25  ;;  %652 = vmax.xlane.f32.xlu0 %v651_v26 }
 0x4fd   : > { %693 = vmatpush.msrb.mxu0 %v598_v27 }
 0x4ff   : > { %694 = vmatpush.msrb.mxu0 %v597_v28 }
 0x501   : > { %695 = vmatpush.msrb.mxu0 %v596_v29 }
 0x502   : > { %2737 = vmatmul.msk.f32.vlgmr.msrb.gmra.mxu0 %vm278_vm1, %v596_v29 }
 0x50a   : > { %2738 = vmatmul.msk.f32.gmra.mxu0 %vm278_vm1, %v597_v28 }
 0x512   : > { %2739 = vmatmul.msk.f32.gmra.mxu0 %vm278_vm1, %v598_v27 }
 0x51a   : > { %2740 = vmatmul.msk.f32.gmra.mxu0 %vm278_vm1, %v599_v25 }
 0x56e   : > { %v653_v30 = vpop.xlane.xlu0 %652 }
 0x56f   : > { %v654_v31 = vrot.slane %v653_v30, 4 }
 0x571   : > { %v655_v32 = vmax.f32 %v653_v30, %v654_v31 }
 0x573   : > { %v656_v33 = vrot.slane %v655_v32, 2 }
 0x575   : > { %v657_v19 = vmax.f32 %v655_v32, %v656_v33 }
 0x577   : > { %v658_v34 = vrot.slane %v657_v19, 1 }
 0x579   : > { %v659_v17 = vmax.f32 %v657_v19, %v658_v34 }
 0x57b   : > { %2897 = vpush %v659_v17 }
 0x57f   : > { %v3419_v35 = vpop.f32.mrf.mxu0 }
 0x580   : > { %v709_v38 = vand.u32 2147483647, %v3419_v35 }
 0x582   : > { %v713_v42 = vsel %vm278_vm1, %v709_v38, -inf }
 0x587   : > { %v3421_v36 = vpop.f32.mrf.mxu0 }
 0x588   : > { %v710_v23 = vand.u32 2147483647, %v3421_v36 }
 0x58a   : > { %v714_v40 = vsel %vm278_vm1, %v710_v23, -inf }
 0x58b   : > { %v717_v45 = vmax.f32 %v713_v42, %v714_v40 }
 0x58f   : > { %v703_v37 = vpop.f32.mrf.mxu0 }
 0x590   : > { %v711_v18 = vand.u32 2147483647, %v703_v37 }
 0x592   : > { %v715_v43 = vsel %vm278_vm1, %v711_v18, -inf }
 0x597   : > { %v706_v39 = vpop.f32.mrf.mxu0 }
 0x598   : > { %v712_v41 = vand.u32 2147483647, %v706_v39 }
 0x59a   : > { %v716_v44 = vsel %vm278_vm1, %v712_v41, -inf }
 0x59b   : > { %v718_v46 = vmax.f32 %v715_v43, %v716_v44 }
 0x59d   : > { %v719_v47 = vmax.f32 %v717_v45, %v718_v46 }
 0x59f   : > { %720 = vmax.xlane.f32.xlu1 %v719_v47 }
 0x5ac   : > { %s2898_s22 = spop %2897 }
 0x5ad   : > { %v661_v48 = vstv %s2898_s22 }
 0x5ae   : > { %v662_v49 = vadd.f32 1e-37, %v661_v48 }
 0x5b0   : > { %3040 = vrcp.f32 %v662_v49 }
 0x5b6   : > { %v3041_v50 = vpop.eup %3040 }
 0x5b7   : > { %v667_v51 = vmul.f32 %v3041_v50, %v638_v8  ;;  %v666_v52 = vmul.f32 %v3041_v50, %v635_v2  ;;  %v665_v53 = vmul.f32 %v3041_v50, %v3405_v1  ;;  %v664_v54 = vmul.f32 %v3041_v50, %v3403_v0 }
 0x5b9   : > { %760 = vmatpush.msrb.mxu1 %v667_v51 }
 0x5bb   : > { %761 = vmatpush.msrb.mxu1 %v666_v52 }
 0x5bd   : > { %762 = vmatpush.msrb.mxu1 %v665_v53 }
 0x5bf   : > { %763 = vmatpush.msrb.mxu1 %v664_v54 }
 0x5c0   : > { %2741 = vmatmul.msk.f32.vlgmr.msrb.gmra.mxu1 %vm278_vm1, %v664_v54 }
 0x5c8   : > { %2742 = vmatmul.msk.f32.gmra.mxu1 %vm278_vm1, %v665_v53 }
 0x5d0   : > { %2743 = vmatmul.msk.f32.gmra.mxu1 %vm278_vm1, %v666_v52 }
 0x5d8   : > { %2744 = vmatmul.msk.f32.gmra.mxu1 %vm278_vm1, %v667_v51 }
 0x612   : > { %v721_v55 = vpop.xlane.xlu1 %720 }
 0x613   : > { %v722_v56 = vrot.slane %v721_v55, 4 }
 0x615   : > { %v723_v57 = vmax.f32 %v721_v55, %v722_v56 }
 0x617   : > { %v724_v58 = vrot.slane %v723_v57, 2 }
 0x619   : > { %v725_v59 = vmax.f32 %v723_v57, %v724_v58 }
 0x61b   : > { %v726_v60 = vrot.slane %v725_v59, 1 }
 0x61d   : > { %v727_v61 = vmax.f32 %v725_v59, %v726_v60 }
 0x61f   : > { %2899 = vpush %v727_v61 }
 0x63d   : > { %v3435_v62 = vpop.f32.mrf.mxu1 }
 0x63e   : > { %v777_v4 = vand.u32 2147483647, %v3435_v62 }
 0x640   : > { %v781_v9 = vsel %vm278_vm1, %v777_v4, -inf }
 0x645   : > { %v3437_v63 = vpop.f32.mrf.mxu1 }
 0x646   : > { %v778_v2 = vand.u32 2147483647, %v3437_v63 }
 0x648   : > { %v782_v7 = vsel %vm278_vm1, %v778_v2, -inf }
 0x649   : > { %v785_v16 = vmax.f32 %v781_v9, %v782_v7 }
 0x64d   : > { %v771_v0 = vpop.f32.mrf.mxu1 }
 0x64e   : > { %v779_v5 = vand.u32 2147483647, %v771_v0 }
 0x650   : > { %s2900_s23 = spop %2899  ;;  %v783_v14 = vsel %vm278_vm1, %v779_v5, -inf }
 0x651   : > { %v729_v1 = vstv %s2900_s23 }
 0x652   : > { %v730_v3 = vadd.f32 1e-37, %v729_v1 }
 0x654   : > { %3042 = vrcp.f32 %v730_v3 }
 0x655   : > { %v774_v6 = vpop.f32.mrf.mxu1 }
 0x656   : > { %v780_v8 = vand.u32 2147483647, %v774_v6 }
 0x658   : > { %v784_v15 = vsel %vm278_vm1, %v780_v8, -inf }
 0x659   : > { %v786_v20 = vmax.f32 %v783_v14, %v784_v15 }
 0x65a   : > { %v3043_v21 = vpop.eup %3042 }
 0x65b   : > { %v735_v22 = vmul.f32 %v3043_v21, %v706_v39  ;;  %v787_v24 = vmax.f32 %v785_v16, %v786_v20  ;;  %v734_v25 = vmul.f32 %v3043_v21, %v703_v37  ;;  %v733_v26 = vmul.f32 %v3043_v21, %v3421_v36 }
 0x65c   : > { %v732_v27 = vmul.f32 %v3043_v21, %v3419_v35 }
 0x65d   : > { %828 = vmatpush.msrb.mxu2 %v735_v22  ;;  %788 = vmax.xlane.f32.xlu2 %v787_v24 }
 0x65f   : > { %829 = vmatpush.msrb.mxu2 %v734_v25 }
 0x661   : > { %830 = vmatpush.msrb.mxu2 %v733_v26 }
 0x663   : > { %831 = vmatpush.msrb.mxu2 %v732_v27 }
 0x664   : > { %2745 = vmatmul.msk.f32.vlgmr.msrb.gmra.mxu2 %vm278_vm1, %v732_v27 }
 0x66c   : > { %2746 = vmatmul.msk.f32.gmra.mxu2 %vm278_vm1, %v733_v26 }
 0x674   : > { %2747 = vmatmul.msk.f32.gmra.mxu2 %vm278_vm1, %v734_v25 }
 0x67c   : > { %2748 = vmatmul.msk.f32.gmra.mxu2 %vm278_vm1, %v735_v22 }
 0x6d0   : > { %v789_v28 = vpop.xlane.xlu2 %788 }
 0x6d1   : > { %v790_v29 = vrot.slane %v789_v28, 4 }
 0x6d3   : > { %v791_v30 = vmax.f32 %v789_v28, %v790_v29 }
 0x6d5   : > { %v792_v31 = vrot.slane %v791_v30, 2 }
 0x6d7   : > { %v793_v32 = vmax.f32 %v791_v30, %v792_v31 }
 0x6d9   : > { %v794_v33 = vrot.slane %v793_v32, 1 }
 0x6db   : > { %v795_v19 = vmax.f32 %v793_v32, %v794_v33 }
 0x6dd   : > { %2901 = vpush %v795_v19 }
 0x6e7   : > { %v3451_v34 = vpop.f32.mrf.mxu2 }
 0x6e8   : > { %v845_v37 = vand.u32 2147483647, %v3451_v34 }
 0x6ea   : > { %v849_v40 = vsel %vm278_vm1, %v845_v37, -inf }
 0x6ef   : > { %v3453_v17 = vpop.f32.mrf.mxu2 }
 0x6f0   : > { %v846_v36 = vand.u32 2147483647, %v3453_v17 }
 0x6f2   : > { %v850_v18 = vsel %vm278_vm1, %v846_v36, -inf }
 0x6f3   : > { %v853_v43 = vmax.f32 %v849_v40, %v850_v18 }
 0x6f7   : > { %v839_v35 = vpop.f32.mrf.mxu2 }
 0x6f8   : > { %v847_v23 = vand.u32 2147483647, %v839_v35 }
 0x6fa   : > { %v851_v41 = vsel %vm278_vm1, %v847_v23, -inf }
 0x6ff   : > { %v842_v38 = vpop.f32.mrf.mxu2 }
 0x700   : > { %v848_v39 = vand.u32 2147483647, %v842_v38 }
 0x702   : > { %v852_v42 = vsel %vm278_vm1, %v848_v39, -inf }
 0x703   : > { %v854_v44 = vmax.f32 %v851_v41, %v852_v42 }
 0x705   : > { %v855_v45 = vmax.f32 %v853_v43, %v854_v44 }
 0x707   : > { %856 = vmax.xlane.f32.xlu0 %v855_v45 }
 0x70e   : > { %s2902_s24 = spop %2901 }
 0x70f   : > { %v797_v46 = vstv %s2902_s24 }
 0x710   : > { %v798_v47 = vadd.f32 1e-37, %v797_v46 }
 0x712   : > { %3044 = vrcp.f32 %v798_v47 }
 0x718   : > { %v3045_v48 = vpop.eup %3044 }
 0x719   : > { %v803_v49 = vmul.f32 %v3045_v48, %v774_v6  ;;  %v802_v50 = vmul.f32 %v3045_v48, %v771_v0  ;;  %v801_v51 = vmul.f32 %v3045_v48, %v3437_v63  ;;  %v800_v52 = vmul.f32 %v3045_v48, %v3435_v62 }
 0x71b   : > { %896 = vmatpush.msrb.mxu3 %v803_v49 }
 0x71d   : > { %897 = vmatpush.msrb.mxu3 %v802_v50 }
 0x71f   : > { %898 = vmatpush.msrb.mxu3 %v801_v51 }
 0x721   : > { %899 = vmatpush.msrb.mxu3 %v800_v52 }
 0x722   : > { %2749 = vmatmul.msk.f32.vlgmr.msrb.gmra.mxu3 %vm278_vm1, %v800_v52 }
 0x72a   : > { %2750 = vmatmul.msk.f32.gmra.mxu3 %vm278_vm1, %v801_v51 }
 0x732   : > { %2751 = vmatmul.msk.f32.gmra.mxu3 %vm278_vm1, %v802_v50 }
 0x73a   : > { %2752 = vmatmul.msk.f32.gmra.mxu3 %vm278_vm1, %v803_v49 }
 0x77a   : > { %v857_v53 = vpop.xlane.xlu0 %856 }
 0x77b   : > { %v858_v54 = vrot.slane %v857_v53, 4 }
 0x77d   : > { %v859_v55 = vmax.f32 %v857_v53, %v858_v54 }
 0x77f   : > { %v860_v56 = vrot.slane %v859_v55, 2 }
 0x781   : > { %v861_v57 = vmax.f32 %v859_v55, %v860_v56 }
 0x783   : > { %v862_v58 = vrot.slane %v861_v57, 1 }
 0x785   : > { %v863_v59 = vmax.f32 %v861_v57, %v862_v58 }
 0x787   : > { %2903 = vpush %v863_v59 }
 0x7a5   : > { %v3467_v60 = vpop.f32.mrf.mxu3 }
 0x7a6   : > { %v913_v2 = vand.u32 2147483647, %v3467_v60 }
 0x7a8   : > { %v917_v7 = vsel %vm278_vm1, %v913_v2, -inf }
 0x7ad   : > { %v3469_v61 = vpop.f32.mrf.mxu3 }
 0x7ae   : > { %v914_v0 = vand.u32 2147483647, %v3469_v61 }
 0x7b0   : > { %v918_v5 = vsel %vm278_vm1, %v914_v0, -inf }
 0x7b1   : > { %v921_v14 = vmax.f32 %v917_v7, %v918_v5 }
 0x7b5   : > { %v907_v62 = vpop.f32.mrf.mxu3 }
 0x7b6   : > { %v915_v3 = vand.u32 2147483647, %v907_v62 }
 0x7b8   : > { %s2904_s25 = spop %2903  ;;  %v919_v8 = vsel %vm278_vm1, %v915_v3, -inf }
 0x7b9   : > { %v865_v63 = vstv %s2904_s25 }
 0x7ba   : > { %v866_v1 = vadd.f32 1e-37, %v865_v63 }
 0x7bc   : > { %3046 = vrcp.f32 %v866_v1 }
 0x7bd   : > { %v910_v4 = vpop.f32.mrf.mxu3 }
 0x7be   : > { %v916_v6 = vand.u32 2147483647, %v910_v4 }
 0x7c0   : > { %v920_v9 = vsel %vm278_vm1, %v916_v6, -inf }
 0x7c1   : > { %v922_v15 = vmax.f32 %v919_v8, %v920_v9 }
 0x7c2   : > { %v3047_v16 = vpop.eup %3046 }
 0x7c3   : > { %v871_v20 = vmul.f32 %v3047_v16, %v842_v38  ;;  %v923_v21 = vmax.f32 %v921_v14, %v922_v15  ;;  %v870_v22 = vmul.f32 %v3047_v16, %v839_v35  ;;  %v869_v24 = vmul.f32 %v3047_v16, %v3453_v17 }
 0x7c4   : > { %v868_v25 = vmul.f32 %v3047_v16, %v3451_v34 }
 0x7c5   : > { %964 = vmatpush.msra.mxu0 %v871_v20  ;;  %924 = vmax.xlane.f32.xlu1 %v923_v21 }
 0x7c7   : > { %965 = vmatpush.msra.mxu0 %v870_v22 }
 0x7c9   : > { %966 = vmatpush.msra.mxu0 %v869_v24 }
 0x7cb   : > { %967 = vmatpush.msra.mxu0 %v868_v25 }
 0x7cc   : > { %2753 = vmatmul.msk.f32.vlgmr.msra.gmra.mxu0 %vm278_vm1, %v868_v25 }
 0x7d4   : > { %2754 = vmatmul.msk.f32.gmra.mxu0 %vm278_vm1, %v869_v24 }
 0x7dc   : > { %2755 = vmatmul.msk.f32.gmra.mxu0 %vm278_vm1, %v870_v22 }
 0x7e4   : > { %2756 = vmatmul.msk.f32.gmra.mxu0 %vm278_vm1, %v871_v20 }
 0x838   : > { %v925_v26 = vpop.xlane.xlu1 %924 }
 0x839   : > { %v926_v27 = vrot.slane %v925_v26, 4 }
 0x83b   : > { %v927_v28 = vmax.f32 %v925_v26, %v926_v27 }
 0x83d   : > { %v928_v29 = vrot.slane %v927_v28, 2 }
 0x83f   : > { %v929_v30 = vmax.f32 %v927_v28, %v928_v29 }
 0x841   : > { %v930_v31 = vrot.slane %v929_v30, 1 }
 0x843   : > { %v931_v32 = vmax.f32 %v929_v30, %v930_v31 }
 0x845   : > { %2905 = vpush %v931_v32 }
 0x849   : > { %v3483_v33 = vpop.f32.mrf.mxu0 }
 0x84a   : > { %v981_v35 = vand.u32 2147483647, %v3483_v33 }
 0x84c   : > { %v985_v18 = vsel %vm278_vm1, %v981_v35, -inf }
 0x851   : > { %v3485_v19 = vpop.f32.mrf.mxu0 }
 0x852   : > { %v982_v17 = vand.u32 2147483647, %v3485_v19 }
 0x854   : > { %v986_v23 = vsel %vm278_vm1, %v982_v17, -inf }
 0x855   : > { %v989_v41 = vmax.f32 %v985_v18, %v986_v23 }
 0x859   : > { %v975_v34 = vpop.f32.mrf.mxu0 }
 0x85a   : > { %v983_v36 = vand.u32 2147483647, %v975_v34 }
 0x85c   : > { %v987_v39 = vsel %vm278_vm1, %v983_v36, -inf }
 0x861   : > { %v978_v37 = vpop.f32.mrf.mxu0 }
 0x862   : > { %v984_v38 = vand.u32 2147483647, %v978_v37 }
 0x864   : > { %v988_v40 = vsel %vm278_vm1, %v984_v38, -inf }
 0x865   : > { %v990_v42 = vmax.f32 %v987_v39, %v988_v40 }
 0x867   : > { %v991_v43 = vmax.f32 %v989_v41, %v990_v42 }
 0x869   : > { %992 = vmax.xlane.f32.xlu2 %v991_v43 }
 0x876   : > { %s2906_s26 = spop %2905 }
 0x877   : > { %v933_v44 = vstv %s2906_s26 }
 0x878   : > { %v934_v45 = vadd.f32 1e-37, %v933_v44 }
 0x87a   : > { %3048 = vrcp.f32 %v934_v45 }
 0x880   : > { %v3049_v46 = vpop.eup %3048 }
 0x881   : > { %v939_v47 = vmul.f32 %v3049_v46, %v910_v4  ;;  %v938_v48 = vmul.f32 %v3049_v46, %v907_v62  ;;  %v937_v49 = vmul.f32 %v3049_v46, %v3469_v61  ;;  %v936_v50 = vmul.f32 %v3049_v46, %v3467_v60 }
 0x883   : > { %1032 = vmatpush.msra.mxu1 %v939_v47 }
 0x885   : > { %1033 = vmatpush.msra.mxu1 %v938_v48 }
 0x887   : > { %1034 = vmatpush.msra.mxu1 %v937_v49 }
 0x889   : > { %1035 = vmatpush.msra.mxu1 %v936_v50 }
 0x88a   : > { %2757 = vmatmul.msk.f32.vlgmr.msra.gmra.mxu1 %vm278_vm1, %v936_v50 }
 0x892   : > { %2758 = vmatmul.msk.f32.gmra.mxu1 %vm278_vm1, %v937_v49 }
 0x89a   : > { %2759 = vmatmul.msk.f32.gmra.mxu1 %vm278_vm1, %v938_v48 }
 0x8a2   : > { %2760 = vmatmul.msk.f32.gmra.mxu1 %vm278_vm1, %v939_v47 }
 0x8dc   : > { %v993_v51 = vpop.xlane.xlu2 %992 }
 0x8dd   : > { %v994_v52 = vrot.slane %v993_v51, 4 }
 0x8df   : > { %v995_v53 = vmax.f32 %v993_v51, %v994_v52 }
 0x8e1   : > { %v996_v54 = vrot.slane %v995_v53, 2 }
 0x8e3   : > { %v997_v55 = vmax.f32 %v995_v53, %v996_v54 }
 0x8e5   : > { %v998_v56 = vrot.slane %v997_v55, 1 }
 0x8e7   : > { %v999_v57 = vmax.f32 %v997_v55, %v998_v56 }
 0x8e9   : > { %2907 = vpush %v999_v57 }
 0x907   : > { %v3499_v58 = vpop.f32.mrf.mxu1 }
 0x908   : > { %v1049_v0 = vand.u32 2147483647, %v3499_v58 }
 0x90a   : > { %v1053_v5 = vsel %vm278_vm1, %v1049_v0, -inf }
 0x90f   : > { %v3501_v59 = vpop.f32.mrf.mxu1 }
 0x910   : > { %v1050_v62 = vand.u32 2147483647, %v3501_v59 }
 0x912   : > { %v1054_v3 = vsel %vm278_vm1, %v1050_v62, -inf }
 0x913   : > { %v1057_v8 = vmax.f32 %v1053_v5, %v1054_v3 }
 0x917   : > { %v1043_v60 = vpop.f32.mrf.mxu1 }
 0x918   : > { %v1051_v1 = vand.u32 2147483647, %v1043_v60 }
 0x91a   : > { %s2908_s27 = spop %2907  ;;  %v1055_v6 = vsel %vm278_vm1, %v1051_v1, -inf }
 0x91b   : > { %v1001_v61 = vstv %s2908_s27 }
 0x91c   : > { %v1002_v63 = vadd.f32 1e-37, %v1001_v61 }
 0x91e   : > { %3050 = vrcp.f32 %v1002_v63 }
 0x91f   : > { %v1046_v2 = vpop.f32.mrf.mxu1 }
 0x920   : > { %v1052_v4 = vand.u32 2147483647, %v1046_v2 }
 0x922   : > { %v1056_v7 = vsel %vm278_vm1, %v1052_v4, -inf }
 0x923   : > { %v1058_v9 = vmax.f32 %v1055_v6, %v1056_v7 }
 0x924   : > { %v3051_v14 = vpop.eup %3050 }
 0x925   : > { %v1007_v15 = vmul.f32 %v3051_v14, %v978_v37  ;;  %v1059_v16 = vmax.f32 %v1057_v8, %v1058_v9  ;;  %v1006_v20 = vmul.f32 %v3051_v14, %v975_v34  ;;  %v1005_v21 = vmul.f32 %v3051_v14, %v3485_v19 }
 0x926   : > { %v1004_v22 = vmul.f32 %v3051_v14, %v3483_v33 }
 0x927   : > { %1100 = vmatpush.msra.mxu2 %v1007_v15  ;;  %1060 = vmax.xlane.f32.xlu0 %v1059_v16 }
 0x929   : > { %1101 = vmatpush.msra.mxu2 %v1006_v20 }
 0x92b   : > { %1102 = vmatpush.msra.mxu2 %v1005_v21 }
 0x92d   : > { %1103 = vmatpush.msra.mxu2 %v1004_v22 }
 0x92e   : > { %2761 = vmatmul.msk.f32.vlgmr.msra.gmra.mxu2 %vm278_vm1, %v1004_v22 }
 0x936   : > { %2762 = vmatmul.msk.f32.gmra.mxu2 %vm278_vm1, %v1005_v21 }
 0x93e   : > { %2763 = vmatmul.msk.f32.gmra.mxu2 %vm278_vm1, %v1006_v20 }
 0x946   : > { %2764 = vmatmul.msk.f32.gmra.mxu2 %vm278_vm1, %v1007_v15 }
 0x99a   : > { %v1061_v24 = vpop.xlane.xlu0 %1060 }
 0x99b   : > { %v1062_v25 = vrot.slane %v1061_v24, 4 }
 0x99d   : > { %v1063_v26 = vmax.f32 %v1061_v24, %v1062_v25 }
 0x99f   : > { %v1064_v27 = vrot.slane %v1063_v26, 2 }
 0x9a1   : > { %v1065_v28 = vmax.f32 %v1063_v26, %v1064_v27 }
 0x9a3   : > { %v1066_v29 = vrot.slane %v1065_v28, 1 }
 0x9a5   : > { %v1067_v30 = vmax.f32 %v1065_v28, %v1066_v29 }
 0x9a7   : > { %2909 = vpush %v1067_v30 }
 0x9b1   : > { %v3515_v31 = vpop.f32.mrf.mxu2 }
 0x9b2   : > { %v1117_v34 = vand.u32 2147483647, %v3515_v31 }
 0x9b4   : > { %v1121_v23 = vsel %vm278_vm1, %v1117_v34, -inf }
 0x9b9   : > { %v3517_v32 = vpop.f32.mrf.mxu2 }
 0x9ba   : > { %v1118_v19 = vand.u32 2147483647, %v3517_v32 }
 0x9bc   : > { %v1122_v36 = vsel %vm278_vm1, %v1118_v19, -inf }
 0x9bd   : > { %v1125_v39 = vmax.f32 %v1121_v23, %v1122_v36 }
 0x9c1   : > { %v1111_v33 = vpop.f32.mrf.mxu2 }
 0x9c2   : > { %v1119_v17 = vand.u32 2147483647, %v1111_v33 }
 0x9c4   : > { %v1123_v38 = vsel %vm278_vm1, %v1119_v17, -inf }
 0x9c9   : > { %v1114_v35 = vpop.f32.mrf.mxu2 }
 0x9ca   : > { %v1120_v37 = vand.u32 2147483647, %v1114_v35 }
 0x9cc   : > { %v1124_v18 = vsel %vm278_vm1, %v1120_v37, -inf }
 0x9cd   : > { %v1126_v40 = vmax.f32 %v1123_v38, %v1124_v18 }
 0x9cf   : > { %v1127_v41 = vmax.f32 %v1125_v39, %v1126_v40 }
 0x9d1   : > { %1128 = vmax.xlane.f32.xlu1 %v1127_v41 }
 0x9d8   : > { %s2910_s28 = spop %2909 }
 0x9d9   : > { %v1069_v42 = vstv %s2910_s28 }
 0x9da   : > { %v1070_v43 = vadd.f32 1e-37, %v1069_v42 }
 0x9dc   : > { %3052 = vrcp.f32 %v1070_v43 }
 0x9e2   : > { %v3053_v44 = vpop.eup %3052 }
 0x9e3   : > { %v1075_v45 = vmul.f32 %v3053_v44, %v1046_v2  ;;  %v1074_v46 = vmul.f32 %v3053_v44, %v1043_v60  ;;  %v1073_v47 = vmul.f32 %v3053_v44, %v3501_v59  ;;  %v1072_v48 = vmul.f32 %v3053_v44, %v3499_v58 }
 0x9e5   : > { %1168 = vmatpush.msra.mxu3 %v1075_v45 }
 0x9e7   : > { %1169 = vmatpush.msra.mxu3 %v1074_v46 }
 0x9e9   : > { %1170 = vmatpush.msra.mxu3 %v1073_v47 }
 0x9eb   : > { %1171 = vmatpush.msra.mxu3 %v1072_v48 }
 0x9ec   : > { %2765 = vmatmul.msk.f32.vlgmr.msra.gmra.mxu3 %vm278_vm1, %v1072_v48 }
 0x9f4   : > { %2766 = vmatmul.msk.f32.gmra.mxu3 %vm278_vm1, %v1073_v47 }
 0x9fc   : > { %2767 = vmatmul.msk.f32.gmra.mxu3 %vm278_vm1, %v1074_v46 }
 0xa04   : > { %2768 = vmatmul.msk.f32.gmra.mxu3 %vm278_vm1, %v1075_v45 }
 0xa44   : > { %v1129_v49 = vpop.xlane.xlu1 %1128 }
 0xa45   : > { %v1130_v50 = vrot.slane %v1129_v49, 4 }
 0xa47   : > { %v1131_v51 = vmax.f32 %v1129_v49, %v1130_v50 }
 0xa49   : > { %v1132_v52 = vrot.slane %v1131_v51, 2 }
 0xa4b   : > { %v1133_v53 = vmax.f32 %v1131_v51, %v1132_v52 }
 0xa4d   : > { %v1134_v54 = vrot.slane %v1133_v53, 1 }
 0xa4f   : > { %v1135_v55 = vmax.f32 %v1133_v53, %v1134_v54 }
 0xa51   : > { %2911 = vpush %v1135_v55 }
 0xa6f   : > { %v3531_v56 = vpop.f32.mrf.mxu3 }
 0xa70   : > { %v1185_v62 = vand.u32 2147483647, %v3531_v56 }
 0xa72   : > { %v1189_v3 = vsel %vm278_vm1, %v1185_v62, -inf }
 0xa77   : > { %v3533_v57 = vpop.f32.mrf.mxu3 }
 0xa78   : > { %v1186_v60 = vand.u32 2147483647, %v3533_v57 }
 0xa7a   : > { %v1190_v1 = vsel %vm278_vm1, %v1186_v60, -inf }
 0xa7b   : > { %v1193_v6 = vmax.f32 %v1189_v3, %v1190_v1 }
 0xa7f   : > { %v1179_v58 = vpop.f32.mrf.mxu3 }
 0xa80   : > { %v1187_v63 = vand.u32 2147483647, %v1179_v58 }
 0xa82   : > { %s2912_s29 = spop %2911  ;;  %v1191_v4 = vsel %vm278_vm1, %v1187_v63, -inf }
 0xa83   : > { %v1137_v59 = vstv %s2912_s29 }
 0xa84   : > { %v1138_v61 = vadd.f32 1e-37, %v1137_v59 }
 0xa86   : > { %3054 = vrcp.f32 %v1138_v61 }
 0xa87   : > { %v1182_v0 = vpop.f32.mrf.mxu3 }
 0xa88   : > { %v1188_v2 = vand.u32 2147483647, %v1182_v0 }
 0xa8a   : > { %v1192_v5 = vsel %vm278_vm1, %v1188_v2, -inf }
 0xa8b   : > { %v1194_v7 = vmax.f32 %v1191_v4, %v1192_v5 }
 0xa8c   : > { %v3055_v8 = vpop.eup %3054 }
 0xa8d   : > { %v1143_v9 = vmul.f32 %v3055_v8, %v1114_v35  ;;  %v1195_v14 = vmax.f32 %v1193_v6, %v1194_v7  ;;  %v1142_v15 = vmul.f32 %v3055_v8, %v1111_v33  ;;  %v1141_v16 = vmul.f32 %v3055_v8, %v3517_v32 }
 0xa8e   : > { %v1140_v20 = vmul.f32 %v3055_v8, %v3515_v31 }
 0xa8f   : > { %1236 = vmatpush.msrb.mxu0 %v1143_v9  ;;  %1196 = vmax.xlane.f32.xlu2 %v1195_v14 }
 0xa91   : > { %1237 = vmatpush.msrb.mxu0 %v1142_v15 }
 0xa93   : > { %1238 = vmatpush.msrb.mxu0 %v1141_v16 }
 0xa95   : > { %1239 = vmatpush.msrb.mxu0 %v1140_v20 }
 0xa96   : > { %2769 = vmatmul.msk.f32.vlgmr.msrb.gmra.mxu0 %vm278_vm1, %v1140_v20 }
 0xa9e   : > { %2770 = vmatmul.msk.f32.gmra.mxu0 %vm278_vm1, %v1141_v16 }
 0xaa6   : > { %2771 = vmatmul.msk.f32.gmra.mxu0 %vm278_vm1, %v1142_v15 }
 0xaae   : > { %2772 = vmatmul.msk.f32.gmra.mxu0 %vm278_vm1, %v1143_v9 }
 0xb02   : > { %v1197_v21 = vpop.xlane.xlu2 %1196 }
 0xb03   : > { %v1198_v22 = vrot.slane %v1197_v21, 4 }
 0xb05   : > { %v1199_v24 = vmax.f32 %v1197_v21, %v1198_v22 }
 0xb07   : > { %v1200_v25 = vrot.slane %v1199_v24, 2 }
 0xb09   : > { %v1201_v26 = vmax.f32 %v1199_v24, %v1200_v25 }
 0xb0b   : > { %v1202_v27 = vrot.slane %v1201_v26, 1 }
 0xb0d   : > { %v1203_v28 = vmax.f32 %v1201_v26, %v1202_v27 }
 0xb0f   : > { %2913 = vpush %v1203_v28 }
 0xb13   : > { %v3547_v29 = vpop.f32.mrf.mxu0 }
 0xb14   : > { %v1253_v33 = vand.u32 2147483647, %v3547_v29 }
 0xb16   : > { %v1257_v36 = vsel %vm278_vm1, %v1253_v33, -inf }
 0xb1b   : > { %v3549_v30 = vpop.f32.mrf.mxu0 }
 0xb1c   : > { %v1254_v32 = vand.u32 2147483647, %v3549_v30 }
 0xb1e   : > { %v1258_v17 = vsel %vm278_vm1, %v1254_v32, -inf }
 0xb1f   : > { %v1261_v38 = vmax.f32 %v1257_v36, %v1258_v17 }
 0xb23   : > { %v1247_v31 = vpop.f32.mrf.mxu0 }
 0xb24   : > { %v1255_v19 = vand.u32 2147483647, %v1247_v31 }
 0xb26   : > { %v1259_v37 = vsel %vm278_vm1, %v1255_v19, -inf }
 0xb2b   : > { %v1250_v34 = vpop.f32.mrf.mxu0 }
 0xb2c   : > { %v1256_v35 = vand.u32 2147483647, %v1250_v34 }
 0xb2e   : > { %v1260_v23 = vsel %vm278_vm1, %v1256_v35, -inf }
 0xb2f   : > { %v1262_v18 = vmax.f32 %v1259_v37, %v1260_v23 }
 0xb31   : > { %v1263_v39 = vmax.f32 %v1261_v38, %v1262_v18 }
 0xb33   : > { %1264 = vmax.xlane.f32.xlu0 %v1263_v39 }
 0xb40   : > { %s2914_s30 = spop %2913 }
 0xb41   : > { %v1205_v40 = vstv %s2914_s30 }
 0xb42   : > { %v1206_v41 = vadd.f32 1e-37, %v1205_v40 }
 0xb44   : > { %3056 = vrcp.f32 %v1206_v41 }
 0xb4a   : > { %v3057_v42 = vpop.eup %3056 }
 0xb4b   : > { %v1211_v43 = vmul.f32 %v3057_v42, %v1182_v0  ;;  %v1210_v44 = vmul.f32 %v3057_v42, %v1179_v58  ;;  %v1209_v45 = vmul.f32 %v3057_v42, %v3533_v57  ;;  %v1208_v46 = vmul.f32 %v3057_v42, %v3531_v56 }
 0xb4d   : > { %1304 = vmatpush.msrb.mxu1 %v1211_v43 }
 0xb4f   : > { %1305 = vmatpush.msrb.mxu1 %v1210_v44 }
 0xb51   : > { %1306 = vmatpush.msrb.mxu1 %v1209_v45 }
 0xb53   : > { %1307 = vmatpush.msrb.mxu1 %v1208_v46 }
 0xb54   : > { %2773 = vmatmul.msk.f32.vlgmr.msrb.gmra.mxu1 %vm278_vm1, %v1208_v46 }
 0xb5c   : > { %2774 = vmatmul.msk.f32.gmra.mxu1 %vm278_vm1, %v1209_v45 }
 0xb64   : > { %2775 = vmatmul.msk.f32.gmra.mxu1 %vm278_vm1, %v1210_v44 }
 0xb6c   : > { %2776 = vmatmul.msk.f32.gmra.mxu1 %vm278_vm1, %v1211_v43 }
 0xba6   : > { %v1265_v47 = vpop.xlane.xlu0 %1264 }
 0xba7   : > { %v1266_v48 = vrot.slane %v1265_v47, 4 }
 0xba9   : > { %v1267_v49 = vmax.f32 %v1265_v47, %v1266_v48 }
 0xbab   : > { %v1268_v50 = vrot.slane %v1267_v49, 2 }
 0xbad   : > { %v1269_v51 = vmax.f32 %v1267_v49, %v1268_v50 }
 0xbaf   : > { %v1270_v52 = vrot.slane %v1269_v51, 1 }
 0xbb1   : > { %v1271_v53 = vmax.f32 %v1269_v51, %v1270_v52 }
 0xbb3   : > { %2915 = vpush %v1271_v53 }
 0xbd1   : > { %v3563_v54 = vpop.f32.mrf.mxu1 }
 0xbd2   : > { %v1321_v60 = vand.u32 2147483647, %v3563_v54 }
 0xbd4   : > { %v1325_v1 = vsel %vm278_vm1, %v1321_v60, -inf }
 0xbd9   : > { %v3565_v55 = vpop.f32.mrf.mxu1 }
 0xbda   : > { %v1322_v58 = vand.u32 2147483647, %v3565_v55 }
 0xbdc   : > { %v1326_v63 = vsel %vm278_vm1, %v1322_v58, -inf }
 0xbdd   : > { %v1329_v4 = vmax.f32 %v1325_v1, %v1326_v63 }
 0xbe1   : > { %v1315_v56 = vpop.f32.mrf.mxu1 }
 0xbe2   : > { %v1323_v61 = vand.u32 2147483647, %v1315_v56 }
 0xbe4   : > { %s2916_s2 = spop %2915  ;;  %v1327_v2 = vsel %vm278_vm1, %v1323_v61, -inf }
 0xbe5   : > { %v1273_v57 = vstv %s2916_s2 }
 0xbe6   : > { %v1274_v59 = vadd.f32 1e-37, %v1273_v57 }
 0xbe8   : > { %3058 = vrcp.f32 %v1274_v59 }
 0xbe9   : > { %v1318_v62 = vpop.f32.mrf.mxu1 }
 0xbea   : > { %v1324_v0 = vand.u32 2147483647, %v1318_v62 }
 0xbec   : > { %v1328_v3 = vsel %vm278_vm1, %v1324_v0, -inf }
 0xbed   : > { %v1330_v5 = vmax.f32 %v1327_v2, %v1328_v3 }
 0xbee   : > { %v3059_v6 = vpop.eup %3058 }
 0xbef   : > { %v1279_v7 = vmul.f32 %v3059_v6, %v1250_v34  ;;  %v1331_v8 = vmax.f32 %v1329_v4, %v1330_v5  ;;  %v1278_v9 = vmul.f32 %v3059_v6, %v1247_v31  ;;  %v1277_v14 = vmul.f32 %v3059_v6, %v3549_v30 }
 0xbf0   : > { %v1276_v15 = vmul.f32 %v3059_v6, %v3547_v29 }
 0xbf1   : > { %1372 = vmatpush.msrb.mxu2 %v1279_v7  ;;  %1332 = vmax.xlane.f32.xlu1 %v1331_v8 }
 0xbf3   : > { %1373 = vmatpush.msrb.mxu2 %v1278_v9 }
 0xbf5   : > { %1374 = vmatpush.msrb.mxu2 %v1277_v14 }
 0xbf7   : > { %1375 = vmatpush.msrb.mxu2 %v1276_v15 }
 0xbf8   : > { %2777 = vmatmul.msk.f32.vlgmr.msrb.gmra.mxu2 %vm278_vm1, %v1276_v15 }
 0xc00   : > { %2778 = vmatmul.msk.f32.gmra.mxu2 %vm278_vm1, %v1277_v14 }
 0xc08   : > { %2779 = vmatmul.msk.f32.gmra.mxu2 %vm278_vm1, %v1278_v9 }
 0xc10   : > { %2780 = vmatmul.msk.f32.gmra.mxu2 %vm278_vm1, %v1279_v7 }
 0xc64   : > { %v1333_v16 = vpop.xlane.xlu1 %1332 }
 0xc65   : > { %v1334_v20 = vrot.slane %v1333_v16, 4 }
 0xc67   : > { %v1335_v21 = vmax.f32 %v1333_v16, %v1334_v20 }
 0xc69   : > { %v1336_v22 = vrot.slane %v1335_v21, 2 }
 0xc6b   : > { %v1337_v24 = vmax.f32 %v1335_v21, %v1336_v22 }
 0xc6d   : > { %v1338_v25 = vrot.slane %v1337_v24, 1 }
 0xc6f   : > { %v1339_v26 = vmax.f32 %v1337_v24, %v1338_v25 }
 0xc71   : > { %2917 = vpush %v1339_v26 }
 0xc7b   : > { %v3579_v27 = vpop.f32.mrf.mxu2 }
 0xc7c   : > { %v1389_v31 = vand.u32 2147483647, %v3579_v27 }
 0xc7e   : > { %v1393_v17 = vsel %vm278_vm1, %v1389_v31, -inf }
 0xc83   : > { %v3581_v28 = vpop.f32.mrf.mxu2 }
 0xc84   : > { %v1390_v30 = vand.u32 2147483647, %v3581_v28 }
 0xc86   : > { %v1394_v19 = vsel %vm278_vm1, %v1390_v30, -inf }
 0xc87   : > { %v1397_v37 = vmax.f32 %v1393_v17, %v1394_v19 }
 0xc8b   : > { %v1383_v29 = vpop.f32.mrf.mxu2 }
 0xc8c   : > { %v1391_v32 = vand.u32 2147483647, %v1383_v29 }
 0xc8e   : > { %v1395_v35 = vsel %vm278_vm1, %v1391_v32, -inf }
 0xc93   : > { %v1386_v33 = vpop.f32.mrf.mxu2 }
 0xc94   : > { %v1392_v34 = vand.u32 2147483647, %v1386_v33 }
 0xc96   : > { %v1396_v36 = vsel %vm278_vm1, %v1392_v34, -inf }
 0xc97   : > { %v1398_v23 = vmax.f32 %v1395_v35, %v1396_v36 }
 0xc99   : > { %v1399_v38 = vmax.f32 %v1397_v37, %v1398_v23 }
 0xc9b   : > { %1400 = vmax.xlane.f32.xlu2 %v1399_v38 }
 0xca2   : > { %s2918_s3 = spop %2917 }
 0xca3   : > { %v1341_v18 = vstv %s2918_s3 }
 0xca4   : > { %v1342_v39 = vadd.f32 1e-37, %v1341_v18 }
 0xca6   : > { %3060 = vrcp.f32 %v1342_v39 }
 0xcac   : > { %v3061_v40 = vpop.eup %3060 }
 0xcad   : > { %v1347_v41 = vmul.f32 %v3061_v40, %v1318_v62  ;;  %v1346_v42 = vmul.f32 %v3061_v40, %v1315_v56  ;;  %v1345_v43 = vmul.f32 %v3061_v40, %v3565_v55  ;;  %v1344_v44 = vmul.f32 %v3061_v40, %v3563_v54 }
 0xcaf   : > { %1440 = vmatpush.msrb.mxu3 %v1347_v41 }
 0xcb1   : > { %1441 = vmatpush.msrb.mxu3 %v1346_v42 }
 0xcb3   : > { %1442 = vmatpush.msrb.mxu3 %v1345_v43 }
 0xcb5   : > { %1443 = vmatpush.msrb.mxu3 %v1344_v44 }
 0xcb6   : > { %2781 = vmatmul.msk.f32.vlgmr.msrb.gmra.mxu3 %vm278_vm1, %v1344_v44 }
 0xcbe   : > { %2782 = vmatmul.msk.f32.gmra.mxu3 %vm278_vm1, %v1345_v43 }
 0xcc6   : > { %2783 = vmatmul.msk.f32.gmra.mxu3 %vm278_vm1, %v1346_v42 }
 0xcce   : > { %2784 = vmatmul.msk.f32.gmra.mxu3 %vm278_vm1, %v1347_v41 }
 0xd0e   : > { %v1401_v45 = vpop.xlane.xlu2 %1400 }
 0xd0f   : > { %v1402_v46 = vrot.slane %v1401_v45, 4 }
 0xd11   : > { %v1403_v47 = vmax.f32 %v1401_v45, %v1402_v46 }
 0xd13   : > { %v1404_v48 = vrot.slane %v1403_v47, 2 }
 0xd15   : > { %v1405_v49 = vmax.f32 %v1403_v47, %v1404_v48 }
 0xd17   : > { %v1406_v50 = vrot.slane %v1405_v49, 1 }
 0xd19   : > { %v1407_v51 = vmax.f32 %v1405_v49, %v1406_v50 }
 0xd1b   : > { %2919 = vpush %v1407_v51 }
 0xd39   : > { %v3595_v52 = vpop.f32.mrf.mxu3 }
 0xd3a   : > { %v1457_v58 = vand.u32 2147483647, %v3595_v52 }
 0xd3c   : > { %v1461_v63 = vsel %vm278_vm1, %v1457_v58, -inf }
 0xd41   : > { %v3597_v53 = vpop.f32.mrf.mxu3 }
 0xd42   : > { %v1458_v56 = vand.u32 2147483647, %v3597_v53 }
 0xd44   : > { %v1462_v61 = vsel %vm278_vm1, %v1458_v56, -inf }
 0xd45   : > { %v1465_v2 = vmax.f32 %v1461_v63, %v1462_v61 }
 0xd49   : > { %v1451_v54 = vpop.f32.mrf.mxu3 }
 0xd4a   : > { %v1459_v59 = vand.u32 2147483647, %v1451_v54 }
 0xd4c   : > { %s2920_s4 = spop %2919  ;;  %v1463_v0 = vsel %vm278_vm1, %v1459_v59, -inf }
 0xd4d   : > { %v1409_v55 = vstv %s2920_s4 }
 0xd4e   : > { %v1410_v57 = vadd.f32 1e-37, %v1409_v55 }
 0xd50   : > { %3062 = vrcp.f32 %v1410_v57 }
 0xd51   : > { %v1454_v60 = vpop.f32.mrf.mxu3 }
 0xd52   : > { %v1460_v62 = vand.u32 2147483647, %v1454_v60 }
 0xd54   : > { %v1464_v1 = vsel %vm278_vm1, %v1460_v62, -inf }
 0xd55   : > { %v1466_v3 = vmax.f32 %v1463_v0, %v1464_v1 }
 0xd56   : > { %v3063_v4 = vpop.eup %3062 }
 0xd57   : > { %v1415_v5 = vmul.f32 %v3063_v4, %v1386_v33  ;;  %v1467_v6 = vmax.f32 %v1465_v2, %v1466_v3  ;;  %v1414_v7 = vmul.f32 %v3063_v4, %v1383_v29  ;;  %v1413_v8 = vmul.f32 %v3063_v4, %v3581_v28 }
 0xd58   : > { %v1412_v9 = vmul.f32 %v3063_v4, %v3579_v27 }
 0xd59   : > { %1508 = vmatpush.msra.mxu0 %v1415_v5  ;;  %1468 = vmax.xlane.f32.xlu0 %v1467_v6 }
 0xd5b   : > { %1509 = vmatpush.msra.mxu0 %v1414_v7 }
 0xd5d   : > { %1510 = vmatpush.msra.mxu0 %v1413_v8 }
 0xd5f   : > { %1511 = vmatpush.msra.mxu0 %v1412_v9 }
 0xd60   : > { %2785 = vmatmul.msk.f32.vlgmr.msra.gmra.mxu0 %vm278_vm1, %v1412_v9 }
 0xd68   : > { %2786 = vmatmul.msk.f32.gmra.mxu0 %vm278_vm1, %v1413_v8 }
 0xd70   : > { %2787 = vmatmul.msk.f32.gmra.mxu0 %vm278_vm1, %v1414_v7 }
 0xd78   : > { %2788 = vmatmul.msk.f32.gmra.mxu0 %vm278_vm1, %v1415_v5 }
 0xdcc   : > { %v1469_v14 = vpop.xlane.xlu0 %1468 }
 0xdcd   : > { %v1470_v15 = vrot.slane %v1469_v14, 4 }
 0xdcf   : > { %v1471_v16 = vmax.f32 %v1469_v14, %v1470_v15 }
 0xdd1   : > { %v1472_v20 = vrot.slane %v1471_v16, 2 }
 0xdd3   : > { %v1473_v21 = vmax.f32 %v1471_v16, %v1472_v20 }
 0xdd5   : > { %v1474_v22 = vrot.slane %v1473_v21, 1 }
 0xdd7   : > { %v1475_v24 = vmax.f32 %v1473_v21, %v1474_v22 }
 0xdd9   : > { %2921 = vpush %v1475_v24 }
 0xddd   : > { %v3611_v25 = vpop.f32.mrf.mxu0 }
 0xdde   : > { %v1525_v29 = vand.u32 2147483647, %v3611_v25 }
 0xde0   : > { %v1529_v19 = vsel %vm278_vm1, %v1525_v29, -inf }
 0xde5   : > { %v3613_v26 = vpop.f32.mrf.mxu0 }
 0xde6   : > { %v1526_v28 = vand.u32 2147483647, %v3613_v26 }
 0xde8   : > { %v1530_v32 = vsel %vm278_vm1, %v1526_v28, -inf }
 0xde9   : > { %v1533_v35 = vmax.f32 %v1529_v19, %v1530_v32 }
 0xded   : > { %v1519_v27 = vpop.f32.mrf.mxu0 }
 0xdee   : > { %v1527_v30 = vand.u32 2147483647, %v1519_v27 }
 0xdf0   : > { %v1531_v34 = vsel %vm278_vm1, %v1527_v30, -inf }
 0xdf5   : > { %v1522_v31 = vpop.f32.mrf.mxu0 }
 0xdf6   : > { %v1528_v33 = vand.u32 2147483647, %v1522_v31 }
 0xdf8   : > { %v1532_v17 = vsel %vm278_vm1, %v1528_v33, -inf }
 0xdf9   : > { %v1534_v36 = vmax.f32 %v1531_v34, %v1532_v17 }
 0xdfb   : > { %v1535_v37 = vmax.f32 %v1533_v35, %v1534_v36 }
 0xdfd   : > { %1536 = vmax.xlane.f32.xlu1 %v1535_v37 }
 0xe0a   : > { %s2922_s5 = spop %2921 }
 0xe0b   : > { %v1477_v23 = vstv %s2922_s5 }
 0xe0c   : > { %v1478_v38 = vadd.f32 1e-37, %v1477_v23 }
 0xe0e   : > { %3064 = vrcp.f32 %v1478_v38 }
 0xe14   : > { %v3065_v18 = vpop.eup %3064 }
 0xe15   : > { %v1483_v39 = vmul.f32 %v3065_v18, %v1454_v60  ;;  %v1482_v40 = vmul.f32 %v3065_v18, %v1451_v54  ;;  %v1481_v41 = vmul.f32 %v3065_v18, %v3597_v53  ;;  %v1480_v42 = vmul.f32 %v3065_v18, %v3595_v52 }
 0xe17   : > { %1576 = vmatpush.msra.mxu1 %v1483_v39 }
 0xe19   : > { %1577 = vmatpush.msra.mxu1 %v1482_v40 }
 0xe1b   : > { %1578 = vmatpush.msra.mxu1 %v1481_v41 }
 0xe1d   : > { %1579 = vmatpush.msra.mxu1 %v1480_v42 }
 0xe1e   : > { %2789 = vmatmul.msk.f32.vlgmr.msra.gmra.mxu1 %vm278_vm1, %v1480_v42 }
 0xe26   : > { %2790 = vmatmul.msk.f32.gmra.mxu1 %vm278_vm1, %v1481_v41 }
 0xe2e   : > { %2791 = vmatmul.msk.f32.gmra.mxu1 %vm278_vm1, %v1482_v40 }
 0xe36   : > { %2792 = vmatmul.msk.f32.gmra.mxu1 %vm278_vm1, %v1483_v39 }
 0xe70   : > { %v1537_v43 = vpop.xlane.xlu1 %1536 }
 0xe71   : > { %v1538_v44 = vrot.slane %v1537_v43, 4 }
 0xe73   : > { %v1539_v45 = vmax.f32 %v1537_v43, %v1538_v44 }
 0xe75   : > { %v1540_v46 = vrot.slane %v1539_v45, 2 }
 0xe77   : > { %v1541_v47 = vmax.f32 %v1539_v45, %v1540_v46 }
 0xe79   : > { %v1542_v48 = vrot.slane %v1541_v47, 1 }
 0xe7b   : > { %v1543_v49 = vmax.f32 %v1541_v47, %v1542_v48 }
 0xe7d   : > { %2923 = vpush %v1543_v49 }
 0xe9b   : > { %v3627_v50 = vpop.f32.mrf.mxu1 }
 0xe9c   : > { %v1593_v56 = vand.u32 2147483647, %v3627_v50 }
 0xe9e   : > { %v1597_v61 = vsel %vm278_vm1, %v1593_v56, -inf }
 0xea3   : > { %v3629_v51 = vpop.f32.mrf.mxu1 }
 0xea4   : > { %v1594_v54 = vand.u32 2147483647, %v3629_v51 }
 0xea6   : > { %v1598_v59 = vsel %vm278_vm1, %v1594_v54, -inf }
 0xea7   : > { %v1601_v0 = vmax.f32 %v1597_v61, %v1598_v59 }
 0xeab   : > { %v1587_v52 = vpop.f32.mrf.mxu1 }
 0xeac   : > { %v1595_v57 = vand.u32 2147483647, %v1587_v52 }
 0xeae   : > { %s2924_s8 = spop %2923  ;;  %v1599_v62 = vsel %vm278_vm1, %v1595_v57, -inf }
 0xeaf   : > { %v1545_v53 = vstv %s2924_s8 }
 0xeb0   : > { %v1546_v55 = vadd.f32 1e-37, %v1545_v53 }
 0xeb2   : > { %3066 = vrcp.f32 %v1546_v55 }
 0xeb3   : > { %v1590_v58 = vpop.f32.mrf.mxu1 }
 0xeb4   : > { %v1596_v60 = vand.u32 2147483647, %v1590_v58 }
 0xeb6   : > { %v1600_v63 = vsel %vm278_vm1, %v1596_v60, -inf }
 0xeb7   : > { %v1602_v1 = vmax.f32 %v1599_v62, %v1600_v63 }
 0xeb8   : > { %v3067_v2 = vpop.eup %3066 }
 0xeb9   : > { %v1551_v3 = vmul.f32 %v3067_v2, %v1522_v31  ;;  %v1603_v4 = vmax.f32 %v1601_v0, %v1602_v1  ;;  %v1550_v5 = vmul.f32 %v3067_v2, %v1519_v27  ;;  %v1549_v6 = vmul.f32 %v3067_v2, %v3613_v26 }
 0xeba   : > { %v1548_v7 = vmul.f32 %v3067_v2, %v3611_v25 }
 0xebb   : > { %1644 = vmatpush.msra.mxu2 %v1551_v3  ;;  %1604 = vmax.xlane.f32.xlu2 %v1603_v4 }
 0xebd   : > { %1645 = vmatpush.msra.mxu2 %v1550_v5 }
 0xebf   : > { %1646 = vmatpush.msra.mxu2 %v1549_v6 }
 0xec1   : > { %1647 = vmatpush.msra.mxu2 %v1548_v7 }
 0xec2   : > { %2793 = vmatmul.msk.f32.vlgmr.msra.gmra.mxu2 %vm278_vm1, %v1548_v7 }
 0xeca   : > { %2794 = vmatmul.msk.f32.gmra.mxu2 %vm278_vm1, %v1549_v6 }
 0xed2   : > { %2795 = vmatmul.msk.f32.gmra.mxu2 %vm278_vm1, %v1550_v5 }
 0xeda   : > { %2796 = vmatmul.msk.f32.gmra.mxu2 %vm278_vm1, %v1551_v3 }
 0xf2e   : > { %v1605_v8 = vpop.xlane.xlu2 %1604 }
 0xf2f   : > { %v1606_v9 = vrot.slane %v1605_v8, 4 }
 0xf31   : > { %v1607_v14 = vmax.f32 %v1605_v8, %v1606_v9 }
 0xf33   : > { %v1608_v15 = vrot.slane %v1607_v14, 2 }
 0xf35   : > { %v1609_v16 = vmax.f32 %v1607_v14, %v1608_v15 }
 0xf37   : > { %v1610_v20 = vrot.slane %v1609_v16, 1 }
 0xf39   : > { %v1611_v21 = vmax.f32 %v1609_v16, %v1610_v20 }
 0xf3b   : > { %2925 = vpush %v1611_v21 }
 0xf45   : > { %v3643_v22 = vpop.f32.mrf.mxu2 }
 0xf46   : > { %v1661_v27 = vand.u32 2147483647, %v3643_v22 }
 0xf48   : > { %v1665_v32 = vsel %vm278_vm1, %v1661_v27, -inf }
 0xf4d   : > { %v3645_v24 = vpop.f32.mrf.mxu2 }
 0xf4e   : > { %v1662_v26 = vand.u32 2147483647, %v3645_v24 }
 0xf50   : > { %v1666_v30 = vsel %vm278_vm1, %v1662_v26, -inf }
 0xf51   : > { %v1669_v34 = vmax.f32 %v1665_v32, %v1666_v30 }
 0xf55   : > { %v1655_v25 = vpop.f32.mrf.mxu2 }
 0xf56   : > { %v1663_v28 = vand.u32 2147483647, %v1655_v25 }
 0xf58   : > { %v1667_v33 = vsel %vm278_vm1, %v1663_v28, -inf }
 0xf5d   : > { %v1658_v29 = vpop.f32.mrf.mxu2 }
 0xf5e   : > { %v1664_v31 = vand.u32 2147483647, %v1658_v29 }
 0xf60   : > { %v1668_v19 = vsel %vm278_vm1, %v1664_v31, -inf }
 0xf61   : > { %v1670_v17 = vmax.f32 %v1667_v33, %v1668_v19 }
 0xf63   : > { %v1671_v35 = vmax.f32 %v1669_v34, %v1670_v17 }
 0xf65   : > { %1672 = vmax.xlane.f32.xlu0 %v1671_v35 }
 0xf6c   : > { %s2926_s9 = spop %2925 }
 0xf6d   : > { %v1613_v36 = vstv %s2926_s9 }
 0xf6e   : > { %v1614_v37 = vadd.f32 1e-37, %v1613_v36 }
 0xf70   : > { %3068 = vrcp.f32 %v1614_v37 }
 0xf76   : > { %v3069_v23 = vpop.eup %3068 }
 0xf77   : > { %v1619_v38 = vmul.f32 %v3069_v23, %v1590_v58  ;;  %v1618_v18 = vmul.f32 %v3069_v23, %v1587_v52  ;;  %v1617_v39 = vmul.f32 %v3069_v23, %v3629_v51  ;;  %v1616_v40 = vmul.f32 %v3069_v23, %v3627_v50 }
 0xf79   : > { %1712 = vmatpush.msra.mxu3 %v1619_v38 }
 0xf7b   : > { %1713 = vmatpush.msra.mxu3 %v1618_v18 }
 0xf7d   : > { %1714 = vmatpush.msra.mxu3 %v1617_v39 }
 0xf7f   : > { %1715 = vmatpush.msra.mxu3 %v1616_v40 }
 0xf80   : > { %2797 = vmatmul.msk.f32.vlgmr.msra.gmra.mxu3 %vm278_vm1, %v1616_v40 }
 0xf88   : > { %2798 = vmatmul.msk.f32.gmra.mxu3 %vm278_vm1, %v1617_v39 }
 0xf90   : > { %2799 = vmatmul.msk.f32.gmra.mxu3 %vm278_vm1, %v1618_v18 }
 0xf98   : > { %2800 = vmatmul.msk.f32.gmra.mxu3 %vm278_vm1, %v1619_v38 }
 0xfd8   : > { %v1673_v41 = vpop.xlane.xlu0 %1672 }
 0xfd9   : > { %v1674_v42 = vrot.slane %v1673_v41, 4 }
 0xfdb   : > { %v1675_v43 = vmax.f32 %v1673_v41, %v1674_v42 }
 0xfdd   : > { %v1676_v44 = vrot.slane %v1675_v43, 2 }
 0xfdf   : > { %v1677_v45 = vmax.f32 %v1675_v43, %v1676_v44 }
 0xfe1   : > { %v1678_v46 = vrot.slane %v1677_v45, 1 }
 0xfe3   : > { %v1679_v47 = vmax.f32 %v1677_v45, %v1678_v46 }
 0xfe5   : > { %2927 = vpush %v1679_v47 }
0x1003   : > { %v3659_v48 = vpop.f32.mrf.mxu3 }
0x1004   : > { %v1729_v54 = vand.u32 2147483647, %v3659_v48 }
0x1006   : > { %v1733_v59 = vsel %vm278_vm1, %v1729_v54, -inf }
0x100b   : > { %v3661_v49 = vpop.f32.mrf.mxu3 }
0x100c   : > { %v1730_v52 = vand.u32 2147483647, %v3661_v49 }
0x100e   : > { %v1734_v57 = vsel %vm278_vm1, %v1730_v52, -inf }
0x100f   : > { %v1737_v62 = vmax.f32 %v1733_v59, %v1734_v57 }
0x1013   : > { %v1723_v50 = vpop.f32.mrf.mxu3 }
0x1014   : > { %v1731_v55 = vand.u32 2147483647, %v1723_v50 }
0x1016   : > { %s2928_s10 = spop %2927  ;;  %v1735_v60 = vsel %vm278_vm1, %v1731_v55, -inf }
0x1017   : > { %v1681_v51 = vstv %s2928_s10 }
0x1018   : > { %v1682_v53 = vadd.f32 1e-37, %v1681_v51 }
0x101a   : > { %3070 = vrcp.f32 %v1682_v53 }
0x101b   : > { %v1726_v56 = vpop.f32.mrf.mxu3 }
0x101c   : > { %v1732_v58 = vand.u32 2147483647, %v1726_v56 }
0x101e   : > { %v1736_v61 = vsel %vm278_vm1, %v1732_v58, -inf }
0x101f   : > { %v1738_v63 = vmax.f32 %v1735_v60, %v1736_v61 }
0x1020   : > { %v3071_v0 = vpop.eup %3070 }
0x1021   : > { %v1687_v1 = vmul.f32 %v3071_v0, %v1658_v29  ;;  %v1739_v2 = vmax.f32 %v1737_v62, %v1738_v63  ;;  %v1686_v3 = vmul.f32 %v3071_v0, %v1655_v25  ;;  %v1685_v4 = vmul.f32 %v3071_v0, %v3645_v24 }
0x1022   : > { %v1684_v5 = vmul.f32 %v3071_v0, %v3643_v22 }
0x1023   : > { %1780 = vmatpush.msrb.mxu0 %v1687_v1  ;;  %1740 = vmax.xlane.f32.xlu1 %v1739_v2 }
0x1025   : > { %1781 = vmatpush.msrb.mxu0 %v1686_v3 }
0x1027   : > { %1782 = vmatpush.msrb.mxu0 %v1685_v4 }
0x1029   : > { %1783 = vmatpush.msrb.mxu0 %v1684_v5 }
0x102a   : > { %2801 = vmatmul.msk.f32.vlgmr.msrb.gmra.mxu0 %vm278_vm1, %v1684_v5 }
0x1032   : > { %2802 = vmatmul.msk.f32.gmra.mxu0 %vm278_vm1, %v1685_v4 }
0x103a   : > { %2803 = vmatmul.msk.f32.gmra.mxu0 %vm278_vm1, %v1686_v3 }
0x1042   : > { %2804 = vmatmul.msk.f32.gmra.mxu0 %vm278_vm1, %v1687_v1 }
0x1096   : > { %v1741_v6 = vpop.xlane.xlu1 %1740 }
0x1097   : > { %v1742_v7 = vrot.slane %v1741_v6, 4 }
0x1099   : > { %v1743_v8 = vmax.f32 %v1741_v6, %v1742_v7 }
0x109b   : > { %v1744_v9 = vrot.slane %v1743_v8, 2 }
0x109d   : > { %v1745_v14 = vmax.f32 %v1743_v8, %v1744_v9 }
0x109f   : > { %v1746_v15 = vrot.slane %v1745_v14, 1 }
0x10a1   : > { %v1747_v16 = vmax.f32 %v1745_v14, %v1746_v15 }
0x10a3   : > { %2929 = vpush %v1747_v16 }
0x10a7   : > { %v3675_v20 = vpop.f32.mrf.mxu0 }
0x10a8   : > { %v1797_v25 = vand.u32 2147483647, %v3675_v20 }
0x10aa   : > { %v1801_v30 = vsel %vm278_vm1, %v1797_v25, -inf }
0x10af   : > { %v3677_v21 = vpop.f32.mrf.mxu0 }
0x10b0   : > { %v1798_v24 = vand.u32 2147483647, %v3677_v21 }
0x10b2   : > { %v1802_v28 = vsel %vm278_vm1, %v1798_v24, -inf }
0x10b3   : > { %v1805_v33 = vmax.f32 %v1801_v30, %v1802_v28 }
0x10b7   : > { %v1791_v22 = vpop.f32.mrf.mxu0 }
0x10b8   : > { %v1799_v26 = vand.u32 2147483647, %v1791_v22 }
0x10ba   : > { %v1803_v31 = vsel %vm278_vm1, %v1799_v26, -inf }
0x10bf   : > { %v1794_v27 = vpop.f32.mrf.mxu0 }
0x10c0   : > { %v1800_v29 = vand.u32 2147483647, %v1794_v27 }
0x10c2   : > { %v1804_v32 = vsel %vm278_vm1, %v1800_v29, -inf }
0x10c3   : > { %v1806_v19 = vmax.f32 %v1803_v31, %v1804_v32 }
0x10c5   : > { %v1807_v34 = vmax.f32 %v1805_v33, %v1806_v19 }
0x10c7   : > { %1808 = vmax.xlane.f32.xlu2 %v1807_v34 }
0x10d4   : > { %s2930_s11 = spop %2929 }
0x10d5   : > { %v1749_v17 = vstv %s2930_s11 }
0x10d6   : > { %v1750_v35 = vadd.f32 1e-37, %v1749_v17 }
0x10d8   : > { %3072 = vrcp.f32 %v1750_v35 }
0x10de   : > { %v3073_v36 = vpop.eup %3072 }
0x10df   : > { %v1755_v37 = vmul.f32 %v3073_v36, %v1726_v56  ;;  %v1754_v23 = vmul.f32 %v3073_v36, %v1723_v50  ;;  %v1753_v38 = vmul.f32 %v3073_v36, %v3661_v49  ;;  %v1752_v18 = vmul.f32 %v3073_v36, %v3659_v48 }
0x10e1   : > { %1848 = vmatpush.msrb.mxu1 %v1755_v37 }
0x10e3   : > { %1849 = vmatpush.msrb.mxu1 %v1754_v23 }
0x10e5   : > { %1850 = vmatpush.msrb.mxu1 %v1753_v38 }
0x10e7   : > { %1851 = vmatpush.msrb.mxu1 %v1752_v18 }
0x10e8   : > { %2805 = vmatmul.msk.f32.vlgmr.msrb.gmra.mxu1 %vm278_vm1, %v1752_v18 }
0x10f0   : > { %2806 = vmatmul.msk.f32.gmra.mxu1 %vm278_vm1, %v1753_v38 }
0x10f8   : > { %2807 = vmatmul.msk.f32.gmra.mxu1 %vm278_vm1, %v1754_v23 }
0x1100   : > { %2808 = vmatmul.msk.f32.gmra.mxu1 %vm278_vm1, %v1755_v37 }
0x113a   : > { %v1809_v39 = vpop.xlane.xlu2 %1808 }
0x113b   : > { %v1810_v40 = vrot.slane %v1809_v39, 4 }
0x113d   : > { %v1811_v41 = vmax.f32 %v1809_v39, %v1810_v40 }
0x113f   : > { %v1812_v42 = vrot.slane %v1811_v41, 2 }
0x1141   : > { %v1813_v43 = vmax.f32 %v1811_v41, %v1812_v42 }
0x1143   : > { %v1814_v44 = vrot.slane %v1813_v43, 1 }
0x1145   : > { %v1815_v45 = vmax.f32 %v1813_v43, %v1814_v44 }
0x1147   : > { %2931 = vpush %v1815_v45 }
0x1165   : > { %v3691_v46 = vpop.f32.mrf.mxu1 }
0x1166   : > { %v1865_v52 = vand.u32 2147483647, %v3691_v46 }
0x1168   : > { %v1869_v57 = vsel %vm278_vm1, %v1865_v52, -inf }
0x116d   : > { %v3693_v47 = vpop.f32.mrf.mxu1 }
0x116e   : > { %v1866_v50 = vand.u32 2147483647, %v3693_v47 }
0x1170   : > { %v1870_v55 = vsel %vm278_vm1, %v1866_v50, -inf }
0x1171   : > { %v1873_v60 = vmax.f32 %v1869_v57, %v1870_v55 }
0x1175   : > { %v1859_v48 = vpop.f32.mrf.mxu1 }
0x1176   : > { %v1867_v53 = vand.u32 2147483647, %v1859_v48 }
0x1178   : > { %s2932_s12 = spop %2931  ;;  %v1871_v58 = vsel %vm278_vm1, %v1867_v53, -inf }
0x1179   : > { %v1817_v49 = vstv %s2932_s12 }
0x117a   : > { %v1818_v51 = vadd.f32 1e-37, %v1817_v49 }
0x117c   : > { %3074 = vrcp.f32 %v1818_v51 }
0x117d   : > { %v1862_v54 = vpop.f32.mrf.mxu1 }
0x117e   : > { %v1868_v56 = vand.u32 2147483647, %v1862_v54 }
0x1180   : > { %v1872_v59 = vsel %vm278_vm1, %v1868_v56, -inf }
0x1181   : > { %v1874_v61 = vmax.f32 %v1871_v58, %v1872_v59 }
0x1182   : > { %v3075_v62 = vpop.eup %3074 }
0x1183   : > { %v1823_v63 = vmul.f32 %v3075_v62, %v1794_v27  ;;  %v1875_v0 = vmax.f32 %v1873_v60, %v1874_v61  ;;  %v1822_v1 = vmul.f32 %v3075_v62, %v1791_v22  ;;  %v1821_v2 = vmul.f32 %v3075_v62, %v3677_v21 }
0x1184   : > { %v1820_v3 = vmul.f32 %v3075_v62, %v3675_v20 }
0x1185   : > { %1916 = vmatpush.msrb.mxu2 %v1823_v63  ;;  %1876 = vmax.xlane.f32.xlu0 %v1875_v0 }
0x1187   : > { %1917 = vmatpush.msrb.mxu2 %v1822_v1 }
0x1189   : > { %1918 = vmatpush.msrb.mxu2 %v1821_v2 }
0x118b   : > { %1919 = vmatpush.msrb.mxu2 %v1820_v3 }
0x118c   : > { %2809 = vmatmul.msk.f32.vlgmr.msrb.gmra.mxu2 %vm278_vm1, %v1820_v3 }
0x1194   : > { %2810 = vmatmul.msk.f32.gmra.mxu2 %vm278_vm1, %v1821_v2 }
0x119c   : > { %2811 = vmatmul.msk.f32.gmra.mxu2 %vm278_vm1, %v1822_v1 }
0x11a4   : > { %2812 = vmatmul.msk.f32.gmra.mxu2 %vm278_vm1, %v1823_v63 }
0x11f8   : > { %v1877_v4 = vpop.xlane.xlu0 %1876 }
0x11f9   : > { %v1878_v5 = vrot.slane %v1877_v4, 4 }
0x11fb   : > { %v1879_v6 = vmax.f32 %v1877_v4, %v1878_v5 }
0x11fd   : > { %v1880_v7 = vrot.slane %v1879_v6, 2 }
0x11ff   : > { %v1881_v8 = vmax.f32 %v1879_v6, %v1880_v7 }
0x1201   : > { %v1882_v9 = vrot.slane %v1881_v8, 1 }
0x1203   : > { %v1883_v14 = vmax.f32 %v1881_v8, %v1882_v9 }
0x1205   : > { %2933 = vpush %v1883_v14 }
0x120f   : > { %v3707_v15 = vpop.f32.mrf.mxu2 }
0x1210   : > { %v1933_v22 = vand.u32 2147483647, %v3707_v15 }
0x1212   : > { %v1937_v28 = vsel %vm278_vm1, %v1933_v22, -inf }
0x1217   : > { %v3709_v16 = vpop.f32.mrf.mxu2 }
0x1218   : > { %v1934_v21 = vand.u32 2147483647, %v3709_v16 }
0x121a   : > { %v1938_v26 = vsel %vm278_vm1, %v1934_v21, -inf }
0x121b   : > { %v1941_v31 = vmax.f32 %v1937_v28, %v1938_v26 }
0x121f   : > { %v1927_v20 = vpop.f32.mrf.mxu2 }
0x1220   : > { %v1935_v24 = vand.u32 2147483647, %v1927_v20 }
0x1222   : > { %v1939_v29 = vsel %vm278_vm1, %v1935_v24, -inf }
0x1227   : > { %v1930_v25 = vpop.f32.mrf.mxu2 }
0x1228   : > { %v1936_v27 = vand.u32 2147483647, %v1930_v25 }
0x122a   : > { %v1940_v30 = vsel %vm278_vm1, %v1936_v27, -inf }
0x122b   : > { %v1942_v32 = vmax.f32 %v1939_v29, %v1940_v30 }
0x122d   : > { %v1943_v33 = vmax.f32 %v1941_v31, %v1942_v32 }
0x122f   : > { %1944 = vmax.xlane.f32.xlu1 %v1943_v33 }
0x1236   : > { %s2934_s13 = spop %2933 }
0x1237   : > { %v1885_v19 = vstv %s2934_s13 }
0x1238   : > { %v1886_v34 = vadd.f32 1e-37, %v1885_v19 }
0x123a   : > { %3076 = vrcp.f32 %v1886_v34 }
0x1240   : > { %v3077_v17 = vpop.eup %3076 }
0x1241   : > { %v1891_v35 = vmul.f32 %v3077_v17, %v1862_v54  ;;  %v1890_v36 = vmul.f32 %v3077_v17, %v1859_v48  ;;  %v1889_v37 = vmul.f32 %v3077_v17, %v3693_v47  ;;  %v1888_v23 = vmul.f32 %v3077_v17, %v3691_v46 }
0x1243   : > { %1984 = vmatpush.msrb.mxu3 %v1891_v35 }
0x1245   : > { %1985 = vmatpush.msrb.mxu3 %v1890_v36 }
0x1247   : > { %1986 = vmatpush.msrb.mxu3 %v1889_v37 }
0x1249   : > { %1987 = vmatpush.msrb.mxu3 %v1888_v23 }
0x124a   : > { %2813 = vmatmul.msk.f32.vlgmr.msrb.gmra.mxu3 %vm278_vm1, %v1888_v23 }
0x1252   : > { %2814 = vmatmul.msk.f32.gmra.mxu3 %vm278_vm1, %v1889_v37 }
0x125a   : > { %2815 = vmatmul.msk.f32.gmra.mxu3 %vm278_vm1, %v1890_v36 }
0x1262   : > { %2816 = vmatmul.msk.f32.gmra.mxu3 %vm278_vm1, %v1891_v35 }
0x12a2   : > { %v1945_v38 = vpop.xlane.xlu1 %1944 }
0x12a3   : > { %v1946_v18 = vrot.slane %v1945_v38, 4 }
0x12a5   : > { %v1947_v39 = vmax.f32 %v1945_v38, %v1946_v18 }
0x12a7   : > { %v1948_v40 = vrot.slane %v1947_v39, 2 }
0x12a9   : > { %v1949_v41 = vmax.f32 %v1947_v39, %v1948_v40 }
0x12ab   : > { %v1950_v42 = vrot.slane %v1949_v41, 1 }
0x12ad   : > { %v1951_v43 = vmax.f32 %v1949_v41, %v1950_v42 }
0x12af   : > { %2935 = vpush %v1951_v43 }
0x12cd   : > { %v3723_v44 = vpop.f32.mrf.mxu3 }
0x12ce   : > { %v2001_v50 = vand.u32 2147483647, %v3723_v44 }
0x12d0   : > { %v2005_v55 = vsel %vm278_vm1, %v2001_v50, -inf }
0x12d5   : > { %v3725_v45 = vpop.f32.mrf.mxu3 }
0x12d6   : > { %v2002_v48 = vand.u32 2147483647, %v3725_v45 }
0x12d8   : > { %v2006_v53 = vsel %vm278_vm1, %v2002_v48, -inf }
0x12d9   : > { %v2009_v58 = vmax.f32 %v2005_v55, %v2006_v53 }
0x12dd   : > { %v1995_v46 = vpop.f32.mrf.mxu3 }
0x12de   : > { %v2003_v51 = vand.u32 2147483647, %v1995_v46 }
0x12e0   : > { %s2936_s14 = spop %2935  ;;  %v2007_v56 = vsel %vm278_vm1, %v2003_v51, -inf }
0x12e1   : > { %v1953_v47 = vstv %s2936_s14 }
0x12e2   : > { %v1954_v49 = vadd.f32 1e-37, %v1953_v47 }
0x12e4   : > { %3078 = vrcp.f32 %v1954_v49 }
0x12e5   : > { %v1998_v52 = vpop.f32.mrf.mxu3 }
0x12e6   : > { %v2004_v54 = vand.u32 2147483647, %v1998_v52 }
0x12e8   : > { %v2008_v57 = vsel %vm278_vm1, %v2004_v54, -inf }
0x12e9   : > { %v2010_v59 = vmax.f32 %v2007_v56, %v2008_v57 }
0x12ea   : > { %v3079_v60 = vpop.eup %3078 }
0x12eb   : > { %v1959_v61 = vmul.f32 %v3079_v60, %v1930_v25  ;;  %v2011_v62 = vmax.f32 %v2009_v58, %v2010_v59  ;;  %v1958_v63 = vmul.f32 %v3079_v60, %v1927_v20  ;;  %v1957_v0 = vmul.f32 %v3079_v60, %v3709_v16 }
0x12ec   : > { %v1956_v1 = vmul.f32 %v3079_v60, %v3707_v15 }
0x12ed   : > { %2052 = vmatpush.msra.mxu0 %v1959_v61  ;;  %2012 = vmax.xlane.f32.xlu2 %v2011_v62 }
0x12ef   : > { %2053 = vmatpush.msra.mxu0 %v1958_v63 }
0x12f1   : > { %2054 = vmatpush.msra.mxu0 %v1957_v0 }
0x12f3   : > { %2055 = vmatpush.msra.mxu0 %v1956_v1 }
0x12f4   : > { %2817 = vmatmul.msk.f32.vlgmr.msra.gmra.mxu0 %vm278_vm1, %v1956_v1 }
0x12fc   : > { %2818 = vmatmul.msk.f32.gmra.mxu0 %vm278_vm1, %v1957_v0 }
0x1304   : > { %2819 = vmatmul.msk.f32.gmra.mxu0 %vm278_vm1, %v1958_v63 }
0x130c   : > { %2820 = vmatmul.msk.f32.gmra.mxu0 %vm278_vm1, %v1959_v61 }
0x1360   : > { %v2013_v2 = vpop.xlane.xlu2 %2012 }
0x1361   : > { %v2014_v3 = vrot.slane %v2013_v2, 4 }
0x1363   : > { %v2015_v4 = vmax.f32 %v2013_v2, %v2014_v3 }
0x1365   : > { %v2016_v5 = vrot.slane %v2015_v4, 2 }
0x1367   : > { %v2017_v6 = vmax.f32 %v2015_v4, %v2016_v5 }
0x1369   : > { %v2018_v7 = vrot.slane %v2017_v6, 1 }
0x136b   : > { %v2019_v8 = vmax.f32 %v2017_v6, %v2018_v7 }
0x136d   : > { %2937 = vpush %v2019_v8 }
0x1371   : > { %v3739_v9 = vpop.f32.mrf.mxu0 }
0x1372   : > { %v2069_v20 = vand.u32 2147483647, %v3739_v9 }
0x1374   : > { %v2073_v26 = vsel %vm278_vm1, %v2069_v20, -inf }
0x1379   : > { %v3741_v14 = vpop.f32.mrf.mxu0 }
0x137a   : > { %v2070_v16 = vand.u32 2147483647, %v3741_v14 }
0x137c   : > { %v2074_v24 = vsel %vm278_vm1, %v2070_v16, -inf }
0x137d   : > { %v2077_v29 = vmax.f32 %v2073_v26, %v2074_v24 }
0x1381   : > { %v2063_v15 = vpop.f32.mrf.mxu0 }
0x1382   : > { %v2071_v21 = vand.u32 2147483647, %v2063_v15 }
0x1384   : > { %v2075_v27 = vsel %vm278_vm1, %v2071_v21, -inf }
0x1389   : > { %v2066_v22 = vpop.f32.mrf.mxu0 }
0x138a   : > { %v2072_v25 = vand.u32 2147483647, %v2066_v22 }
0x138c   : > { %v2076_v28 = vsel %vm278_vm1, %v2072_v25, -inf }
0x138d   : > { %v2078_v30 = vmax.f32 %v2075_v27, %v2076_v28 }
0x138f   : > { %v2079_v31 = vmax.f32 %v2077_v29, %v2078_v30 }
0x1391   : > { %2080 = vmax.xlane.f32.xlu0 %v2079_v31 }
0x139e   : > { %s2938_s17 = spop %2937 }
0x139f   : > { %v2021_v32 = vstv %s2938_s17 }
0x13a0   : > { %v2022_v33 = vadd.f32 1e-37, %v2021_v32 }
0x13a2   : > { %3080 = vrcp.f32 %v2022_v33 }
0x13a8   : > { %v3081_v19 = vpop.eup %3080 }
0x13a9   : > { %v2027_v34 = vmul.f32 %v3081_v19, %v1998_v52  ;;  %v2026_v17 = vmul.f32 %v3081_v19, %v1995_v46  ;;  %v2025_v35 = vmul.f32 %v3081_v19, %v3725_v45  ;;  %v2024_v36 = vmul.f32 %v3081_v19, %v3723_v44 }
0x13ab   : > { %2120 = vmatpush.msra.mxu1 %v2027_v34 }
0x13ad   : > { %2121 = vmatpush.msra.mxu1 %v2026_v17 }
0x13af   : > { %2122 = vmatpush.msra.mxu1 %v2025_v35 }
0x13b1   : > { %2123 = vmatpush.msra.mxu1 %v2024_v36 }
0x13b2   : > { %2821 = vmatmul.msk.f32.vlgmr.msra.gmra.mxu1 %vm278_vm1, %v2024_v36 }
0x13ba   : > { %2822 = vmatmul.msk.f32.gmra.mxu1 %vm278_vm1, %v2025_v35 }
0x13c2   : > { %2823 = vmatmul.msk.f32.gmra.mxu1 %vm278_vm1, %v2026_v17 }
0x13ca   : > { %2824 = vmatmul.msk.f32.gmra.mxu1 %vm278_vm1, %v2027_v34 }
0x1404   : > { %v2081_v37 = vpop.xlane.xlu0 %2080 }
0x1405   : > { %v2082_v23 = vrot.slane %v2081_v37, 4 }
0x1407   : > { %v2083_v38 = vmax.f32 %v2081_v37, %v2082_v23 }
0x1409   : > { %v2084_v18 = vrot.slane %v2083_v38, 2 }
0x140b   : > { %v2085_v39 = vmax.f32 %v2083_v38, %v2084_v18 }
0x140d   : > { %v2086_v40 = vrot.slane %v2085_v39, 1 }
0x140f   : > { %v2087_v41 = vmax.f32 %v2085_v39, %v2086_v40 }
0x1411   : > { %2939 = vpush %v2087_v41 }
0x142f   : > { %v3755_v42 = vpop.f32.mrf.mxu1 }
0x1430   : > { %v2137_v48 = vand.u32 2147483647, %v3755_v42 }
0x1432   : > { %v2141_v53 = vsel %vm278_vm1, %v2137_v48, -inf }
0x1437   : > { %v3757_v43 = vpop.f32.mrf.mxu1 }
0x1438   : > { %v2138_v46 = vand.u32 2147483647, %v3757_v43 }
0x143a   : > { %v2142_v51 = vsel %vm278_vm1, %v2138_v46, -inf }
0x143b   : > { %v2145_v56 = vmax.f32 %v2141_v53, %v2142_v51 }
0x143f   : > { %v2131_v44 = vpop.f32.mrf.mxu1 }
0x1440   : > { %v2139_v49 = vand.u32 2147483647, %v2131_v44 }
0x1442   : > { %s2940_s18 = spop %2939  ;;  %v2143_v54 = vsel %vm278_vm1, %v2139_v49, -inf }
0x1443   : > { %v2089_v45 = vstv %s2940_s18 }
0x1444   : > { %v2090_v47 = vadd.f32 1e-37, %v2089_v45 }
0x1446   : > { %3082 = vrcp.f32 %v2090_v47 }
0x1447   : > { %v2134_v50 = vpop.f32.mrf.mxu1 }
0x1448   : > { %v2140_v52 = vand.u32 2147483647, %v2134_v50 }
0x144a   : > { %v2144_v55 = vsel %vm278_vm1, %v2140_v52, -inf }
0x144b   : > { %v2146_v57 = vmax.f32 %v2143_v54, %v2144_v55 }
0x144c   : > { %v3083_v58 = vpop.eup %3082 }
0x144d   : > { %v2095_v59 = vmul.f32 %v3083_v58, %v2066_v22  ;;  %v2147_v60 = vmax.f32 %v2145_v56, %v2146_v57  ;;  %v2094_v61 = vmul.f32 %v3083_v58, %v2063_v15  ;;  %v2093_v62 = vmul.f32 %v3083_v58, %v3741_v14 }
0x144e   : > { %v2092_v63 = vmul.f32 %v3083_v58, %v3739_v9 }
0x144f   : > { %2188 = vmatpush.msra.mxu2 %v2095_v59  ;;  %2148 = vmax.xlane.f32.xlu1 %v2147_v60 }
0x1451   : > { %2189 = vmatpush.msra.mxu2 %v2094_v61 }
0x1453   : > { %2190 = vmatpush.msra.mxu2 %v2093_v62 }
0x1455   : > { %2191 = vmatpush.msra.mxu2 %v2092_v63 }
0x1456   : > { %2825 = vmatmul.msk.f32.vlgmr.msra.gmra.mxu2 %vm278_vm1, %v2092_v63 }
0x145e   : > { %2826 = vmatmul.msk.f32.gmra.mxu2 %vm278_vm1, %v2093_v62 }
0x1466   : > { %2827 = vmatmul.msk.f32.gmra.mxu2 %vm278_vm1, %v2094_v61 }
0x146e   : > { %2828 = vmatmul.msk.f32.gmra.mxu2 %vm278_vm1, %v2095_v59 }
0x14c2   : > { %v2149_v0 = vpop.xlane.xlu1 %2148 }
0x14c3   : > { %v2150_v1 = vrot.slane %v2149_v0, 4 }
0x14c5   : > { %v2151_v2 = vmax.f32 %v2149_v0, %v2150_v1 }
0x14c7   : > { %v2152_v3 = vrot.slane %v2151_v2, 2 }
0x14c9   : > { %v2153_v4 = vmax.f32 %v2151_v2, %v2152_v3 }
0x14cb   : > { %v2154_v5 = vrot.slane %v2153_v4, 1 }
0x14cd   : > { %v2155_v6 = vmax.f32 %v2153_v4, %v2154_v5 }
0x14cf   : > { %2941 = vpush %v2155_v6 }
0x14d9   : > { %v3771_v7 = vpop.f32.mrf.mxu2 }
0x14da   : > { %v2205_v15 = vand.u32 2147483647, %v3771_v7 }
0x14dc   : > { %v2209_v24 = vsel %vm278_vm1, %v2205_v15, -inf }
0x14e1   : > { %v3773_v8 = vpop.f32.mrf.mxu2 }
0x14e2   : > { %v2206_v14 = vand.u32 2147483647, %v3773_v8 }
0x14e4   : > { %v2210_v21 = vsel %vm278_vm1, %v2206_v14, -inf }
0x14e5   : > { %v2213_v27 = vmax.f32 %v2209_v24, %v2210_v21 }
0x14e9   : > { %v2199_v9 = vpop.f32.mrf.mxu2 }
0x14ea   : > { %v2207_v16 = vand.u32 2147483647, %v2199_v9 }
0x14ec   : > { %v2211_v25 = vsel %vm278_vm1, %v2207_v16, -inf }
0x14f1   : > { %v2202_v20 = vpop.f32.mrf.mxu2 }
0x14f2   : > { %v2208_v22 = vand.u32 2147483647, %v2202_v20 }
0x14f4   : > { %v2212_v26 = vsel %vm278_vm1, %v2208_v22, -inf }
0x14f5   : > { %v2214_v28 = vmax.f32 %v2211_v25, %v2212_v26 }
0x14f7   : > { %v2215_v29 = vmax.f32 %v2213_v27, %v2214_v28 }
0x14f9   : > { %2216 = vmax.xlane.f32.xlu2 %v2215_v29 }
0x1500   : > { %s2942_s19 = spop %2941 }
0x1501   : > { %v2157_v30 = vstv %s2942_s19 }
0x1502   : > { %v2158_v31 = vadd.f32 1e-37, %v2157_v30 }
0x1504   : > { %3084 = vrcp.f32 %v2158_v31 }
0x150a   : > { %v3085_v32 = vpop.eup %3084 }
0x150b   : > { %v2163_v33 = vmul.f32 %v3085_v32, %v2134_v50  ;;  %v2162_v19 = vmul.f32 %v3085_v32, %v2131_v44  ;;  %v2161_v34 = vmul.f32 %v3085_v32, %v3757_v43  ;;  %v2160_v17 = vmul.f32 %v3085_v32, %v3755_v42 }
0x150d   : > { %2256 = vmatpush.msra.mxu3 %v2163_v33 }
0x150f   : > { %2257 = vmatpush.msra.mxu3 %v2162_v19 }
0x1511   : > { %2258 = vmatpush.msra.mxu3 %v2161_v34 }
0x1513   : > { %2259 = vmatpush.msra.mxu3 %v2160_v17 }
0x1514   : > { %2829 = vmatmul.msk.f32.vlgmr.msra.gmra.mxu3 %vm278_vm1, %v2160_v17 }
0x151c   : > { %2830 = vmatmul.msk.f32.gmra.mxu3 %vm278_vm1, %v2161_v34 }
0x1524   : > { %2831 = vmatmul.msk.f32.gmra.mxu3 %vm278_vm1, %v2162_v19 }
0x152c   : > { %2832 = vmatmul.msk.f32.gmra.mxu3 %vm278_vm1, %v2163_v33 }
0x156c   : > { %v2217_v35 = vpop.xlane.xlu2 %2216 }
0x156d   : > { %v2218_v36 = vrot.slane %v2217_v35, 4 }
0x156f   : > { %v2219_v37 = vmax.f32 %v2217_v35, %v2218_v36 }
0x1571   : > { %v2220_v23 = vrot.slane %v2219_v37, 2 }
0x1573   : > { %v2221_v38 = vmax.f32 %v2219_v37, %v2220_v23 }
0x1575   : > { %v2222_v18 = vrot.slane %v2221_v38, 1 }
0x1577   : > { %v2223_v39 = vmax.f32 %v2221_v38, %v2222_v18 }
0x1579   : > { %2943 = vpush %v2223_v39 }
0x1597   : > { %v3787_v40 = vpop.f32.mrf.mxu3 }
0x1598   : > { %v2273_v46 = vand.u32 2147483647, %v3787_v40 }
0x159a   : > { %v2277_v51 = vsel %vm278_vm1, %v2273_v46, -inf }
0x159f   : > { %v3789_v41 = vpop.f32.mrf.mxu3 }
0x15a0   : > { %v2274_v44 = vand.u32 2147483647, %v3789_v41 }
0x15a2   : > { %v2278_v49 = vsel %vm278_vm1, %v2274_v44, -inf }
0x15a3   : > { %v2281_v54 = vmax.f32 %v2277_v51, %v2278_v49 }
0x15a7   : > { %v2267_v42 = vpop.f32.mrf.mxu3 }
0x15a8   : > { %v2275_v47 = vand.u32 2147483647, %v2267_v42 }
0x15aa   : > { %s2944_s20 = spop %2943  ;;  %v2279_v52 = vsel %vm278_vm1, %v2275_v47, -inf }
0x15ab   : > { %v2225_v43 = vstv %s2944_s20 }
0x15ac   : > { %v2226_v45 = vadd.f32 1e-37, %v2225_v43 }
0x15ae   : > { %3086 = vrcp.f32 %v2226_v45 }
0x15af   : > { %v2270_v48 = vpop.f32.mrf.mxu3 }
0x15b0   : > { %v2276_v50 = vand.u32 2147483647, %v2270_v48 }
0x15b2   : > { %v2280_v53 = vsel %vm278_vm1, %v2276_v50, -inf }
0x15b3   : > { %v2282_v55 = vmax.f32 %v2279_v52, %v2280_v53 }
0x15b4   : > { %v3087_v56 = vpop.eup %3086 }
0x15b5   : > { %v2231_v57 = vmul.f32 %v3087_v56, %v2202_v20  ;;  %v2283_v58 = vmax.f32 %v2281_v54, %v2282_v55  ;;  %v2230_v59 = vmul.f32 %v3087_v56, %v2199_v9  ;;  %v2229_v60 = vmul.f32 %v3087_v56, %v3773_v8 }
0x15b6   : > { %v2228_v61 = vmul.f32 %v3087_v56, %v3771_v7 }
0x15b7   : > { %2324 = vmatpush.msrb.mxu0 %v2231_v57  ;;  %2284 = vmax.xlane.f32.xlu0 %v2283_v58 }
0x15b9   : > { %2325 = vmatpush.msrb.mxu0 %v2230_v59 }
0x15bb   : > { %2326 = vmatpush.msrb.mxu0 %v2229_v60 }
0x15bd   : > { %2327 = vmatpush.msrb.mxu0 %v2228_v61 }
0x15be   : > { %2833 = vmatmul.msk.f32.vlgmr.msrb.gmra.mxu0 %vm278_vm1, %v2228_v61  ;;  %v3103_v61 = vld [vmem:[#allocation2 + $0x8] sm:$0xff] }
0x15c6   : > { %2834 = vmatmul.msk.f32.gmra.mxu0 %vm278_vm1, %v2229_v60  ;;  %v3102_v60 = vld [vmem:[#allocation2] sm:$0xff] }
0x15ce   : > { %2835 = vmatmul.msk.f32.gmra.mxu0 %vm278_vm1, %v2230_v59 }
0x15d6   : > { %2836 = vmatmul.msk.f32.gmra.mxu0 %vm278_vm1, %v2231_v57 }
0x162a   : > { %v2285_v62 = vpop.xlane.xlu0 %2284 }
0x162b   : > { %v2286_v63 = vrot.slane %v2285_v62, 4 }
0x162d   : > { %v2287_v0 = vmax.f32 %v2285_v62, %v2286_v63  ;;  %v3104_v62 = vld [vmem:[#allocation2 + $0x10] sm:$0xff]  ;;  %v3105_v63 = vld [vmem:[#allocation2 + $0x18] sm:$0xff] }
0x162f   : > { %v2288_v1 = vrot.slane %v2287_v0, 2 }
0x1631   : > { %v2289_v2 = vmax.f32 %v2287_v0, %v2288_v1 }
0x1633   : > { %v2290_v3 = vrot.slane %v2289_v2, 1 }
0x1635   : > { %v2291_v4 = vmax.f32 %v2289_v2, %v2290_v3 }
0x1637   : > { %2945 = vpush %v2291_v4 }
0x163b   : > { %v3803_v5 = vpop.f32.mrf.mxu0 }
0x163c   : > { %v2341_v9 = vand.u32 2147483647, %v3803_v5 }
0x163e   : > { %v2345_v21 = vsel %vm278_vm1, %v2341_v9, -inf }
0x1643   : > { %v3805_v6 = vpop.f32.mrf.mxu0 }
0x1644   : > { %v2342_v8 = vand.u32 2147483647, %v3805_v6 }
0x1646   : > { %v2346_v16 = vsel %vm278_vm1, %v2342_v8, -inf }
0x1647   : > { %v2349_v25 = vmax.f32 %v2345_v21, %v2346_v16 }
0x164b   : > { %v2335_v7 = vpop.f32.mrf.mxu0 }
0x164c   : > { %v2343_v14 = vand.u32 2147483647, %v2335_v7 }
0x164e   : > { %v2347_v22 = vsel %vm278_vm1, %v2343_v14, -inf }
0x1653   : > { %v2338_v15 = vpop.f32.mrf.mxu0 }
0x1654   : > { %v2344_v20 = vand.u32 2147483647, %v2338_v15 }
0x1656   : > { %v2348_v24 = vsel %vm278_vm1, %v2344_v20, -inf }
0x1657   : > { %v2350_v26 = vmax.f32 %v2347_v22, %v2348_v24 }
0x1659   : > { %v2351_v27 = vmax.f32 %v2349_v25, %v2350_v26 }
0x165b   : > { %2352 = vmax.xlane.f32.xlu1 %v2351_v27 }
0x1668   : > { %s2946_s21 = spop %2945 }
0x1669   : > { %v2293_v28 = vstv %s2946_s21 }
0x166a   : > { %v2294_v29 = vadd.f32 1e-37, %v2293_v28 }
0x166c   : > { %3088 = vrcp.f32 %v2294_v29 }
0x1672   : > { %v3089_v30 = vpop.eup %3088 }
0x1673   : > { %v2299_v31 = vmul.f32 %v3089_v30, %v2270_v48  ;;  %v2298_v32 = vmul.f32 %v3089_v30, %v2267_v42  ;;  %v2297_v33 = vmul.f32 %v3089_v30, %v3789_v41  ;;  %v2296_v19 = vmul.f32 %v3089_v30, %v3787_v40 }
0x1675   : > { %2392 = vmatpush.msrb.mxu1 %v2299_v31 }
0x1677   : > { %2393 = vmatpush.msrb.mxu1 %v2298_v32 }
0x1679   : > { %2394 = vmatpush.msrb.mxu1 %v2297_v33 }
0x167b   : > { %2395 = vmatpush.msrb.mxu1 %v2296_v19 }
0x167c   : > { %2837 = vmatmul.msk.f32.vlgmr.msrb.gmra.mxu1 %vm278_vm1, %v2296_v19 }
0x1684   : > { %2838 = vmatmul.msk.f32.gmra.mxu1 %vm278_vm1, %v2297_v33 }
0x168c   : > { %2839 = vmatmul.msk.f32.gmra.mxu1 %vm278_vm1, %v2298_v32 }
0x1694   : > { %2840 = vmatmul.msk.f32.gmra.mxu1 %vm278_vm1, %v2299_v31 }
0x16ce   : > { %v2353_v34 = vpop.xlane.xlu1 %2352 }
0x16cf   : > { %v2354_v17 = vrot.slane %v2353_v34, 4 }
0x16d1   : > { %v2355_v35 = vmax.f32 %v2353_v34, %v2354_v17 }
0x16d3   : > { %v2356_v36 = vrot.slane %v2355_v35, 2 }
0x16d5   : > { %v2357_v37 = vmax.f32 %v2355_v35, %v2356_v36 }
0x16d7   : > { %v2358_v23 = vrot.slane %v2357_v37, 1 }
0x16d9   : > { %v2359_v38 = vmax.f32 %v2357_v37, %v2358_v23 }
0x16db   : > { %2947 = vpush %v2359_v38 }
0x16f9   : > { %v3819_v18 = vpop.f32.mrf.mxu1 }
0x16fa   : > { %v2409_v44 = vand.u32 2147483647, %v3819_v18 }
0x16fc   : > { %v2413_v49 = vsel %vm278_vm1, %v2409_v44, -inf }
0x1701   : > { %v3821_v39 = vpop.f32.mrf.mxu1 }
0x1702   : > { %v2410_v42 = vand.u32 2147483647, %v3821_v39 }
0x1704   : > { %v2414_v47 = vsel %vm278_vm1, %v2410_v42, -inf }
0x1705   : > { %v2417_v52 = vmax.f32 %v2413_v49, %v2414_v47 }
0x1709   : > { %v3823_v40 = vpop.f32.mrf.mxu1 }
0x170a   : > { %v2411_v45 = vand.u32 2147483647, %v3823_v40 }
0x170c   : > { %s2948_s22 = spop %2947  ;;  %v2415_v50 = vsel %vm278_vm1, %v2411_v45, -inf }
0x170d   : > { %v2361_v41 = vstv %s2948_s22 }
0x170e   : > { %v2362_v43 = vadd.f32 1e-37, %v2361_v41 }
0x1710   : > { %3090 = vrcp.f32 %v2362_v43 }
0x1711   : > { %v3828_v46 = vpop.f32.mrf.mxu1 }
0x1712   : > { %v2412_v48 = vand.u32 2147483647, %v3828_v46 }
0x1714   : > { %v2416_v51 = vsel %vm278_vm1, %v2412_v48, -inf }
0x1715   : > { %v2418_v53 = vmax.f32 %v2415_v50, %v2416_v51 }
0x1716   : > { %v3091_v54 = vpop.eup %3090 }
0x1717   : > { %v2367_v55 = vmul.f32 %v3091_v54, %v2338_v15  ;;  %v2419_v56 = vmax.f32 %v2417_v52, %v2418_v53  ;;  %v2366_v57 = vmul.f32 %v3091_v54, %v2335_v7  ;;  %v2365_v58 = vmul.f32 %v3091_v54, %v3805_v6 }
0x1718   : > { %v2364_v59 = vmul.f32 %v3091_v54, %v3803_v5 }
0x1719   : > { %2460 = vmatpush.msrb.mxu2 %v2367_v55  ;;  %2420 = vmax.xlane.f32.xlu2 %v2419_v56  ;;  %v2495_v0 = vmul.f32 %v2365_v58, %v2365_v58  ;;  %v2496_v4 = vmul.f32 %v2366_v57, %v2366_v57  ;;  %v2497_v6 = vmul.f32 %v2367_v55, %v2367_v55 }
0x171a   : > { %v2494_v1 = vmul.f32 %v2364_v59, %v2364_v59 }
0x171b   : > { %2461 = vmatpush.msrb.mxu2 %v2366_v57  ;;  %v2499_v2 = vsel %vm278_vm1, %v2495_v0, 0.0  ;;  %v2501_v7 = vsel %vm278_vm1, %v2496_v4, 0.0  ;;  %v2503_v15 = vsel %vm278_vm1, %v2497_v6, 0.0 }
0x171c   : > { %v2498_v3 = vsel %vm278_vm1, %v2494_v1, 0.0 }
0x171d   : > { %2462 = vmatpush.msrb.mxu2 %v2365_v58  ;;  %v2500_v5 = vadd.f32 %v2499_v2, %v2498_v3 }
0x171f   : > { %2463 = vmatpush.msrb.mxu2 %v2364_v59  ;;  %v2502_v8 = vadd.f32 %v2501_v7, %v2500_v5 }
0x1720   : > { %2841 = vmatmul.msk.f32.vlgmr.msrb.gmra.mxu2 %vm278_vm1, %v3102_v60 }
0x1721   : > { %v2504_v20 = vadd.f32 %v2503_v15, %v2502_v8 }
0x1723   : > { %v2505_v24 = vrot.slane %v2504_v20, 4 }
0x1725   : > { %v2506_v27 = vadd.f32 %v2505_v24, %v2504_v20 }
0x1727   : > { %v2507_v28 = vrot.slane %v2506_v27, 2 }
0x1728   : > { %2842 = vmatmul.msk.f32.gmra.mxu2 %vm278_vm1, %v3103_v61 }
0x1729   : > { %v2508_v29 = vadd.f32 %v2507_v28, %v2506_v27 }
0x172b   : > { %v2509_v31 = vrot.slane %v2508_v29, 1 }
0x172d   : > { %v2510_v32 = vadd.f32 %v2509_v31, %v2508_v29 }
0x172f   : > { %v2511_v19 = vadd.f32 1e-37, %v2510_v32 }
0x1730   : > { %2843 = vmatmul.msk.f32.gmra.mxu2 %vm278_vm1, %v3104_v62 }
0x1731   : > { %3092 = vrcp.f32 %v2511_v19  ;;  %vm2517_vm7 = vweird.f32 %v2511_v19 }
0x1737   : > { %v3093_v35 = vpop.eup %3092 }
0x1738   : > { %2844 = vmatmul.msk.f32.gmra.mxu2 %vm278_vm1, %v3105_v63  ;;  %v2513_v38 = vmul.f32 %v3093_v35, %v2511_v19  ;;  %vm2518_vm6 = vweird.f32 %v3093_v35 }
0x1739   : > { %vm2519_vm8 = vmor %vm2517_vm7, %vm2518_vm6 }
0x173a   : > { %v2514_v48 = vsub.f32 1.0, %v2513_v38 }
0x173c   : > { %v2515_v52 = vmul.f32 %v3093_v35, %v2514_v48 }
0x173e   : > { %v2516_v56 = vadd.f32 %v3093_v35, %v2515_v52 }
0x1740   : > { %v2520_v61 = vsel %vm2519_vm8, %v3093_v35, %v2516_v56 }
0x178c   : > { %v2421_v9 = vpop.xlane.xlu2 %2420 }
0x178d   : > { %v2422_v14 = vrot.slane %v2421_v9, 4 }
0x178f   : > { %v2423_v16 = vmax.f32 %v2421_v9, %v2422_v14 }
0x1791   : > { %v2424_v21 = vrot.slane %v2423_v16, 2 }
0x1793   : > { %v2425_v22 = vmax.f32 %v2423_v16, %v2424_v21 }
0x1795   : > { %v2426_v25 = vrot.slane %v2425_v22, 1 }
0x1797   : > { %v2427_v26 = vmax.f32 %v2425_v22, %v2426_v25 }
0x1799   : > { %2949 = vpush %v2427_v26 }
0x17a3   : > { %v2465_v30 = vpop.f32.mrf.mxu2 }
0x17a4   : > { %v2477_v36 = vmul.f32 %v2465_v30, %v2364_v59  ;;  %v2521_v59 = vand.u32 2147483647, %v2511_v19 }
0x17a6   : > { %v2481_v41 = vsel %vm278_vm1, %v2477_v36, 0.0  ;;  %vm2522_vm9 = vcmp.eq.f32.partialorder %v2521_v59, 8.507059e+37 }
0x17ab   : > { %v2468_v33 = vpop.f32.mrf.mxu2 }
0x17ac   : > { %v2478_v17 = vmul.f32 %v2468_v33, %v2365_v58 }
0x17ae   : > { %v2482_v23 = vsel %vm278_vm1, %v2478_v17, 0.0 }
0x17af   : > { %v2483_v43 = vadd.f32 %v2482_v23, %v2481_v41 }
0x17b3   : > { %v2471_v34 = vpop.f32.mrf.mxu2 }
0x17b4   : > { %v2479_v37 = vmul.f32 %v2471_v34, %v2366_v57  ;;  %v2523_v57 = vand.u32 2147483648, %v2511_v19 }
0x17b6   : > { %v2484_v42 = vsel %vm278_vm1, %v2479_v37, 0.0 }
0x17b7   : > { %v2485_v47 = vadd.f32 %v2484_v42, %v2483_v43 }
0x17bb   : > { %v2474_v44 = vpop.f32.mrf.mxu2 }
0x17bc   : > { %v2480_v45 = vmul.f32 %v2474_v44, %v2367_v55  ;;  %v2524_v55 = vor.u32 1.1754944e-38, %v2523_v57 }
0x17be   : > { %v2486_v49 = vsel %vm278_vm1, %v2480_v45, 0.0  ;;  %v2525_v1 = vsel %vm2522_vm9, %v2524_v55, %v2520_v61 }
0x17bf   : > { %v2487_v50 = vadd.f32 %v2486_v49, %v2485_v47 }
0x17c1   : > { %v2488_v51 = vrot.slane %v2487_v50, 4 }
0x17c3   : > { %v2489_v53 = vadd.f32 %v2488_v51, %v2487_v50 }
0x17c5   : > { %v2490_v54 = vrot.slane %v2489_v53, 2 }
0x17c7   : > { %v2491_v58 = vadd.f32 %v2490_v54, %v2489_v53 }
0x17c9   : > { %v2492_v60 = vrot.slane %v2491_v58, 1 }
0x17ca   : > { %s2950_s23 = spop %2949 }
0x17cb   : > { %v2429_v62 = vstv %s2950_s23  ;;  %v2493_v63 = vadd.f32 %v2492_v60, %v2491_v58 }
0x17cc   : > { %v2430_v0 = vadd.f32 1e-37, %v2429_v62 }
0x17cd   : > { %v2526_v2 = vmul.f32 %v2525_v1, %v2493_v63 }
0x17ce   : > { %3094 = vrcp.f32 %v2430_v0 }
0x17cf   : > { %v2527_v3 = vsel %vm278_vm1, %v2526_v2, -inf }
0x17d0   : > { %2528 = vmax.xlane.f32.xlu0 %v2527_v3 }
0x17d4   : > { %v3095_v4 = vpop.eup %3094 }
0x17d5   : > { %v2435_v5 = vmul.f32 %v3095_v4, %v3828_v46  ;;  %v2434_v6 = vmul.f32 %v3095_v4, %v3823_v40  ;;  %v2433_v7 = vmul.f32 %v3095_v4, %v3821_v39  ;;  %v2432_v8 = vmul.f32 %v3095_v4, %v3819_v18 }
0x17d7   : > { %2556 = vmatpush.msrb.mxu3 %v2435_v5  ;;  %v2591_v40 = vmul.f32 %v2433_v7, %v2433_v7  ;;  %v2590_v46 = vmul.f32 %v2432_v8, %v2432_v8  ;;  %v2592_v14 = vmul.f32 %v2434_v6, %v2434_v6 }
0x17d9   : > { %2557 = vmatpush.msrb.mxu3 %v2434_v6  ;;  %v2595_v39 = vsel %vm278_vm1, %v2591_v40, 0.0  ;;  %v2594_v9 = vsel %vm278_vm1, %v2590_v46, 0.0  ;;  %v2597_v16 = vsel %vm278_vm1, %v2592_v14, 0.0 }
0x17da   : > { %v2596_v15 = vadd.f32 %v2595_v39, %v2594_v9 }
0x17db   : > { %2558 = vmatpush.msrb.mxu3 %v2433_v7 }
0x17dd   : > { %2559 = vmatpush.msrb.mxu3 %v2432_v8 }
0x17de   : > { %2845 = vmatmul.msk.f32.vlgmr.msrb.gmra.mxu3 %vm278_vm1, %v3326_v10  ;;  %v2593_v10 = vmul.f32 %v2435_v5, %v2435_v5 }
0x17e0   : > { %v2599_v20 = vsel %vm278_vm1, %v2593_v10, 0.0 }
0x17e6   : > { %2846 = vmatmul.msk.f32.gmra.mxu3 %vm278_vm1, %v3329_v11  ;;  %v2598_v11 = vadd.f32 %v2597_v16, %v2596_v15 }
0x17ee   : > { %2847 = vmatmul.msk.f32.gmra.mxu3 %vm278_vm1, %v3332_v12  ;;  %v2600_v12 = vadd.f32 %v2599_v20, %v2598_v11 }
0x17f0   : > { %v2601_v21 = vrot.slane %v2600_v12, 4 }
0x17f2   : > { %v2602_v22 = vadd.f32 %v2601_v21, %v2600_v12 }
0x17f6   : > { %2848 = vmatmul.msk.f32.gmra.mxu3 %vm278_vm1, %v3335_v13  ;;  %v2603_v13 = vrot.slane %v2602_v22, 2 }
0x17f8   : > { %v2604_v24 = vadd.f32 %v2603_v13, %v2602_v22 }
0x17fa   : > { %v2605_v26 = vrot.slane %v2604_v24, 1 }
0x17fc   : > { %v2606_v27 = vadd.f32 %v2605_v26, %v2604_v24 }
0x17fe   : > { %v2607_v29 = vadd.f32 1e-37, %v2606_v27 }
0x1800   : > { %3096 = vrcp.f32 %v2607_v29  ;;  %v2619_v51 = vand.u32 2147483648, %v2607_v29  ;;  %vm2613_vm11 = vweird.f32 %v2607_v29  ;;  %v2617_v53 = vand.u32 2147483647, %v2607_v29 }
0x1802   : > { %v2620_v57 = vor.u32 1.1754944e-38, %v2619_v51  ;;  %vm2618_vm13 = vcmp.eq.f32.partialorder %v2617_v53, 8.507059e+37 }
0x1806   : > { %v3097_v32 = vpop.eup %3096 }
0x1807   : > { %v2609_v17 = vmul.f32 %v3097_v32, %v2607_v29  ;;  %vm2614_vm10 = vweird.f32 %v3097_v32 }
0x1808   : > { %vm2615_vm12 = vmor %vm2613_vm11, %vm2614_vm10 }
0x1809   : > { %v2610_v42 = vsub.f32 1.0, %v2609_v17 }
0x180b   : > { %v2611_v47 = vmul.f32 %v3097_v32, %v2610_v42 }
0x180d   : > { %v2612_v50 = vadd.f32 %v3097_v32, %v2611_v47 }
0x180f   : > { %v2616_v56 = vsel %vm2615_vm12, %v3097_v32, %v2612_v50 }
0x1810   : > { %v2621_v59 = vsel %vm2618_vm13, %v2620_v57, %v2616_v56 }
0x1843   : > { %v2529_v18 = vpop.xlane.xlu0 %2528 }
0x1844   : > { %2951 = vpush %v2529_v18 }
0x1861   : > { %v2561_v25 = vpop.f32.mrf.mxu3 }
0x1862   : > { %v2573_v33 = vmul.f32 %v2561_v25, %v2432_v8 }
0x1864   : > { %v2577_v35 = vsel %vm278_vm1, %v2573_v33, 0.0 }
0x1869   : > { %v2564_v28 = vpop.f32.mrf.mxu3 }
0x186a   : > { %v2574_v31 = vmul.f32 %v2564_v28, %v2433_v7 }
0x186c   : > { %v2578_v34 = vsel %vm278_vm1, %v2574_v31, 0.0 }
0x186d   : > { %v2579_v37 = vadd.f32 %v2578_v34, %v2577_v35 }
0x1871   : > { %v2567_v30 = vpop.f32.mrf.mxu3 }
0x1872   : > { %v2575_v19 = vmul.f32 %v2567_v30, %v2434_v6 }
0x1874   : > { %v2580_v36 = vsel %vm278_vm1, %v2575_v19, 0.0 }
0x1875   : > { %v2581_v41 = vadd.f32 %v2580_v36, %v2579_v37  ;;  %s2952_s24 = spop %2951 }
0x1879   : > { %v2570_v23 = vpop.f32.mrf.mxu3 }
0x187a   : > { %v2576_v38 = vmul.f32 %v2570_v23, %v2435_v5 }
0x187c   : > { %v2582_v43 = vsel %vm278_vm1, %v2576_v38, 0.0 }
0x187d   : > { %v2583_v44 = vadd.f32 %v2582_v43, %v2581_v41 }
0x187f   : > { %v2584_v45 = vrot.slane %v2583_v44, 4 }
0x1881   : > { %v2585_v48 = vadd.f32 %v2584_v45, %v2583_v44 }
0x1883   : > { %v2586_v49 = vrot.slane %v2585_v48, 2 }
0x1885   : > { %v2587_v52 = vadd.f32 %v2586_v49, %v2585_v48 }
0x1887   : > { %v2588_v54 = vrot.slane %v2587_v52, 1 }
0x1889   : > { %v2589_v58 = vadd.f32 %v2588_v54, %v2587_v52 }
0x188b   : > { %v2622_v60 = vmul.f32 %v2621_v59, %v2589_v58 }
0x188d   : > { %v2623_v61 = vsel %vm278_vm1, %v2622_v60, -inf }
0x188e   : > { %2624 = vmax.xlane.f32.xlu1 %v2623_v61 }
0x1901   : > { %v2625_v55 = vpop.xlane.xlu1 %2624 }
0x1902   : > { %2953 = vpush %v2625_v55 }
0x1933   : > { %s2954_s25 = spop %2953 }
0x1934   : > { %s2627_s26 = ssub.f32 %s3322_s16, %s2954_s25  ;;  %s2531_s16 = smax.f32 %s3135_s15, %s2952_s24 }
0x1936   : > { %s2628_s27 = smax.f32 %s3135_s15, %s2627_s26 }
0x1937   : > { %v2629_v62 = vstv %s2628_s27 }
0x1938   : > { %3098 = vrcp.f32 %v2629_v62  ;;  %v2641_v2 = vand.u32 2147483648, %v2629_v62  ;;  %v2639_v4 = vand.u32 2147483647, %v2629_v62  ;;  %vm2635_vm15 = vweird.f32 %v2629_v62 }
0x193a   : > { %v2642_v6 = vor.u32 1.1754944e-38, %v2641_v2  ;;  %vm2640_vm1 = vcmp.eq.f32.partialorder %v2639_v4, 8.507059e+37 }
0x193e   : > { %v3099_v63 = vpop.eup %3098 }
0x193f   : > { %v2631_v0 = vmul.f32 %v3099_v63, %v2629_v62  ;;  %vm2636_vm14 = vweird.f32 %v3099_v63 }
0x1940   : > { %vm2637_vm0 = vmor %vm2635_vm15, %vm2636_vm14 }
0x1941   : > { %v2632_v1 = vsub.f32 1.0, %v2631_v0 }
0x1943   : > { %v2633_v3 = vmul.f32 %v3099_v63, %v2632_v1 }
0x1945   : > { %v2634_v5 = vadd.f32 %v3099_v63, %v2633_v3 }
0x1947   : > { %v2638_v7 = vsel %vm2637_vm0, %v3099_v63, %v2634_v5 }
0x1948   : > { %v2643_v8 = vsel %vm2640_vm1, %v2642_v6, %v2638_v7 }
0x1949   : > { %2955 = vpush %v2643_v8 }
0x197a   : > { %s2956_s28 = spop %2955 }
0x197b   : > { %s2645_s29 = smul.f32 %s2956_s28, %s2531_s16 }
0x197d   : > { %v2646_v40 = vstv %s2645_s29 }
0x197e   : > { %3100 = vrsqrt.f32 %v2646_v40  ;;  %vm2654_vm2 = vcmp.eq.f32.partialorder %v2646_v40, inf  ;;  %v2657_v16 = vand.u32 2147483648, %v2646_v40  ;;  %vm2656_vm3 = vcmp.eq.f32.partialorder %v2646_v40, 0.0 }
0x1984   : > { %v3101_v46 = vpop.eup %3100 }
0x1985   : > { %v2648_v39 = vmul.f32 %v3101_v46, %v2646_v40 }
0x1987   : > { %v2649_v9 = vmul.f32 %v3101_v46, %v2648_v39 }
0x1989   : > { %v2650_v18 = vmul.f32 0.5, %v2649_v9 }
0x198b   : > { %v2651_v14 = vsub.f32 1.5, %v2650_v18 }
0x198d   : > { %v2652_v15 = vmul.f32 %v3101_v46, %v2651_v14 }
0x198f   : > { %v2653_v10 = vmul.f32 %v2652_v15, %v2646_v40 }
0x1991   : > { %v2655_v11 = vsel %vm2654_vm2, %v2646_v40, %v2653_v10 }
0x1992   : > { %v2658_v20 = vsel %vm2656_vm3, %v2657_v16, %v2655_v11 }
0x1993   : > { %2957 = vpush %v2658_v20 }
0x19c4   : > { %s2958_s30 = spop %2957 }
0x19c5   : > { %2661 = sst [smem:[#allocation3]] %s2958_s30 }
0x19c6 PF: > { %p2963_p6 = scmp.eq.s32.totalorder %s3153_s7, 1  ;;  %s2668_s3 = sshll.u32 %s3882_s1, 4  ;;  %s2669_s3 = int_to_ptr.hbm [resolvable:$true] %s2668_s3 }
0x19c7   : > { %s3136_s4 = smov [#allocation3]  }
0x19c8   : > { %2960 = dma.smem_to_hbm (%p2963_p6), %s3136_s4, 16, %s2669_s3, [#allocation4]  }
0x19c9   : > { %3125 = dma.done.wait (%p2963_p6), [#allocation4], 16  }
0x19ca   : > { %3127 = vsyncadd (%p2963_p6), [#allocation4], 4294967280 }
0x19cb   : > { %2677 = sfence }
0x19cc PF: > { %s12_s6 = sadd.s32 1, %s3130_s6  }
0x19cd   : > { %p9_p7 = scmp.ge.s32.totalorder %s12_s6, 4  }
0x19cf   :  { %11 = sbr.rel (!%p9_p7) target bundleno = 1 (0x1), region = 61 }
0x19d4   :  { %2683 = vsyncpa [#allocation4], 1 }
0x19d5   :  { %2685 = vsyncpa [#allocation4 + $0x1], 1 }

</bundles_post_ra>
